<compile_context>
chip_gen: v6e
topology: v6e:2x2x1
jax: 0.10.0
libtpu: 0.0.40
codegen_flags: <defaults>
</compile_context>

<pallas_src>
import functools

import numpy as np
import jax
import jax.numpy as jnp
from jax import lax
from jax.experimental import pallas as pl
from jax.experimental.pallas import tpu as pltpu


def _bot_attention_kernel(x_cn_ref, w_ref, r_ref, out_ref, qkv_ref, *, head_num):
    """One batch step.

    x_cn_ref : (1, C, N)   bf16  input pixels, channel-first
    w_ref    : (3C, C)     bf16  packed [Wq*scale; Wk; Wv] (all heads)
    r_ref    : (hn, d, N)  f32   relative-position embedding per head
    out_ref  : (1, C, N)         output (x dtype)
    qkv_ref  : (3C, N)     f32   VMEM scratch holding the fused projection
    """
    C = x_cn_ref.shape[1]
    d = C // head_num

    # Single packed projection for q, k, v over all heads:
    # (3C, C) @ (C, N) -> (3C, N), f32 MXU accumulation. Scale is pre-folded into the Wq rows.
    qkv_ref[...] = jnp.dot(w_ref[...], x_cn_ref[0],
                           preferred_element_type=jnp.float32)

    # Heads processed in a statically-unrolled loop; all slices are static and
    # sublane-aligned (d is a multiple of 8 at these sizes).
    for h in range(head_num):
        q = qkv_ref[pl.ds(h * d, d), :]                           # (d, N) f32 (pre-scaled)
        # Fuse relative position: q^T k + q^T r = q^T (k + r).
        k = qkv_ref[pl.ds(C + h * d, d), :] + r_ref[h]            # (d, N) f32
        v = qkv_ref[pl.ds(2 * C + h * d, d), :]                   # (d, N) f32

        # Logits s[n, m] = sum_di q[di, n] * k[di, m]  (transposed-LHS contraction).
        s = lax.dot_general(q.astype(jnp.bfloat16), k.astype(jnp.bfloat16),
                            (((0,), (0,)), ((), ())),
                            preferred_element_type=jnp.float32)   # (N, N) f32

        # Softmax along the lane axis, fully in f32 (v5e-safe).
        s = s - jnp.max(s, axis=-1, keepdims=True)
        p = jnp.exp(s)
        attn = p * pl.reciprocal(jnp.sum(p, axis=-1, keepdims=True), approx=True)

        # out[di, n] = sum_m v[di, m] * attn[n, m]  (transposed-RHS contraction).
        o = lax.dot_general(v.astype(jnp.bfloat16), attn.astype(jnp.bfloat16),
                            (((1,), (1,)), ((), ())),
                            preferred_element_type=jnp.float32)   # (d, N) f32

        out_ref[0, pl.ds(h * d, d), :] = o.astype(out_ref.dtype)


def bot_attention(x_nchw, params, *, head_num):
    """x_nchw: (B, C, H, W) float32. Returns (B, C, H, W)."""
    B, C, H, W = x_nchw.shape
    d = C // head_num
    N = H * W

    w = params["w_qkv_packed"]          # (3C, C)   bf16, Wq rows pre-scaled by head_dim**-0.5
    r = params["r"]                     # (hn, d, N) f32

    # Layout plumbing done in the wrapper: NCHW -> (B, C, N) is a pure reshape (no transpose).
    x_cn = x_nchw.reshape(B, C, N).astype(jnp.bfloat16)

    out = pl.pallas_call(
        functools.partial(_bot_attention_kernel, head_num=head_num),
        out_shape=jax.ShapeDtypeStruct((B, C, N), x_nchw.dtype),
        grid=(B,),
        in_specs=[
            pl.BlockSpec((1, C, N), lambda b: (b, 0, 0)),          # x, one batch per step
            pl.BlockSpec((3 * C, C), lambda b: (0, 0)),            # packed qkv weight (resident)
            pl.BlockSpec((head_num, d, N), lambda b: (0, 0, 0)),   # relative position (resident)
        ],
        out_specs=pl.BlockSpec((1, C, N), lambda b: (b, 0, 0)),    # lane-dense (C, 256) slab
        scratch_shapes=[pltpu.VMEM((3 * C, N), jnp.float32)],
        compiler_params=pltpu.CompilerParams(
            dimension_semantics=("parallel",)),
    )(x_cn, w, r)

    return out.reshape(B, C, H, W)


def init_params(key, dim, height, width, head_num):
    """Deterministic synthetic parameters (torch layouts -> kernel layouts)."""
    d = dim // head_num
    N = height * width
    scale = float(d) ** -0.5            # qkv_bias=False path of the module
    k1, k2, k3 = jax.random.split(key, 3)

    # torch: nn.Conv2d(dim, 3*dim, 1, bias=False) weight (3C, C, 1, 1); rw/rh ~ randn.
    w_qkv = jax.random.normal(k1, (3 * dim, dim), jnp.float32) * (dim ** -0.5)
    rw = jax.random.normal(k2, (1, head_num, d, 1, width), jnp.float32)
    rh = jax.random.normal(k3, (1, head_num, d, height, 1), jnp.float32)

    # Kernel layout: fold the softmax scale into the q rows (one-time constant fold on weights).
    w_packed = jnp.concatenate([w_qkv[:dim] * scale, w_qkv[dim:]],
                               axis=0).astype(jnp.bfloat16)        # (3C, C)
    r = (rw + rh).reshape(head_num, d, N)                          # (hn, d, N) f32

    params_kernel = dict(w_qkv_packed=w_packed, r=r)
    params_ref = dict(w_qkv=w_qkv, rw=rw, rh=rh)
    return params_kernel, params_ref


def ref_forward(x, p, head_num):
    """Pure-JAX NCHW reference mirroring the PyTorch module (f32)."""
    B, C, H, W = x.shape
    d = C // head_num
    N = H * W
    scale = float(d) ** -0.5

    xf = x.reshape(B, C, N)
    qkv = jnp.einsum('oc,bcn->bon', p["w_qkv"], xf)                  # 1x1 conv, no bias
    qkv = qkv.reshape(B, 3, head_num, d, N)
    q, k, v = qkv[:, 0], qkv[:, 1], qkv[:, 2]                        # (B, hn, d, N)

    attn_content = jnp.einsum('bhdn,bhdm->bhnm', q, k) * scale
    r = (p["rw"] + p["rh"]).reshape(head_num, d, N)
    attn_position = jnp.einsum('bhdn,hdm->bhnm', q, r) * scale
    attn = jax.nn.softmax(attn_content + attn_position, axis=-1)

    out = jnp.einsum('bhnm,bhdm->bhdn', attn, v)                     # (B, hn, d, N)
    return out.reshape(B, C, H, W)


if __name__ == "__main__":
    # BoTAttention(dim=64, width=16, height=16, head_num=4, qkv_bias=False)
    B, dim, H, W, head_num = 2, 64, 16, 16, 4

    key = jax.random.PRNGKey(0)
    kx, kp = jax.random.split(key)
    x = jax.random.normal(kx, (B, dim, H, W), jnp.float32)
    params_kernel, params_ref = init_params(kp, dim, H, W, head_num)

    out = bot_attention(x, params_kernel, head_num=head_num)
    out = jax.block_until_ready(out)

    ref = ref_forward(x, params_ref, head_num)
    assert out.shape == (B, dim, H, W)
    np.testing.assert_allclose(np.asarray(out), np.asarray(ref), atol=2e-2, rtol=2e-2)

    print("KERNEL_OK")
</pallas_src>

<mosaic_0001>
module attributes {stable_mosaic.version = 11 : i64} {
  func.func @_bot_attention_kernel(%arg0: i32, %arg1: memref<1x64x256xbf16, #tpu.memory_space<vmem>>, %arg2: memref<192x64xbf16, #tpu.memory_space<vmem>>, %arg3: memref<4x16x256xf32, #tpu.memory_space<vmem>>, %arg4: memref<1x64x256xf32, #tpu.memory_space<vmem>>, %arg5: memref<192x256xf32, #tpu.memory_space<vmem>>) attributes {dimension_semantics = [#tpu.dimension_semantics<parallel>], iteration_bounds = array<i64: 2>, scalar_prefetch = 0 : i64, scratch_operands = 1 : i64, tpu.core_type = #tpu.core_type<tc>, window_params = [{transform_indices = @transform_0, window_bounds = array<i64: 1, 64, 256>}, {pipeline_mode = #tpu.pipeline_mode<synchronous>, transform_indices = @transform_1, window_bounds = array<i64: 192, 64>}, {pipeline_mode = #tpu.pipeline_mode<synchronous>, transform_indices = @transform_2, window_bounds = array<i64: 4, 16, 256>}, {transform_indices = @transform_3, window_bounds = array<i64: 1, 64, 256>}]} {
    %c0 = arith.constant 0 : index
    %c0_0 = arith.constant 0 : index
    %0 = vector.load %arg2[%c0, %c0_0] : memref<192x64xbf16, #tpu.memory_space<vmem>>, vector<192x64xbf16>
    %c0_1 = arith.constant 0 : index
    %c0_2 = arith.constant 0 : index
    %c0_3 = arith.constant 0 : index
    %1 = vector.load %arg1[%c0_1, %c0_2, %c0_3] : memref<1x64x256xbf16, #tpu.memory_space<vmem>>, vector<1x64x256xbf16>
    %2 = vector.shape_cast %1 : vector<1x64x256xbf16> to vector<64x256xbf16>
    %cst = arith.constant dense<0.000000e+00> : vector<192x256xf32>
    %3 = tpu.matmul %0, %2, %cst {dimension_numbers = #tpu.dot_dimension_numbers<[1], [0], [0], [1], [0, 0, 1, 1], [], []>} : vector<192x64xbf16>, vector<64x256xbf16>, vector<192x256xf32> -> vector<192x256xf32>
    %c0_4 = arith.constant 0 : index
    %c0_5 = arith.constant 0 : index
    %4 = vector.load %arg5[%c0_4, %c0_5] : memref<192x256xf32, #tpu.memory_space<vmem>>, vector<192x256xf32>
    tpu.vector_store %arg5[%c0_4, %c0_5], %3 {strides = array<i32>} : memref<192x256xf32, #tpu.memory_space<vmem>>, vector<192x256xf32>,
    %c0_6 = arith.constant 0 : index
    %c0_7 = arith.constant 0 : index
    %5 = vector.load %arg5[%c0_6, %c0_7] : memref<192x256xf32, #tpu.memory_space<vmem>>, vector<16x256xf32>
    %c64 = arith.constant 64 : index
    %c0_8 = arith.constant 0 : index
    %6 = vector.load %arg5[%c64, %c0_8] : memref<192x256xf32, #tpu.memory_space<vmem>>, vector<16x256xf32>
    %c0_9 = arith.constant 0 : index
    %c0_10 = arith.constant 0 : index
    %c0_11 = arith.constant 0 : index
    %7 = vector.load %arg3[%c0_9, %c0_10, %c0_11] : memref<4x16x256xf32, #tpu.memory_space<vmem>>, vector<1x16x256xf32>
    %8 = vector.shape_cast %7 : vector<1x16x256xf32> to vector<16x256xf32>
    %9 = arith.addf %6, %8 : vector<16x256xf32>
    %c128 = arith.constant 128 : index
    %c0_12 = arith.constant 0 : index
    %10 = vector.load %arg5[%c128, %c0_12] : memref<192x256xf32, #tpu.memory_space<vmem>>, vector<16x256xf32>
    %11 = arith.truncf %5 : vector<16x256xf32> to vector<16x256xbf16>
    %12 = arith.truncf %9 : vector<16x256xf32> to vector<16x256xbf16>
    %cst_13 = arith.constant dense<0.000000e+00> : vector<256x256xf32>
    %13 = tpu.matmul %11, %12, %cst_13 {dimension_numbers = #tpu.dot_dimension_numbers<[0], [0], [1], [1], [0, 1, 1, 1], [], []>} : vector<16x256xbf16>, vector<16x256xbf16>, vector<256x256xf32> -> vector<256x256xf32>
    %cst_14 = arith.constant dense<0xFF800000> : vector<256xf32>
    %14 = vector.multi_reduction <maximumf>, %13, %cst_14 [1] : vector<256x256xf32> to vector<256xf32>
    %15 = vector.shape_cast %14 : vector<256xf32> to vector<256x1xf32>
    %16 = vector.broadcast %15 : vector<256x1xf32> to vector<256x256xf32>
    %17 = arith.subf %13, %16 : vector<256x256xf32>
    %18 = math.exp %17 : vector<256x256xf32>
    %cst_15 = arith.constant dense<0.000000e+00> : vector<256xf32>
    %19 = vector.multi_reduction <add>, %18, %cst_15 [1] : vector<256x256xf32> to vector<256xf32>
    %20 = vector.shape_cast %19 : vector<256xf32> to vector<256x1xf32>
    %21 = tpu.reciprocal %20 {approx = true} : vector<256x1xf32> -> vector<256x1xf32>
    %22 = vector.broadcast %21 : vector<256x1xf32> to vector<256x256xf32>
    %23 = arith.mulf %18, %22 : vector<256x256xf32>
    %24 = arith.truncf %10 : vector<16x256xf32> to vector<16x256xbf16>
    %25 = arith.truncf %23 : vector<256x256xf32> to vector<256x256xbf16>
    %cst_16 = arith.constant dense<0.000000e+00> : vector<16x256xf32>
    %26 = tpu.matmul %24, %25, %cst_16 {dimension_numbers = #tpu.dot_dimension_numbers<[1], [1], [0], [0], [0, 0, 1, 0], [], []>} : vector<16x256xbf16>, vector<256x256xbf16>, vector<16x256xf32> -> vector<16x256xf32>
    %c0_17 = arith.constant 0 : index
    %c0_18 = arith.constant 0 : index
    %c0_19 = arith.constant 0 : index
    %27 = vector.load %arg4[%c0_17, %c0_18, %c0_19] : memref<1x64x256xf32, #tpu.memory_space<vmem>>, vector<1x16x256xf32>
    %28 = vector.shape_cast %27 : vector<1x16x256xf32> to vector<16x256xf32>
    %29 = vector.shape_cast %26 : vector<16x256xf32> to vector<1x16x256xf32>
    tpu.vector_store %arg4[%c0_17, %c0_18, %c0_19], %29 {strides = array<i32>} : memref<1x64x256xf32, #tpu.memory_space<vmem>>, vector<1x16x256xf32>,
    %c16 = arith.constant 16 : index
    %c0_20 = arith.constant 0 : index
    %30 = vector.load %arg5[%c16, %c0_20] : memref<192x256xf32, #tpu.memory_space<vmem>>, vector<16x256xf32>
    %c80 = arith.constant 80 : index
    %c0_21 = arith.constant 0 : index
    %31 = vector.load %arg5[%c80, %c0_21] : memref<192x256xf32, #tpu.memory_space<vmem>>, vector<16x256xf32>
    %c1 = arith.constant 1 : index
    %c0_22 = arith.constant 0 : index
    %c0_23 = arith.constant 0 : index
    %32 = vector.load %arg3[%c1, %c0_22, %c0_23] : memref<4x16x256xf32, #tpu.memory_space<vmem>>, vector<1x16x256xf32>
    %33 = vector.shape_cast %32 : vector<1x16x256xf32> to vector<16x256xf32>
    %34 = arith.addf %31, %33 : vector<16x256xf32>
    %c144 = arith.constant 144 : index
    %c0_24 = arith.constant 0 : index
    %35 = vector.load %arg5[%c144, %c0_24] : memref<192x256xf32, #tpu.memory_space<vmem>>, vector<16x256xf32>
    %36 = arith.truncf %30 : vector<16x256xf32> to vector<16x256xbf16>
    %37 = arith.truncf %34 : vector<16x256xf32> to vector<16x256xbf16>
    %cst_25 = arith.constant dense<0.000000e+00> : vector<256x256xf32>
    %38 = tpu.matmul %36, %37, %cst_25 {dimension_numbers = #tpu.dot_dimension_numbers<[0], [0], [1], [1], [0, 1, 1, 1], [], []>} : vector<16x256xbf16>, vector<16x256xbf16>, vector<256x256xf32> -> vector<256x256xf32>
    %cst_26 = arith.constant dense<0xFF800000> : vector<256xf32>
    %39 = vector.multi_reduction <maximumf>, %38, %cst_26 [1] : vector<256x256xf32> to vector<256xf32>
    %40 = vector.shape_cast %39 : vector<256xf32> to vector<256x1xf32>
    %41 = vector.broadcast %40 : vector<256x1xf32> to vector<256x256xf32>
    %42 = arith.subf %38, %41 : vector<256x256xf32>
    %43 = math.exp %42 : vector<256x256xf32>
    %cst_27 = arith.constant dense<0.000000e+00> : vector<256xf32>
    %44 = vector.multi_reduction <add>, %43, %cst_27 [1] : vector<256x256xf32> to vector<256xf32>
    %45 = vector.shape_cast %44 : vector<256xf32> to vector<256x1xf32>
    %46 = tpu.reciprocal %45 {approx = true} : vector<256x1xf32> -> vector<256x1xf32>
    %47 = vector.broadcast %46 : vector<256x1xf32> to vector<256x256xf32>
    %48 = arith.mulf %43, %47 : vector<256x256xf32>
    %49 = arith.truncf %35 : vector<16x256xf32> to vector<16x256xbf16>
    %50 = arith.truncf %48 : vector<256x256xf32> to vector<256x256xbf16>
    %cst_28 = arith.constant dense<0.000000e+00> : vector<16x256xf32>
    %51 = tpu.matmul %49, %50, %cst_28 {dimension_numbers = #tpu.dot_dimension_numbers<[1], [1], [0], [0], [0, 0, 1, 0], [], []>} : vector<16x256xbf16>, vector<256x256xbf16>, vector<16x256xf32> -> vector<16x256xf32>
    %c0_29 = arith.constant 0 : index
    %c16_30 = arith.constant 16 : index
    %c0_31 = arith.constant 0 : index
    %52 = vector.load %arg4[%c0_29, %c16_30, %c0_31] : memref<1x64x256xf32, #tpu.memory_space<vmem>>, vector<1x16x256xf32>
    %53 = vector.shape_cast %52 : vector<1x16x256xf32> to vector<16x256xf32>
    %54 = vector.shape_cast %51 : vector<16x256xf32> to vector<1x16x256xf32>
    tpu.vector_store %arg4[%c0_29, %c16_30, %c0_31], %54 {strides = array<i32>} : memref<1x64x256xf32, #tpu.memory_space<vmem>>, vector<1x16x256xf32>,
    %c32 = arith.constant 32 : index
    %c0_32 = arith.constant 0 : index
    %55 = vector.load %arg5[%c32, %c0_32] : memref<192x256xf32, #tpu.memory_space<vmem>>, vector<16x256xf32>
    %c96 = arith.constant 96 : index
    %c0_33 = arith.constant 0 : index
    %56 = vector.load %arg5[%c96, %c0_33] : memref<192x256xf32, #tpu.memory_space<vmem>>, vector<16x256xf32>
    %c2 = arith.constant 2 : index
    %c0_34 = arith.constant 0 : index
    %c0_35 = arith.constant 0 : index
    %57 = vector.load %arg3[%c2, %c0_34, %c0_35] : memref<4x16x256xf32, #tpu.memory_space<vmem>>, vector<1x16x256xf32>
    %58 = vector.shape_cast %57 : vector<1x16x256xf32> to vector<16x256xf32>
    %59 = arith.addf %56, %58 : vector<16x256xf32>
    %c160 = arith.constant 160 : index
    %c0_36 = arith.constant 0 : index
    %60 = vector.load %arg5[%c160, %c0_36] : memref<192x256xf32, #tpu.memory_space<vmem>>, vector<16x256xf32>
    %61 = arith.truncf %55 : vector<16x256xf32> to vector<16x256xbf16>
    %62 = arith.truncf %59 : vector<16x256xf32> to vector<16x256xbf16>
    %cst_37 = arith.constant dense<0.000000e+00> : vector<256x256xf32>
    %63 = tpu.matmul %61, %62, %cst_37 {dimension_numbers = #tpu.dot_dimension_numbers<[0], [0], [1], [1], [0, 1, 1, 1], [], []>} : vector<16x256xbf16>, vector<16x256xbf16>, vector<256x256xf32> -> vector<256x256xf32>
    %cst_38 = arith.constant dense<0xFF800000> : vector<256xf32>
    %64 = vector.multi_reduction <maximumf>, %63, %cst_38 [1] : vector<256x256xf32> to vector<256xf32>
    %65 = vector.shape_cast %64 : vector<256xf32> to vector<256x1xf32>
    %66 = vector.broadcast %65 : vector<256x1xf32> to vector<256x256xf32>
    %67 = arith.subf %63, %66 : vector<256x256xf32>
    %68 = math.exp %67 : vector<256x256xf32>
    %cst_39 = arith.constant dense<0.000000e+00> : vector<256xf32>
    %69 = vector.multi_reduction <add>, %68, %cst_39 [1] : vector<256x256xf32> to vector<256xf32>
    %70 = vector.shape_cast %69 : vector<256xf32> to vector<256x1xf32>
    %71 = tpu.reciprocal %70 {approx = true} : vector<256x1xf32> -> vector<256x1xf32>
    %72 = vector.broadcast %71 : vector<256x1xf32> to vector<256x256xf32>
    %73 = arith.mulf %68, %72 : vector<256x256xf32>
    %74 = arith.truncf %60 : vector<16x256xf32> to vector<16x256xbf16>
    %75 = arith.truncf %73 : vector<256x256xf32> to vector<256x256xbf16>
    %cst_40 = arith.constant dense<0.000000e+00> : vector<16x256xf32>
    %76 = tpu.matmul %74, %75, %cst_40 {dimension_numbers = #tpu.dot_dimension_numbers<[1], [1], [0], [0], [0, 0, 1, 0], [], []>} : vector<16x256xbf16>, vector<256x256xbf16>, vector<16x256xf32> -> vector<16x256xf32>
    %c0_41 = arith.constant 0 : index
    %c32_42 = arith.constant 32 : index
    %c0_43 = arith.constant 0 : index
    %77 = vector.load %arg4[%c0_41, %c32_42, %c0_43] : memref<1x64x256xf32, #tpu.memory_space<vmem>>, vector<1x16x256xf32>
    %78 = vector.shape_cast %77 : vector<1x16x256xf32> to vector<16x256xf32>
    %79 = vector.shape_cast %76 : vector<16x256xf32> to vector<1x16x256xf32>
    tpu.vector_store %arg4[%c0_41, %c32_42, %c0_43], %79 {strides = array<i32>} : memref<1x64x256xf32, #tpu.memory_space<vmem>>, vector<1x16x256xf32>,
    %c48 = arith.constant 48 : index
    %c0_44 = arith.constant 0 : index
    %80 = vector.load %arg5[%c48, %c0_44] : memref<192x256xf32, #tpu.memory_space<vmem>>, vector<16x256xf32>
    %c112 = arith.constant 112 : index
    %c0_45 = arith.constant 0 : index
    %81 = vector.load %arg5[%c112, %c0_45] : memref<192x256xf32, #tpu.memory_space<vmem>>, vector<16x256xf32>
    %c3 = arith.constant 3 : index
    %c0_46 = arith.constant 0 : index
    %c0_47 = arith.constant 0 : index
    %82 = vector.load %arg3[%c3, %c0_46, %c0_47] : memref<4x16x256xf32, #tpu.memory_space<vmem>>, vector<1x16x256xf32>
    %83 = vector.shape_cast %82 : vector<1x16x256xf32> to vector<16x256xf32>
    %84 = arith.addf %81, %83 : vector<16x256xf32>
    %c176 = arith.constant 176 : index
    %c0_48 = arith.constant 0 : index
    %85 = vector.load %arg5[%c176, %c0_48] : memref<192x256xf32, #tpu.memory_space<vmem>>, vector<16x256xf32>
    %86 = arith.truncf %80 : vector<16x256xf32> to vector<16x256xbf16>
    %87 = arith.truncf %84 : vector<16x256xf32> to vector<16x256xbf16>
    %cst_49 = arith.constant dense<0.000000e+00> : vector<256x256xf32>
    %88 = tpu.matmul %86, %87, %cst_49 {dimension_numbers = #tpu.dot_dimension_numbers<[0], [0], [1], [1], [0, 1, 1, 1], [], []>} : vector<16x256xbf16>, vector<16x256xbf16>, vector<256x256xf32> -> vector<256x256xf32>
    %cst_50 = arith.constant dense<0xFF800000> : vector<256xf32>
    %89 = vector.multi_reduction <maximumf>, %88, %cst_50 [1] : vector<256x256xf32> to vector<256xf32>
    %90 = vector.shape_cast %89 : vector<256xf32> to vector<256x1xf32>
    %91 = vector.broadcast %90 : vector<256x1xf32> to vector<256x256xf32>
    %92 = arith.subf %88, %91 : vector<256x256xf32>
    %93 = math.exp %92 : vector<256x256xf32>
    %cst_51 = arith.constant dense<0.000000e+00> : vector<256xf32>
    %94 = vector.multi_reduction <add>, %93, %cst_51 [1] : vector<256x256xf32> to vector<256xf32>
    %95 = vector.shape_cast %94 : vector<256xf32> to vector<256x1xf32>
    %96 = tpu.reciprocal %95 {approx = true} : vector<256x1xf32> -> vector<256x1xf32>
    %97 = vector.broadcast %96 : vector<256x1xf32> to vector<256x256xf32>
    %98 = arith.mulf %93, %97 : vector<256x256xf32>
    %99 = arith.truncf %85 : vector<16x256xf32> to vector<16x256xbf16>
    %100 = arith.truncf %98 : vector<256x256xf32> to vector<256x256xbf16>
    %cst_52 = arith.constant dense<0.000000e+00> : vector<16x256xf32>
    %101 = tpu.matmul %99, %100, %cst_52 {dimension_numbers = #tpu.dot_dimension_numbers<[1], [1], [0], [0], [0, 0, 1, 0], [], []>} : vector<16x256xbf16>, vector<256x256xbf16>, vector<16x256xf32> -> vector<16x256xf32>
    %c0_53 = arith.constant 0 : index
    %c48_54 = arith.constant 48 : index
    %c0_55 = arith.constant 0 : index
    %102 = vector.load %arg4[%c0_53, %c48_54, %c0_55] : memref<1x64x256xf32, #tpu.memory_space<vmem>>, vector<1x16x256xf32>
    %103 = vector.shape_cast %102 : vector<1x16x256xf32> to vector<16x256xf32>
    %104 = vector.shape_cast %101 : vector<16x256xf32> to vector<1x16x256xf32>
    tpu.vector_store %arg4[%c0_53, %c48_54, %c0_55], %104 {strides = array<i32>} : memref<1x64x256xf32, #tpu.memory_space<vmem>>, vector<1x16x256xf32>,
    return
  }
  func.func @transform_0(%arg0: i32) -> (i32, i32, i32) {
    %c0_i32 = arith.constant 0 : i32
    %c0_i32_0 = arith.constant 0 : i32
    %c0_i32_1 = arith.constant 0 : i32
    return %arg0, %c0_i32, %c0_i32_0 : i32, i32, i32
  }
  func.func @transform_1(%arg0: i32) -> (i32, i32) {
    %c0_i32 = arith.constant 0 : i32
    %c0_i32_0 = arith.constant 0 : i32
    %c0_i32_1 = arith.constant 0 : i32
    return %c0_i32, %c0_i32_0 : i32, i32
  }
  func.func @transform_2(%arg0: i32) -> (i32, i32, i32) {
    %c0_i32 = arith.constant 0 : i32
    %c0_i32_0 = arith.constant 0 : i32
    %c0_i32_1 = arith.constant 0 : i32
    %c0_i32_2 = arith.constant 0 : i32
    return %c0_i32, %c0_i32_0, %c0_i32_1 : i32, i32, i32
  }
  func.func @transform_3(%arg0: i32) -> (i32, i32, i32) {
    %c0_i32 = arith.constant 0 : i32
    %c0_i32_0 = arith.constant 0 : i32
    %c0_i32_1 = arith.constant 0 : i32
    return %arg0, %c0_i32, %c0_i32_0 : i32, i32, i32
  }
}

</mosaic_0001>

<bundles_post_ra>
// kernel: tpu_custom_call.1
= control target key start
LH: loop header
LB: loop body
LE: loop exit
PB: predicated region body
PF: predicated region fallthrough
CT: control target
= control target key end

     0   :  { %8 = vsyncpa [#allocation4], 0  ;;  %s8000_s0 = inlined_call_operand.vmem [shape: bf16[2,64,256], index: 0, kind: input, shape index: {}]   ;;  %s8001_s1 = inlined_call_operand.vmem [shape: bf16[192,64], index: 1, kind: input, shape index: {}]   ;;  %s8002_s2 = inlined_call_operand.hbm [shape: f32[4,16,256], index: 2, kind: input, shape index: {}]   ;;  %s8003_s3 = inlined_call_operand.hbm [shape: f32[2,64,256], index: 3, kind: output, shape index: {}]  }
   0x1   :  { %9 = vsyncpa [#allocation5], 0 }
   0x2   :  { %11 = vsyncpa [#allocation5 + $0x1], 0  ;;  %s5165_s12 = smov 0   ;;  %s5167_s13 = smov 0  }
   0x3   :  { %s5169_s14 = smov 0   ;;  %s5171_s15 = smov 0  }
   0x4 LB: > { %s5186_s16 = sadd.s32 4294967295, %s5136_s15   ;;  %s4079_s17 = sadd.s32 4294967294, %s5136_s15   ;;  %s5136_s15 = sphi %s5171_s15, %s9094_s15   ;;  %s5132_s14 = sphi %s5169_s14, %s9093_s14   ;;  %s5128_s13 = sphi %s5167_s13, %s9092_s13   ;;  %s5124_s12 = sphi %s5165_s12, %s9091_s12  }
   0x5   : > { %s5190_s18 = sadd.s32 1, %s5136_s15   ;;  %s92_s19 = sadd.s32 1, %s5132_s14 }
   0x6   : > { %s89_s20 = ssub.s32 %s5136_s15, %s5190_s18  ;;  %p102_p0 = scmp.ne.s32.totalorder %s5132_s14, %s5128_s13 }
   0x7   : > { %p90_p1 = scmp.eq.s32.totalorder %s89_s20, 0  ;;  %p103_p2 = scmp.eq.s32.totalorder %s5186_s16, 1 }
   0x8   : > { %p108_p3 = scmp.ne.s32.totalorder %s5128_s13, %s5124_s12  ;;  %p109_p4 = scmp.eq.s32.totalorder %s4079_s17, 1 }
   0x9   : > { %s5201_s21 = scalar_select %p90_p1, %s5132_s14, %s92_s19  }
   0xa   : > { %p5203_p5 = por %p103_p2, %p102_p0  ;;  %p5207_p6 = por %p109_p4, %p108_p3 }
   0xb   : > { %p4080_p7 = scmp.ge.s32.totalorder %s5136_s15, 1  ;;  %p116_p8 = scmp.lt.s32.totalorder %s5136_s15, 3 }
   0xc   : > { %s8353_s23 = scalar_select %p5207_p6, 1, 0 }
   0xd   : > { %p4213_p9 = scmp.eq.s32.totalorder %s5186_s16, 0  ;;  %p5214_p10 = pnand %p4080_p7, %p116_p8 }
   0xe   : > { %s5138_s25 = smov [#allocation3]  }
   0xf   : > { %s131_s26 = sshll.u32 %s5138_s25, 4  ;;  %p4205_p11 = pneg %p5214_p10  ;;  %s132_s26 = int_to_ptr.vmem [resolvable:$true] %s131_s26 }
  0x10   : > { %s5057_s27 = scalar_lea.vmem %s132_s26, 2048  ;;  %p5065_p3 = scmp.lt.s32.totalorder %s132_s26, %s132_s26 }
  0x11   : > { %p4206_p12 = pnand %p4213_p9, %p4205_p11  ;;  %p5058_p0 = scmp.ne.s32.totalorder %s132_s26, %s5057_s27 }
  0x12   : > { %p5066_p4 = scmp.lt.s32.totalorder %s5057_s27, %s5057_s27 }
  0x13   : > { %p5048_p13 = pneg %p4206_p12 }
  0x14   : > { %p5067_p6 = por %p5066_p4, %p5065_p3 }
  0x15   : > { %p5060_p1 = pnand %p5058_p0, %p5048_p13 }
  0x17   : > { %p5061_p2 = pneg %p5060_p1 }
  0x19   : > { %p5068_p7 = pnand %p5067_p6, %p5061_p2 }
  0x1b   : > { %5071 = shalt.err (!%p5068_p7)
}
  0x1c   : > { %s5139_s28 = smov 256   ;;  %s5140_s29 = smov 16  }
  0x1d   : > { %4208 = dma.hbm_to_vmem [thread:$0]  (!%p4206_p12), %s8002_s2, 2048, %s132_s26, [#allocation4], %s5139_s28, %s5139_s28, %s5140_s29  }
  0x1e   : > { %155 = sbr.rel (%p5214_p10) target bundleno = 2144 (0x860), region = 32 }
  0x23   : > { %5115 = dma.done.wait (%p4213_p9), [#allocation4], 2048  }
  0x24   : > { %5117 = vsyncadd (%p4213_p9), [#allocation4], 4294965248  ;;  %p179_p8 = scmp.lt.s32.totalorder %s5186_s16, 1  ;;  %v8004_v0 = vmov 0   ;;  %v4266_v9 = vld [vmem:[%s8001_s1] sm:$0xff]   ;;  %vm317_vm0 = vcmask 523264  }
  0x25   : > { %386 = vmatprep.mubr.bf16.mxu0 %v8004_v0  ;;  %446 = vmatprep.mubr.bf16.mxu1 %v8004_v0  ;;  %v4267_v10 = vld [vmem:[%s8001_s1 + $0x8] sm:$0xff]   ;;  %v4268_v11 = vld [vmem:[%s8001_s1 + $0x10] sm:$0xff]   ;;  %v4269_v12 = vld [vmem:[%s8001_s1 + $0x18] sm:$0xff]   ;;  %vm611_vm1 = vcmask 130048   ;;  %s176_s25 = sand.u32 1, %s5128_s13   ;;  %s4190_s28 = sshll.u32 %s5186_s16, 11 }
  0x26   : > { %s180_s5 = scalar_select %p179_p8, %s5186_s16, 1  ;;  %v4270_v13 = vld [vmem:[%s8001_s1 + $0x20] sm:$0xff]   ;;  %v4271_v14 = vld [vmem:[%s8001_s1 + $0x28] sm:$0xff]   ;;  %v4272_v15 = vld [vmem:[%s8001_s1 + $0x30] sm:$0xff]  }
  0x27   : > { %v4273_v16 = vld [vmem:[%s8001_s1 + $0x38] sm:$0xff]   ;;  %v4274_v17 = vld [vmem:[%s8001_s1 + $0x40] sm:$0xff]   ;;  %v4275_v18 = vld [vmem:[%s8001_s1 + $0x48] sm:$0xff]   ;;  %s4085_s26 = sshll.u32 %s176_s25, 7  ;;  %s7960_s16 = scalar_lea.sflag [#allocation5], %s176_s25 }
  0x28   : > { %s4189_s6 = sshll.u32 %s180_s5, 6  ;;  %v4276_v19 = vld [vmem:[%s8001_s1 + $0x50] sm:$0xff]   ;;  %v4277_v20 = vld [vmem:[%s8001_s1 + $0x58] sm:$0xff]   ;;  %v563_v43 = vld [vmem:[#allocation3] sm:$0xff]  ;;  %s6737_s27 = scalar_lea.vmem [#allocation6], %s4085_s26 }
  0x29   : > { %s183_s9 = scalar_lea.vmem %s8000_s0, %s4189_s6  ;;  %v564_v45 = vld [vmem:[#allocation3 + $0x8] sm:$0xff]  ;;  %v565_v46 = vld [vmem:[#allocation3 + $0x10] sm:$0xff]  ;;  %v566_v50 = vld [vmem:[#allocation3 + $0x18] sm:$0xff]  ;;  %s4005_s29 = sshll.u32 %s6737_s27, 4  ;;  %s7954_s29 = int_to_ptr.vmem [resolvable:$true] %s4005_s29 }
  0x2a   : > { %v4254_v1 = vld [vmem:[%s183_s9 + $0x34] ss:$8 sps:$4 sm:$0xff]   ;;  %v4256_v2 = vld [vmem:[%s183_s9 + $0x30] ss:$8 sps:$4 sm:$0xff]   ;;  %v4257_v3 = vld [vmem:[%s183_s9 + $0x24] ss:$8 sps:$4 sm:$0xff]   ;;  %s7952_s5 = scalar_lea.hbm %s8003_s3, %s4190_s28 }
  0x2b   : > { %362 = vmatprep.subr.bf16.mxu0 %v4254_v1  ;;  %4191 = vmatprep.subr.bf16.mxu1 %v4254_v1  ;;  %v4259_v4 = vld [vmem:[%s183_s9 + $0x20] ss:$8 sps:$4 sm:$0xff]   ;;  %v4260_v5 = vld [vmem:[%s183_s9 + $0x14] ss:$8 sps:$4 sm:$0xff]   ;;  %v4262_v6 = vld [vmem:[%s183_s9 + $0x10] ss:$8 sps:$4 sm:$0xff]  }
  0x2c   : > { %363 = vmatpush1.bf16.msra.mxu0 %v4256_v2  ;;  %4195 = vmatpush1.bf16.msra.mxu1 %v4256_v2  ;;  %v4263_v7 = vld [vmem:[%s183_s9 + $0x4] ss:$8 sps:$4 sm:$0xff]   ;;  %v4265_v8 = vld [vmem:[%s183_s9] ss:$8 sps:$4 sm:$0xff]   ;;  %v1425_v61 = vld [vmem:[#allocation3 + $0x30] sm:$0xff]  ;;  %s5072_s6 = scalar_lea.vmem %s7954_s29, 2048 }
  0x2d   : > { %364 = vmatprep.subr.bf16.mxu0 %v4257_v3  ;;  %4192 = vmatprep.subr.bf16.mxu1 %v4257_v3  ;;  %v1423_v58 = vld [vmem:[#allocation3 + $0x20] sm:$0xff]  ;;  %v1424_v60 = vld [vmem:[#allocation3 + $0x28] sm:$0xff]  ;;  %v1426_v1 = vld [vmem:[#allocation3 + $0x38] sm:$0xff]  ;;  %p5073_p6 = scmp.ne.s32.totalorder %s7954_s29, %s5072_s6  ;;  %s5142_s7 = smov [#allocation6]  }
  0x2e   : > { %s5076_s8 = sshll.u32 %s5142_s7, 4  ;;  %s5077_s8 = int_to_ptr.vmem [resolvable:$false] %s5076_s8 }
  0x2f   : > { %p5074_p9 = pnand %p5073_p6, %p5203_p5  ;;  %s5078_s9 = scalar_lea.vmem %s5077_s8, 4096 }
  0x30   : > { %365 = vmatpush1.bf16.msra.mxu0 %v4259_v4  ;;  %4196 = vmatpush1.bf16.msra.mxu1 %v4259_v4  ;;  %p5079_p11 = scmp.lt.s32.totalorder %s7954_s29, %s5077_s8  ;;  %p5080_p12 = scmp.lt.s32.totalorder %s5078_s9, %s5072_s6 }
  0x31   : > { %366 = vmatprep.subr.bf16.mxu0 %v4260_v5  ;;  %4193 = vmatprep.subr.bf16.mxu1 %v4260_v5  ;;  %p5075_p10 = pneg %p5074_p9 }
  0x32   : > { %p5081_p13 = por %p5080_p12, %p5079_p11 }
  0x34   : > { %367 = vmatpush1.bf16.msra.mxu0 %v4262_v6  ;;  %4197 = vmatpush1.bf16.msra.mxu1 %v4262_v6  ;;  %p5082_p0 = pnand %p5081_p13, %p5075_p10 }
  0x35   : > { %368 = vmatprep.subr.bf16.mxu0 %v4263_v7  ;;  %4194 = vmatprep.subr.bf16.mxu1 %v4263_v7 }
  0x38   : > { %369 = vmatpush1.bf16.msra.mxu0 %v4265_v8  ;;  %4198 = vmatpush1.bf16.msra.mxu1 %v4265_v8 }
  0x3b   : > { %4108 = vmatmul.mubr.msk.bf16.vlgmr.msra.gmra.mxu0 %vm317_vm0, %v4266_v9  ;;  %4114 = vmatmul.mubr.msk.bf16.vlgmr.msra.gmra.mxu1 %vm317_vm0, %v4272_v15 }
  0x3c   : > { %396 = vmatprep.mubr.bf16.mxu0 %v8004_v0  ;;  %456 = vmatprep.mubr.bf16.mxu1 %v8004_v0 }
  0x43   : > { %4109 = vmatmul.mubr.msk.bf16.gmra.mxu0 %vm317_vm0, %v4267_v10  ;;  %4115 = vmatmul.mubr.msk.bf16.gmra.mxu1 %vm317_vm0, %v4273_v16  ;;  %v2284_v16 = vld [vmem:[#allocation3 + $0x50] sm:$0xff] }
  0x44   : > { %406 = vmatprep.mubr.bf16.mxu0 %v8004_v0  ;;  %466 = vmatprep.mubr.bf16.mxu1 %v8004_v0 }
  0x4b   : > { %4110 = vmatmul.mubr.msk.bf16.gmra.mxu0 %vm317_vm0, %v4268_v11  ;;  %4116 = vmatmul.mubr.msk.bf16.gmra.mxu1 %vm317_vm0, %v4274_v17 }
  0x4c   : > { %416 = vmatprep.mubr.bf16.mxu0 %v8004_v0  ;;  %476 = vmatprep.mubr.bf16.mxu1 %v8004_v0 }
  0x53   : > { %4111 = vmatmul.mubr.msk.bf16.gmra.mxu0 %vm317_vm0, %v4269_v12  ;;  %4117 = vmatmul.mubr.msk.bf16.gmra.mxu1 %vm317_vm0, %v4275_v18 }
  0x54   : > { %426 = vmatprep.mubr.bf16.mxu0 %v8004_v0  ;;  %486 = vmatprep.mubr.bf16.mxu1 %v8004_v0 }
  0x5b   : > { %4112 = vmatmul.mubr.msk.bf16.gmra.mxu0 %vm317_vm0, %v4270_v13  ;;  %4118 = vmatmul.mubr.msk.bf16.gmra.mxu1 %vm317_vm0, %v4276_v19  ;;  %v2282_v13 = vld [vmem:[#allocation3 + $0x40] sm:$0xff] }
  0x5c   : > { %436 = vmatprep.mubr.bf16.mxu0 %v8004_v0  ;;  %496 = vmatprep.mubr.bf16.mxu1 %v8004_v0 }
  0x63   : > { %4113 = vmatmul.mubr.msk.bf16.gmra.mxu0 %vm317_vm0, %v4271_v14  ;;  %4119 = vmatmul.mubr.msk.bf16.gmra.mxu1 %vm317_vm0, %v4277_v20 }
  0x64   : > { %1551 = vmatprep.mubr.bf16.mxu0 %v8004_v0  ;;  %692 = vmatprep.mubr.bf16.mxu1 %v8004_v0 }
  0xfb   : > { %v388_v21 = vpop.f32.mrf.mxu0  ;;  %v448_v12 = vpop.f32.mrf.mxu1 }
  0xfc   : > { %v5326_v17 = vadd.f32 %v2282_v13, %v448_v12 }
  0xfd   : > { %v390_v22 = vpop.f32.mrf.mxu0  ;;  %v5323_v15 = vpop.f32.mrf.mxu1 }
  0xfe   : > { %8363 = vst [vmem:[#allocation17_spill] sm:$0xff] %v5323_v15  ;;  %8364 = vst [vmem:[#allocation18_spill] sm:$0xff] %v5326_v17 }
  0xff   : > { %v392_v23 = vpop.f32.mrf.mxu0  ;;  %v452_v18 = vpop.f32.mrf.mxu1 }
 0x100   : > { %v575_v24 = vpack.c.bf16 %v392_v23, %v388_v21  ;;  %v5328_v20 = vadd.f32 %v2284_v16, %v452_v18 }
 0x101   : > { %v394_v25 = vpop.f32.mrf.mxu0  ;;  %v5330_v21 = vpop.f32.mrf.mxu1 }
 0x102   : > { %579 = vxpose.xlu0.c.b16.start.end [1/1] (short) %v575_v24, 128  ;;  %v576_v26 = vpack.c.bf16 %v394_v25, %v390_v22  ;;  %8365 = vst [vmem:[#allocation19_spill] sm:$0xff] %v5328_v20  ;;  %8366 = vst [vmem:[#allocation20_spill] sm:$0xff] %v5330_v21  ;;  %v3141_v24 = vld [vmem:[#allocation3 + $0x60] sm:$0xff] }
 0x103   : > { %v398_v27 = vpop.f32.mrf.mxu0  ;;  %v458_v23 = vpop.f32.mrf.mxu1 }
 0x104   : > { %595 = vxpose.xlu1.c.b16.start.end [1/1] (short) %v576_v26, 128 }
 0x105   : > { %v400_v28 = vpop.f32.mrf.mxu0  ;;  %v5335_v26 = vpop.f32.mrf.mxu1 }
 0x106   : > { %8367 = vst [vmem:[#allocation21_spill] sm:$0xff] %v5335_v26 }
 0x107   : > { %v402_v29 = vpop.f32.mrf.mxu0 }
 0x108   : > { %v1435_v41 = vpack.c.bf16 %v402_v29, %v398_v27  ;;  %v3143_v27 = vld [vmem:[#allocation3 + $0x70] sm:$0xff]  ;;  %v462_v29 = vpop.f32.mrf.mxu1 }
 0x109   : > { %v404_v30 = vpop.f32.mrf.mxu0 }
 0x10a   : > { %v1436_v47 = vpack.c.bf16 %v404_v30, %v400_v28  ;;  %v5338_v28 = vadd.f32 %v3141_v24, %v458_v23 }
 0x10b   : > { %v5298_v31 = vpop.f32.mrf.mxu0 }
 0x10c   : > { %8355 = vst [vmem:[#allocation9_spill] sm:$0xff] %v5298_v31  ;;  %8368 = vst [vmem:[#allocation22_spill] sm:$0xff] %v5338_v28 }
 0x10d   : > { %v5300_v32 = vpop.f32.mrf.mxu0 }
 0x10e   : > { %8356 = vst [vmem:[#allocation10_spill] sm:$0xff] %v5300_v32 }
 0x10f   : > { %v5302_v33 = vpop.f32.mrf.mxu0 }
 0x110   : > { %8357 = vst [vmem:[#allocation11_spill] sm:$0xff] %v5302_v33 }
 0x111   : > { %v5306_v35 = vpop.f32.mrf.mxu0 }
 0x112   : > { %8358 = vst [vmem:[#allocation12_spill] sm:$0xff] %v5306_v35 }
 0x113   : > { %v5308_v36 = vpop.f32.mrf.mxu0 }
 0x114   : > { %8359 = vst [vmem:[#allocation13_spill] sm:$0xff] %v5308_v36 }
 0x115   : > { %v5310_v37 = vpop.f32.mrf.mxu0 }
 0x116   : > { %8360 = vst [vmem:[#allocation14_spill] sm:$0xff] %v5310_v37 }
 0x117   : > { %v5312_v38 = vpop.f32.mrf.mxu0 }
 0x118   : > { %8361 = vst [vmem:[#allocation15_spill] sm:$0xff] %v5312_v38 }
 0x119   : > { %v5316_v40 = vpop.f32.mrf.mxu0 }
 0x11a   : > { %8362 = vst [vmem:[#allocation16_spill] sm:$0xff] %v5316_v40 }
 0x11b   : > { %v428_v42 = vpop.f32.mrf.mxu0 }
 0x11c   : > { %v567_v48 = vadd.f32 %v563_v43, %v428_v42  ;;  %v5342_v42 = vpop.f32.mrf.mxu1 }
 0x11d   : > { %v430_v44 = vpop.f32.mrf.mxu0  ;;  %8370 = vst [vmem:[#allocation24_spill] sm:$0xff] %v5342_v42 }
 0x11e   : > { %v568_v51 = vadd.f32 %v564_v45, %v430_v44  ;;  %v5346_v44 = vpop.f32.mrf.mxu1 }
 0x11f   : > { %1439 = vxpose.xlu0.c.b16.start.end [1/1] (short) %v1435_v41, 128  ;;  %v432_v49 = vpop.f32.mrf.mxu0  ;;  %v5340_v41 = vadd.f32 %v3143_v27, %v462_v29  ;;  %8371 = vst [vmem:[#allocation25_spill] sm:$0xff] %v5346_v44 }
 0x120   : > { %v569_v52 = vadd.f32 %v565_v46, %v432_v49  ;;  %v5350_v46 = vpop.f32.mrf.mxu1 }
 0x121   : > { %1455 = vxpose.xlu1.c.b16.start.end [1/1] (short) %v1436_v47, 128  ;;  %v434_v53 = vpop.f32.mrf.mxu0  ;;  %8369 = vst [vmem:[#allocation23_spill] sm:$0xff] %v5340_v41 }
 0x122   : > { %v570_v54 = vadd.f32 %v566_v50, %v434_v53  ;;  %v577_v55 = vpack.c.bf16 %v569_v52, %v567_v48  ;;  %v5354_v47 = vpop.f32.mrf.mxu1 }
 0x123   : > { %v438_v56 = vpop.f32.mrf.mxu0  ;;  %8372 = vst [vmem:[#allocation26_spill] sm:$0xff] %v5354_v47 }
 0x124   : > { %v578_v57 = vpack.c.bf16 %v570_v54, %v568_v51  ;;  %v1427_v62 = vadd.f32 %v1423_v58, %v438_v56  ;;  %v5358_v49 = vpop.f32.mrf.mxu1 }
 0x125   : > { %v440_v59 = vpop.f32.mrf.mxu0 }
 0x126   : > { %674 = vmatprep.subr.bf16.mxu1 %v578_v57  ;;  %v1428_v2 = vadd.f32 %v1424_v60, %v440_v59  ;;  %v5360_v51 = vpop.f32.mrf.mxu1 }
 0x127   : > { %v442_v63 = vpop.f32.mrf.mxu0  ;;  %675 = vmatpush1.bf16.msra.mxu1 %v577_v55  ;;  %8373 = vst [vmem:[#allocation27_spill] sm:$0xff] %v5360_v51 }
 0x128   : > { %v1429_v3 = vadd.f32 %v1425_v61, %v442_v63  ;;  %v5364_v52 = vpop.f32.mrf.mxu1 }
 0x129   : > { %v444_v4 = vpop.f32.mrf.mxu0 }
 0x12a   : > { %v1430_v5 = vadd.f32 %v1426_v1, %v444_v4  ;;  %v1437_v6 = vpack.c.bf16 %v1429_v3, %v1427_v62  ;;  %v5368_v53 = vpop.f32.mrf.mxu1 }
 0x12b   : > { %8374 = vst [vmem:[#allocation28_spill] sm:$0xff] %v5368_v53 }
 0x12c   : > { %v1438_v7 = vpack.c.bf16 %v1430_v5, %v1428_v2  ;;  %v5372_v55 = vpop.f32.mrf.mxu1 }
 0x12e   : > { %1533 = vmatprep.subr.bf16.mxu0 %v1438_v7  ;;  %v5374_v58 = vpop.f32.mrf.mxu1 }
 0x12f   : > { %1534 = vmatpush1.bf16.msra.mxu0 %v1437_v6  ;;  %8375 = vst [vmem:[#allocation29_spill] sm:$0xff] %v5374_v58 }
 0x130   : > { %v5378_v59 = vpop.f32.mrf.mxu1 }
 0x131   : > { %8376 = vst [vmem:[#allocation30_spill] sm:$0xff] %v5378_v59 }
 0x132   : > { %v5382_v60 = vpop.f32.mrf.mxu1 }
 0x133   : > { %8377 = vst [vmem:[#allocation31_spill] sm:$0xff] %v5382_v60 }
 0x134   : > { %v5386_v63 = vpop.f32.mrf.mxu1 }
 0x135   : > { %8378 = vst [vmem:[#allocation32_spill] sm:$0xff] %v5386_v63 }
 0x136   : > { %v5388_v2 = vpop.f32.mrf.mxu1 }
 0x137   : > { %8379 = vst [vmem:[#allocation33_spill] sm:$0xff] %v5388_v2 }
 0x138   : > { %v5392_v3 = vpop.f32.mrf.mxu1 }
 0x139   : > { %8380 = vst [vmem:[#allocation34_spill] sm:$0xff] %v5392_v3 }
 0x13a   : > { %v5396_v5 = vpop.f32.mrf.mxu1 }
 0x13b   : > { %8381 = vst [vmem:[#allocation35_spill] sm:$0xff] %v5396_v5 }
 0x164   : > { %v587_v8 = vpop.trf.xlu0 }
 0x165   : > { %4120 = vmatmul.mubr.msk.bf16.vlgmr.msra.gmra.mxu1 %vm611_vm1, %v587_v8 }
 0x166   : > { %702 = vmatprep.mubr.bf16.mxu1 %v8004_v0  ;;  %v603_v57 = vpop.trf.xlu1 }
 0x168   : > { %v588_v9 = vpop.trf.xlu0 }
 0x16a   : > { %v604_v61 = vpop.trf.xlu1 }
 0x16c   : > { %v589_v10 = vpop.trf.xlu0 }
 0x16d   : > { %4121 = vmatmul.mubr.msk.bf16.gmra.mxu1 %vm611_vm1, %v588_v9 }
 0x16e   : > { %712 = vmatprep.mubr.bf16.mxu1 %v8004_v0  ;;  %v605_v4 = vpop.trf.xlu1 }
 0x170   : > { %v590_v11 = vpop.trf.xlu0 }
 0x172   : > { %v606_v8 = vpop.trf.xlu1 }
 0x174   : > { %v591_v14 = vpop.trf.xlu0 }
 0x175   : > { %4122 = vmatmul.mubr.msk.bf16.gmra.mxu1 %vm611_vm1, %v589_v10 }
 0x176   : > { %722 = vmatprep.mubr.bf16.mxu1 %v8004_v0  ;;  %v607_v10 = vpop.trf.xlu1 }
 0x178   : > { %v592_v19 = vpop.trf.xlu0 }
 0x17c   : > { %v593_v25 = vpop.trf.xlu0 }
 0x17d   : > { %4123 = vmatmul.mubr.msk.bf16.gmra.mxu1 %vm611_vm1, %v590_v11  ;;  %v608_v11 = vpop.trf.xlu1 }
 0x17e   : > { %732 = vmatprep.mubr.bf16.mxu1 %v8004_v0 }
 0x180   : > { %v594_v30 = vpop.trf.xlu0 }
 0x181   : > { %v609_v13 = vpop.trf.xlu1 }
 0x184   : > { %v1447_v45 = vpop.trf.xlu0 }
 0x185   : > { %4124 = vmatmul.mubr.msk.bf16.gmra.mxu1 %vm611_vm1, %v591_v14  ;;  %4136 = vmatmul.mubr.msk.bf16.vlgmr.msra.gmra.mxu0 %vm611_vm1, %v1447_v45  ;;  %v610_v16 = vpop.trf.xlu1 }
 0x186   : > { %742 = vmatprep.mubr.bf16.mxu1 %v8004_v0  ;;  %1561 = vmatprep.mubr.bf16.mxu0 %v8004_v0 }
 0x188   : > { %v1448_v50 = vpop.trf.xlu0 }
 0x189   : > { %v1463_v18 = vpop.trf.xlu1 }
 0x18c   : > { %v1449_v56 = vpop.trf.xlu0 }
 0x18d   : > { %4125 = vmatmul.mubr.msk.bf16.gmra.mxu1 %vm611_vm1, %v592_v19  ;;  %4137 = vmatmul.mubr.msk.bf16.gmra.mxu0 %vm611_vm1, %v1448_v50  ;;  %v1464_v19 = vpop.trf.xlu1 }
 0x18e   : > { %752 = vmatprep.mubr.bf16.mxu1 %v8004_v0  ;;  %1571 = vmatprep.mubr.bf16.mxu0 %v8004_v0 }
 0x190   : > { %v1450_v1 = vpop.trf.xlu0 }
 0x191   : > { %v1465_v23 = vpop.trf.xlu1 }
 0x194   : > { %v1451_v7 = vpop.trf.xlu0 }
 0x195   : > { %4126 = vmatmul.mubr.msk.bf16.gmra.mxu1 %vm611_vm1, %v593_v25  ;;  %4138 = vmatmul.mubr.msk.bf16.gmra.mxu0 %vm611_vm1, %v1449_v56  ;;  %v1466_v24 = vpop.trf.xlu1  ;;  %v1334_v25 = vpack.c.bf16 %v5358_v49, %v5350_v46  ;;  %v2193_v46 = vpack.c.bf16 %v5372_v55, %v5364_v52  ;;  %v5442_v49 = vpop.f32.mrf.mxu1 }
 0x196   : > { %762 = vmatprep.mubr.bf16.mxu1 %v8004_v0  ;;  %1581 = vmatprep.mubr.bf16.mxu0 %v8004_v0  ;;  %8382 = vst [vmem:[#allocation36_spill] sm:$0xff] %v5442_v49 }
 0x198   : > { %v1452_v9 = vpop.trf.xlu0 }
 0x199   : > { %v1467_v27 = vpop.trf.xlu1 }
 0x19c   : > { %v1453_v12 = vpop.trf.xlu0 }
 0x19d   : > { %4127 = vmatmul.mubr.msk.bf16.gmra.mxu1 %vm611_vm1, %v594_v30  ;;  %4139 = vmatmul.mubr.msk.bf16.gmra.mxu0 %vm611_vm1, %v1450_v1  ;;  %v1468_v29 = vpop.trf.xlu1 }
 0x19e   : > { %1591 = vmatprep.mubr.bf16.mxu0 %v8004_v0  ;;  %772 = vmatprep.mubr.bf16.mxu1 %v8004_v0 }
 0x1a0   : > { %v1454_v14 = vpop.trf.xlu0 }
 0x1a1   : > { %v1469_v30 = vpop.trf.xlu1 }
 0x1a5   : > { %4140 = vmatmul.mubr.msk.bf16.gmra.mxu0 %vm611_vm1, %v1451_v7  ;;  %4128 = vmatmul.mubr.msk.bf16.gmra.mxu1 %vm611_vm1, %v603_v57  ;;  %v1470_v45 = vpop.trf.xlu1 }
 0x1a6   : > { %1601 = vmatprep.mubr.bf16.mxu0 %v8004_v0  ;;  %782 = vmatprep.mubr.bf16.mxu1 %v8004_v0 }
 0x1ad   : > { %4141 = vmatmul.mubr.msk.bf16.gmra.mxu0 %vm611_vm1, %v1452_v9  ;;  %4129 = vmatmul.mubr.msk.bf16.gmra.mxu1 %vm611_vm1, %v604_v61 }
 0x1ae   : > { %1611 = vmatprep.mubr.bf16.mxu0 %v8004_v0  ;;  %792 = vmatprep.mubr.bf16.mxu1 %v8004_v0 }
 0x1b5   : > { %4142 = vmatmul.mubr.msk.bf16.gmra.mxu0 %vm611_vm1, %v1453_v12  ;;  %4130 = vmatmul.mubr.msk.bf16.gmra.mxu1 %vm611_vm1, %v605_v4 }
 0x1b6   : > { %1621 = vmatprep.mubr.bf16.mxu0 %v8004_v0  ;;  %802 = vmatprep.mubr.bf16.mxu1 %v8004_v0 }
 0x1bd   : > { %4143 = vmatmul.mubr.msk.bf16.gmra.mxu0 %vm611_vm1, %v1454_v14  ;;  %4131 = vmatmul.mubr.msk.bf16.gmra.mxu1 %vm611_vm1, %v606_v8 }
 0x1be   : > { %1631 = vmatprep.mubr.bf16.mxu0 %v8004_v0  ;;  %812 = vmatprep.mubr.bf16.mxu1 %v8004_v0 }
 0x1c5   : > { %4144 = vmatmul.mubr.msk.bf16.gmra.mxu0 %vm611_vm1, %v1463_v18  ;;  %4132 = vmatmul.mubr.msk.bf16.gmra.mxu1 %vm611_vm1, %v607_v10 }
 0x1c6   : > { %1641 = vmatprep.mubr.bf16.mxu0 %v8004_v0  ;;  %822 = vmatprep.mubr.bf16.mxu1 %v8004_v0 }
 0x1cd   : > { %4145 = vmatmul.mubr.msk.bf16.gmra.mxu0 %vm611_vm1, %v1464_v19  ;;  %4133 = vmatmul.mubr.msk.bf16.gmra.mxu1 %vm611_vm1, %v608_v11 }
 0x1ce   : > { %1651 = vmatprep.mubr.bf16.mxu0 %v8004_v0  ;;  %832 = vmatprep.mubr.bf16.mxu1 %v8004_v0 }
 0x1d5   : > { %4146 = vmatmul.mubr.msk.bf16.gmra.mxu0 %vm611_vm1, %v1465_v23  ;;  %4134 = vmatmul.mubr.msk.bf16.gmra.mxu1 %vm611_vm1, %v609_v13 }
 0x1d6   : > { %1661 = vmatprep.mubr.bf16.mxu0 %v8004_v0  ;;  %842 = vmatprep.mubr.bf16.mxu1 %v8004_v0 }
 0x1dd   : > { %4147 = vmatmul.mubr.msk.bf16.gmra.mxu0 %vm611_vm1, %v1466_v24  ;;  %4135 = vmatmul.mubr.msk.bf16.gmra.mxu1 %vm611_vm1, %v610_v16 }
 0x1de   : > { %1671 = vmatprep.mubr.bf16.mxu0 %v8004_v0  ;;  %1399 = vmatprep.mubr.bf16.mxu1 %v1334_v25 }
 0x1e5   : > { %4148 = vmatmul.mubr.msk.bf16.gmra.mxu0 %vm611_vm1, %v1467_v27 }
 0x1e6   : > { %1681 = vmatprep.mubr.bf16.mxu0 %v8004_v0 }
 0x1ed   : > { %4149 = vmatmul.mubr.msk.bf16.gmra.mxu0 %vm611_vm1, %v1468_v29 }
 0x1ee   : > { %1691 = vmatprep.mubr.bf16.mxu0 %v8004_v0 }
 0x1f5   : > { %4150 = vmatmul.mubr.msk.bf16.gmra.mxu0 %vm611_vm1, %v1469_v30 }
 0x1f6   : > { %1701 = vmatprep.mubr.bf16.mxu0 %v8004_v0 }
 0x1fd   : > { %4151 = vmatmul.mubr.msk.bf16.gmra.mxu0 %vm611_vm1, %v1470_v45 }
 0x1fe   : > { %2258 = vmatprep.mubr.bf16.mxu0 %v2193_v46 }
 0x225   : > { %v5444_v50 = vpop.f32.mrf.mxu1 }
 0x227   : > { %v5446_v56 = vpop.f32.mrf.mxu1 }
 0x228   : > { %8383 = vst [vmem:[#allocation37_spill] sm:$0xff] %v5446_v56 }
 0x229   : > { %v5448_v57 = vpop.f32.mrf.mxu1 }
 0x22b   : > { %v5450_v61 = vpop.f32.mrf.mxu1 }
 0x22c   : > { %8384 = vst [vmem:[#allocation38_spill] sm:$0xff] %v5450_v61 }
 0x22d   : > { %v5452_v1 = vpop.f32.mrf.mxu1 }
 0x22e   : > { %8385 = vst [vmem:[#allocation39_spill] sm:$0xff] %v5452_v1 }
 0x22f   : > { %v5454_v4 = vpop.f32.mrf.mxu1 }
 0x230   : > { %8386 = vst [vmem:[#allocation40_spill] sm:$0xff] %v5454_v4 }
 0x231   : > { %v5456_v7 = vpop.f32.mrf.mxu1 }
 0x232   : > { %8387 = vst [vmem:[#allocation41_spill] sm:$0xff] %v5456_v7 }
 0x233   : > { %v5458_v52 = vpop.f32.mrf.mxu1 }
 0x234   : > { %8388 = vst [vmem:[#allocation42_spill] sm:$0xff] %v5458_v52 }
 0x235   : > { %v5460_v55 = vpop.f32.mrf.mxu1 }
 0x236   : > { %8389 = vst [vmem:[#allocation43_spill] sm:$0xff] %v5460_v55 }
 0x237   : > { %v5462_v8 = vpop.f32.mrf.mxu1 }
 0x238   : > { %8390 = vst [vmem:[#allocation44_spill] sm:$0xff] %v5462_v8  ;;  %v865_v9 = vmax.f32 %v5460_v55, %v5462_v8 }
 0x239   : > { %v5466_v10 = vpop.f32.mrf.mxu1 }
 0x23a   : > { %8391 = vst [vmem:[#allocation45_spill] sm:$0xff] %v5466_v10  ;;  %866 = vmax.xlane.f32.xlu0 %v865_v9 }
 0x23b   : > { %v5468_v11 = vpop.f32.mrf.mxu1 }
 0x23c   : > { %8392 = vst [vmem:[#allocation46_spill] sm:$0xff] %v5468_v11  ;;  %v868_v12 = vmax.f32 %v5466_v10, %v5468_v11 }
 0x23d   : > { %v5472_v13 = vpop.f32.mrf.mxu1 }
 0x23e   : > { %8393 = vst [vmem:[#allocation47_spill] sm:$0xff] %v5472_v13  ;;  %869 = vmax.xlane.f32.xlu1 %v868_v12 }
 0x23f   : > { %v5474_v14 = vpop.f32.mrf.mxu1 }
 0x240   : > { %8394 = vst [vmem:[#allocation48_spill] sm:$0xff] %v5474_v14  ;;  %v871_v16 = vmax.f32 %v5472_v13, %v5474_v14 }
 0x241   : > { %v5478_v18 = vpop.f32.mrf.mxu1 }
 0x242   : > { %8395 = vst [vmem:[#allocation49_spill] sm:$0xff] %v5478_v18  ;;  %872 = vmax.xlane.f32.xlu0 %v871_v16 }
 0x243   : > { %v5480_v19 = vpop.f32.mrf.mxu1 }
 0x244   : > { %8396 = vst [vmem:[#allocation50_spill] sm:$0xff] %v5480_v19  ;;  %v874_v23 = vmax.f32 %v5478_v18, %v5480_v19 }
 0x245   : > { %v5484_v24 = vpop.f32.mrf.mxu1  ;;  %v5486_v25 = vpop.f32.mrf.mxu0 }
 0x246   : > { %875 = vmax.xlane.f32.xlu1 %v874_v23 }
 0x247   : > { %v5488_v27 = vpop.f32.mrf.mxu1  ;;  %v5490_v29 = vpop.f32.mrf.mxu0 }
 0x248   : > { %v877_v30 = vmax.f32 %v5484_v24, %v5488_v27 }
 0x249   : > { %v5494_v45 = vpop.f32.mrf.mxu1  ;;  %v5496_v46 = vpop.f32.mrf.mxu0 }
 0x24a   : > { %8397 = vst [vmem:[#allocation51_spill] sm:$0xff] %v5494_v45  ;;  %878 = vmax.xlane.f32.xlu0 %v877_v30 }
 0x24b   : > { %v5498_v9 = vpop.f32.mrf.mxu1  ;;  %v5500_v12 = vpop.f32.mrf.mxu0 }
 0x24c   : > { %8398 = vst [vmem:[#allocation52_spill] sm:$0xff] %v5498_v9  ;;  %8399 = vst [vmem:[#allocation53_spill] sm:$0xff] %v5500_v12  ;;  %v880_v16 = vmax.f32 %v5494_v45, %v5498_v9 }
 0x24d   : > { %v5504_v23 = vpop.f32.mrf.mxu1  ;;  %v5506_v6 = vpop.f32.mrf.mxu0 }
 0x24e   : > { %8400 = vst [vmem:[#allocation54_spill] sm:$0xff] %v5506_v6  ;;  %881 = vmax.xlane.f32.xlu1 %v880_v16 }
 0x24f   : > { %v5508_v62 = vpop.f32.mrf.mxu1  ;;  %v5510_v43 = vpop.f32.mrf.mxu0 }
 0x250   : > { %8401 = vst [vmem:[#allocation55_spill] sm:$0xff] %v5510_v43  ;;  %v883_v20 = vmax.f32 %v5504_v23, %v5508_v62 }
 0x251   : > { %v5512_v54 = vpop.f32.mrf.mxu1  ;;  %v5514_v0 = vpop.f32.mrf.mxu0 }
 0x252   : > { %8402 = vst [vmem:[#allocation56_spill] sm:$0xff] %v5514_v0 }
 0x253   : > { %v5516_v30 = vpop.f32.mrf.mxu1  ;;  %v5518_v22 = vpop.f32.mrf.mxu0 }
 0x254   : > { %8403 = vst [vmem:[#allocation57_spill] sm:$0xff] %v5518_v22 }
 0x255   : > { %v5520_v48 = vpop.f32.mrf.mxu1  ;;  %v5522_v39 = vpop.f32.mrf.mxu0 }
 0x256   : > { %8404 = vst [vmem:[#allocation58_spill] sm:$0xff] %v5522_v39 }
 0x257   : > { %v5524_v34 = vpop.f32.mrf.mxu1  ;;  %v5526_v2 = vpop.f32.mrf.mxu0 }
 0x258   : > { %8405 = vst [vmem:[#allocation59_spill] sm:$0xff] %v5526_v2 }
 0x259   : > { %v5528_v16 = vpop.f32.mrf.mxu1  ;;  %v5530_v5 = vpop.f32.mrf.mxu0 }
 0x25b   : > { %v5532_v58 = vpop.f32.mrf.mxu1  ;;  %v5534_v60 = vpop.f32.mrf.mxu0 }
 0x25c   : > { %v1727_v45 = vmax.f32 %v5530_v5, %v5534_v60 }
 0x25d   : > { %v5536_v49 = vpop.f32.mrf.mxu1  ;;  %v5538_v3 = vpop.f32.mrf.mxu0 }
 0x25e   : > { %8406 = vst [vmem:[#allocation60_spill] sm:$0xff] %v5538_v3 }
 0x25f   : > { %v5540_v63 = vpop.f32.mrf.mxu1  ;;  %v5542_v59 = vpop.f32.mrf.mxu0 }
 0x260   : > { %8407 = vst [vmem:[#allocation61_spill] sm:$0xff] %v5542_v59  ;;  %v1730_v28 = vmax.f32 %v5538_v3, %v5542_v59 }
 0x261   : > { %v5546_v41 = vpop.f32.mrf.mxu1  ;;  %v5548_v51 = vpop.f32.mrf.mxu0 }
 0x262   : > { %8408 = vst [vmem:[#allocation62_spill] sm:$0xff] %v5548_v51  ;;  %1731 = vmax.xlane.f32.xlu0 %v1730_v28  ;;  %v886_v28 = vmax.f32 %v5512_v54, %v5516_v30 }
 0x263   : > { %v5550_v53 = vpop.f32.mrf.mxu1  ;;  %v5552_v17 = vpop.f32.mrf.mxu0 }
 0x264   : > { %8409 = vst [vmem:[#allocation63_spill] sm:$0xff] %v5552_v17  ;;  %v1733_v44 = vmax.f32 %v5548_v51, %v5552_v17 }
 0x265   : > { %v5558_v47 = vpop.f32.mrf.mxu0  ;;  %v5560_v42 = vpop.f32.mrf.mxu1 }
 0x266   : > { %8410 = vst [vmem:[#allocation64_spill] sm:$0xff] %v5560_v42  ;;  %884 = vmax.xlane.f32.xlu0 %v883_v20  ;;  %1734 = vmax.xlane.f32.xlu1 %v1733_v44  ;;  %v889_v44 = vmax.f32 %v5520_v48, %v5524_v34 }
 0x267   : > { %v5562_v26 = vpop.f32.mrf.mxu0  ;;  %v5564_v21 = vpop.f32.mrf.mxu1 }
 0x268   : > { %8411 = vst [vmem:[#allocation65_spill] sm:$0xff] %v5564_v21  ;;  %v1736_v15 = vmax.f32 %v5558_v47, %v5562_v26 }
 0x269   : > { %v5570_v40 = vpop.f32.mrf.mxu0  ;;  %v5572_v37 = vpop.f32.mrf.mxu1 }
 0x26a   : > { %8412 = vst [vmem:[#allocation66_spill] sm:$0xff] %v5570_v40  ;;  %8413 = vst [vmem:[#allocation67_spill] sm:$0xff] %v5572_v37  ;;  %887 = vmax.xlane.f32.xlu1 %v886_v28  ;;  %1737 = vmax.xlane.f32.xlu0 %v1736_v15  ;;  %v892_v15 = vmax.f32 %v5528_v16, %v5532_v58 }
 0x26b   : > { %v5574_v35 = vpop.f32.mrf.mxu0  ;;  %v5576_v20 = vpop.f32.mrf.mxu1 }
 0x26c   : > { %8414 = vst [vmem:[#allocation68_spill] sm:$0xff] %v5574_v35  ;;  %8415 = vst [vmem:[#allocation69_spill] sm:$0xff] %v5576_v20  ;;  %v1739_v32 = vmax.f32 %v5570_v40, %v5574_v35 }
 0x26d   : > { %v5582_v36 = vpop.f32.mrf.mxu0  ;;  %v5584_v38 = vpop.f32.mrf.mxu1 }
 0x26e   : > { %8416 = vst [vmem:[#allocation70_spill] sm:$0xff] %v5584_v38  ;;  %890 = vmax.xlane.f32.xlu0 %v889_v44  ;;  %1740 = vmax.xlane.f32.xlu1 %v1739_v32  ;;  %v895_v32 = vmax.f32 %v5536_v49, %v5540_v63 }
 0x26f   : > { %v5586_v31 = vpop.f32.mrf.mxu0  ;;  %v5588_v28 = vpop.f32.mrf.mxu1 }
 0x270   : > { %8417 = vst [vmem:[#allocation71_spill] sm:$0xff] %v5588_v28  ;;  %v1742_v33 = vmax.f32 %v5582_v36, %v5586_v31  ;;  %v1724_v28 = vmax.f32 %v5522_v39, %v5526_v2 }
 0x271   : > { %v5594_v37 = vpop.f32.mrf.mxu0  ;;  %v5596_v20 = vpop.f32.mrf.mxu1 }
 0x272   : > { %8418 = vst [vmem:[#allocation72_spill] sm:$0xff] %v5596_v20  ;;  %893 = vmax.xlane.f32.xlu1 %v892_v15  ;;  %1743 = vmax.xlane.f32.xlu0 %v1742_v33  ;;  %v898_v33 = vmax.f32 %v5546_v41, %v5550_v53 }
 0x273   : > { %v5598_v42 = vpop.f32.mrf.mxu0  ;;  %v5600_v44 = vpop.f32.mrf.mxu1 }
 0x274   : > { %8419 = vst [vmem:[#allocation73_spill] sm:$0xff] %v5600_v44  ;;  %v1745_v21 = vmax.f32 %v5594_v37, %v5598_v42 }
 0x275   : > { %v5606_v17 = vpop.f32.mrf.mxu0  ;;  %v5608_v51 = vpop.f32.mrf.mxu1 }
 0x276   : > { %8420 = vst [vmem:[#allocation74_spill] sm:$0xff] %v5608_v51  ;;  %896 = vmax.xlane.f32.xlu0 %v895_v32  ;;  %1746 = vmax.xlane.f32.xlu1 %v1745_v21 }
 0x277   : > { %v5610_v11 = vpop.f32.mrf.mxu0  ;;  %v5612_v15 = vpop.f32.mrf.mxu1 }
 0x278   : > { %8421 = vst [vmem:[#allocation75_spill] sm:$0xff] %v5612_v15  ;;  %v1748_v10 = vmax.f32 %v5606_v17, %v5610_v11 }
 0x279   : > { %v5618_v19 = vpop.f32.mrf.mxu0  ;;  %v5620_v20 = vpop.f32.mrf.mxu1 }
 0x27a   : > { %8422 = vst [vmem:[#allocation76_spill] sm:$0xff] %v5620_v20  ;;  %899 = vmax.xlane.f32.xlu1 %v898_v33  ;;  %1749 = vmax.xlane.f32.xlu0 %v1748_v10 }
 0x27b   : > { %v5622_v44 = vpop.f32.mrf.mxu0  ;;  %v5624_v32 = vpop.f32.mrf.mxu1 }
 0x27c   : > { %8423 = vst [vmem:[#allocation77_spill] sm:$0xff] %v5624_v32  ;;  %v1751_v21 = vmax.f32 %v5618_v19, %v5622_v44 }
 0x27d   : > { %v5628_v18 = vpop.f32.mrf.mxu0  ;;  %v5630_v59 = vpop.f32.mrf.mxu1 }
 0x27e   : > { %8424 = vst [vmem:[#allocation78_spill] sm:$0xff] %v5630_v59  ;;  %1752 = vmax.xlane.f32.xlu1 %v1751_v21 }
 0x27f   : > { %v5632_v3 = vpop.f32.mrf.mxu0  ;;  %v5634_v8 = vpop.f32.mrf.mxu1 }
 0x280   : > { %8425 = vst [vmem:[#allocation79_spill] sm:$0xff] %v5634_v8  ;;  %v1754_v33 = vmax.f32 %v5628_v18, %v5632_v3 }
 0x281   : > { %v5638_v10 = vpop.f32.mrf.mxu0  ;;  %v5640_v55 = vpop.f32.mrf.mxu1 }
 0x282   : > { %8426 = vst [vmem:[#allocation80_spill] sm:$0xff] %v5640_v55  ;;  %1755 = vmax.xlane.f32.xlu0 %v1754_v33  ;;  %v859_v33 = vmax.f32 %v5452_v1, %v5454_v4 }
 0x283   : > { %v5642_v14 = vpop.f32.mrf.mxu0  ;;  %v5644_v38 = vpop.f32.mrf.mxu1 }
 0x284   : > { %8427 = vst [vmem:[#allocation81_spill] sm:$0xff] %v5644_v38  ;;  %v1757_v21 = vmax.f32 %v5638_v10, %v5642_v14 }
 0x285   : > { %v5650_v13 = vpop.f32.mrf.mxu0  ;;  %v5652_v35 = vpop.f32.mrf.mxu1 }
 0x286   : > { %8428 = vst [vmem:[#allocation82_spill] sm:$0xff] %v5650_v13  ;;  %8429 = vst [vmem:[#allocation83_spill] sm:$0xff] %v5652_v35  ;;  %1725 = vmax.xlane.f32.xlu0 %v1724_v28  ;;  %1758 = vmax.xlane.f32.xlu1 %v1757_v21  ;;  %v1718_v21 = vmax.f32 %v5506_v6, %v5510_v43 }
 0x287   : > { %v5654_v40 = vpop.f32.mrf.mxu0  ;;  %v5656_v9 = vpop.f32.mrf.mxu1 }
 0x288   : > { %8430 = vst [vmem:[#allocation84_spill] sm:$0xff] %v5654_v40  ;;  %8431 = vst [vmem:[#allocation85_spill] sm:$0xff] %v5656_v9  ;;  %v862_v40 = vmax.f32 %v5456_v7, %v5458_v52 }
 0x289   : > { %v5662_v2 = vpop.f32.mrf.mxu0  ;;  %v5664_v39 = vpop.f32.mrf.mxu1 }
 0x28a   : > { %8432 = vst [vmem:[#allocation86_spill] sm:$0xff] %v5662_v2  ;;  %8433 = vst [vmem:[#allocation87_spill] sm:$0xff] %v5664_v39  ;;  %860 = vmax.xlane.f32.xlu0 %v859_v33  ;;  %1728 = vmax.xlane.f32.xlu1 %v1727_v45  ;;  %v853_v45 = vmax.f32 %v5444_v50, %v5446_v56 }
 0x28b   : > { %v5666_v13 = vpop.f32.mrf.mxu0  ;;  %v5668_v28 = vpop.f32.mrf.mxu1 }
 0x28c   : > { %8434 = vst [vmem:[#allocation88_spill] sm:$0xff] %v5666_v13  ;;  %8435 = vst [vmem:[#allocation89_spill] sm:$0xff] %v5668_v28  ;;  %v1721_v13 = vmax.f32 %v5514_v0, %v5518_v22  ;;  %v913_v22 = vmax.f32 %v5608_v51, %v5612_v15 }
 0x28d   : > { %v5674_v4 = vpop.f32.mrf.mxu0  ;;  %v5676_v1 = vpop.f32.mrf.mxu1 }
 0x28e   : > { %8436 = vst [vmem:[#allocation90_spill] sm:$0xff] %v5676_v1  ;;  %1719 = vmax.xlane.f32.xlu0 %v1718_v21  ;;  %863 = vmax.xlane.f32.xlu1 %v862_v40  ;;  %v1712_v40 = vmax.f32 %v5486_v25, %v5490_v29  ;;  %v856_v21 = vmax.f32 %v5448_v57, %v5450_v61 }
 0x28f   : > { %v5678_v2 = vpop.f32.mrf.mxu0  ;;  %v5680_v33 = vpop.f32.mrf.mxu1  ;;  %v919_v61 = vmax.f32 %v5630_v59, %v5634_v8 }
 0x290   : > { %8437 = vst [vmem:[#allocation91_spill] sm:$0xff] %v5680_v33 }
 0x291   : > { %v5686_v43 = vpop.f32.mrf.mxu0  ;;  %v5690_v7 = vpop.f32.mrf.mxu1 }
 0x292   : > { %854 = vmax.xlane.f32.xlu0 %v853_v45  ;;  %1722 = vmax.xlane.f32.xlu1 %v1721_v13  ;;  %8439 = vst [vmem:[#allocation93_spill] sm:$0xff] %v5690_v7  ;;  %v1715_v45 = vmax.f32 %v5496_v46, %v5500_v12  ;;  %v925_v12 = vmax.f32 %v5652_v35, %v5656_v9 }
 0x293   : > { %v5688_v52 = vpop.f32.mrf.mxu0  ;;  %v5702_v13 = vpop.f32.mrf.mxu1 }
 0x294   : > { %8438 = vst [vmem:[#allocation92_spill] sm:$0xff] %v5688_v52  ;;  %8442 = vst [vmem:[#allocation96_spill] sm:$0xff] %v5702_v13 }
 0x295   : > { %v5696_v6 = vpop.f32.mrf.mxu0  ;;  %v5714_v15 = vpop.f32.mrf.mxu1 }
 0x296   : > { %8440 = vst [vmem:[#allocation94_spill] sm:$0xff] %v5696_v6  ;;  %1713 = vmax.xlane.f32.xlu0 %v1712_v40  ;;  %857 = vmax.xlane.f32.xlu1 %v856_v21  ;;  %v916_v40 = vmax.f32 %v5620_v20, %v5624_v32  ;;  %v928_v32 = vmax.f32 %v5664_v39, %v5668_v28 }
 0x297   : > { %v5700_v0 = vpop.f32.mrf.mxu0  ;;  %v5724_v8 = vpop.f32.mrf.mxu1 }
 0x298   : > { %8441 = vst [vmem:[#allocation95_spill] sm:$0xff] %v5700_v0 }
 0x299   : > { %v5706_v56 = vpop.f32.mrf.mxu0  ;;  %v5734_v20 = vpop.f32.mrf.mxu1 }
 0x29a   : > { %8443 = vst [vmem:[#allocation97_spill] sm:$0xff] %v5706_v56  ;;  %914 = vmax.xlane.f32.xlu0 %v913_v22  ;;  %1716 = vmax.xlane.f32.xlu1 %v1715_v45  ;;  %v922_v22 = vmax.f32 %v5640_v55, %v5644_v38  ;;  %8449 = vst [vmem:[#allocation103_spill] sm:$0xff] %v5734_v20  ;;  %v931_v38 = vmax.f32 %v5676_v1, %v5680_v33 }
 0x29b   : > { %v5712_v21 = vpop.f32.mrf.mxu0  ;;  %v5744_v55 = vpop.f32.mrf.mxu1  ;;  %v1772_v33 = vmax.f32 %v5696_v6, %v5700_v0 }
 0x29c   : > { %8444 = vst [vmem:[#allocation98_spill] sm:$0xff] %v5712_v21  ;;  %8452 = vst [vmem:[#allocation106_spill] sm:$0xff] %v5744_v55 }
 0x29d   : > { %v5716_v51 = vpop.f32.mrf.mxu0 }
 0x29e   : > { %8445 = vst [vmem:[#allocation99_spill] sm:$0xff] %v5716_v51  ;;  %920 = vmax.xlane.f32.xlu0 %v919_v61  ;;  %917 = vmax.xlane.f32.xlu1 %v916_v40 }
 0x29f   : > { %v5722_v45 = vpop.f32.mrf.mxu0 }
 0x2a0   : > { %8446 = vst [vmem:[#allocation100_spill] sm:$0xff] %v5722_v45  ;;  %v1778_v61 = vmax.f32 %v5716_v51, %v5722_v45  ;;  %v934_v45 = vmax.f32 %v5690_v7, %v5702_v13  ;;  %v5754_v51 = vpop.f32.mrf.mxu1 }
 0x2a1   : > { %v5726_v59 = vpop.f32.mrf.mxu0 }
 0x2a2   : > { %8447 = vst [vmem:[#allocation101_spill] sm:$0xff] %v5726_v59  ;;  %926 = vmax.xlane.f32.xlu0 %v925_v12  ;;  %923 = vmax.xlane.f32.xlu1 %v922_v22 }
 0x2a3   : > { %v5732_v40 = vpop.f32.mrf.mxu0 }
 0x2a4   : > { %8448 = vst [vmem:[#allocation102_spill] sm:$0xff] %v5732_v40  ;;  %v1781_v12 = vmax.f32 %v5726_v59, %v5732_v40  ;;  %v937_v40 = vmax.f32 %v5714_v15, %v5724_v8  ;;  %v5764_v59 = vpop.f32.mrf.mxu1 }
 0x2a5   : > { %v5736_v9 = vpop.f32.mrf.mxu0 }
 0x2a6   : > { %8450 = vst [vmem:[#allocation104_spill] sm:$0xff] %v5736_v9  ;;  %929 = vmax.xlane.f32.xlu1 %v928_v32  ;;  %1779 = vmax.xlane.f32.xlu0 %v1778_v61 }
 0x2a7   : > { %v5742_v22 = vpop.f32.mrf.mxu0 }
 0x2a8   : > { %8451 = vst [vmem:[#allocation105_spill] sm:$0xff] %v5742_v22  ;;  %v1784_v32 = vmax.f32 %v5736_v9, %v5742_v22  ;;  %v940_v22 = vmax.f32 %v5734_v20, %v5744_v55  ;;  %v5774_v9 = vpop.f32.mrf.mxu1 }
 0x2a9   : > { %v5746_v28 = vpop.f32.mrf.mxu0  ;;  %8459 = vst [vmem:[#allocation113_spill] sm:$0xff] %v5774_v9 }
 0x2aa   : > { %8453 = vst [vmem:[#allocation107_spill] sm:$0xff] %v5746_v28  ;;  %932 = vmax.xlane.f32.xlu0 %v931_v38  ;;  %1782 = vmax.xlane.f32.xlu1 %v1781_v12 }
 0x2ab   : > { %v5752_v61 = vpop.f32.mrf.mxu0 }
 0x2ac   : > { %8454 = vst [vmem:[#allocation108_spill] sm:$0xff] %v5752_v61  ;;  %v1787_v38 = vmax.f32 %v5746_v28, %v5752_v61  ;;  %v943_v61 = vmax.f32 %v5754_v51, %v5764_v59  ;;  %v5784_v28 = vpop.f32.mrf.mxu1 }
 0x2ad   : > { %v5756_v39 = vpop.f32.mrf.mxu0  ;;  %8462 = vst [vmem:[#allocation116_spill] sm:$0xff] %v5784_v28 }
 0x2ae   : > { %8455 = vst [vmem:[#allocation109_spill] sm:$0xff] %v5756_v39  ;;  %935 = vmax.xlane.f32.xlu1 %v934_v45  ;;  %1785 = vmax.xlane.f32.xlu0 %v1784_v32 }
 0x2af   : > { %v5762_v12 = vpop.f32.mrf.mxu0 }
 0x2b0   : > { %8456 = vst [vmem:[#allocation110_spill] sm:$0xff] %v5762_v12  ;;  %v1790_v45 = vmax.f32 %v5756_v39, %v5762_v12  ;;  %v946_v12 = vmax.f32 %v5774_v9, %v5784_v28 }
 0x2b1   : > { %v5766_v35 = vpop.f32.mrf.mxu0 }
 0x2b2   : > { %8457 = vst [vmem:[#allocation111_spill] sm:$0xff] %v5766_v35  ;;  %938 = vmax.xlane.f32.xlu0 %v937_v40  ;;  %1788 = vmax.xlane.f32.xlu1 %v1787_v38 }
 0x2b3   : > { %v5772_v32 = vpop.f32.mrf.mxu0 }
 0x2b4   : > { %8458 = vst [vmem:[#allocation112_spill] sm:$0xff] %v5772_v32  ;;  %v1793_v40 = vmax.f32 %v5766_v35, %v5772_v32 }
 0x2b5   : > { %v5776_v13 = vpop.f32.mrf.mxu0 }
 0x2b6   : > { %8460 = vst [vmem:[#allocation114_spill] sm:$0xff] %v5776_v13  ;;  %941 = vmax.xlane.f32.xlu1 %v940_v22  ;;  %1791 = vmax.xlane.f32.xlu0 %v1790_v45 }
 0x2b7   : > { %v5782_v38 = vpop.f32.mrf.mxu0 }
 0x2b8   : > { %8461 = vst [vmem:[#allocation115_spill] sm:$0xff] %v5782_v38  ;;  %v1796_v22 = vmax.f32 %v5776_v13, %v5782_v38 }
 0x2b9   : > { %v5786_v7 = vpop.f32.mrf.mxu0 }
 0x2ba   : > { %8463 = vst [vmem:[#allocation117_spill] sm:$0xff] %v5786_v7  ;;  %944 = vmax.xlane.f32.xlu0 %v943_v61  ;;  %1794 = vmax.xlane.f32.xlu1 %v1793_v40 }
 0x2bb   : > { %v5792_v45 = vpop.f32.mrf.mxu0 }
 0x2bc   : > { %8464 = vst [vmem:[#allocation118_spill] sm:$0xff] %v5792_v45  ;;  %v1799_v32 = vmax.f32 %v5786_v7, %v5792_v45 }
 0x2bd   : > { %v5794_v39 = vpop.f32.mrf.mxu0 }
 0x2be   : > { %8465 = vst [vmem:[#allocation119_spill] sm:$0xff] %v5794_v39  ;;  %947 = vmax.xlane.f32.xlu1 %v946_v12  ;;  %1797 = vmax.xlane.f32.xlu0 %v1796_v22  ;;  %v1775_v22 = vmax.f32 %v5706_v56, %v5712_v21 }
 0x2bf   : > { %v5798_v35 = vpop.f32.mrf.mxu0 }
 0x2c0   : > { %8466 = vst [vmem:[#allocation120_spill] sm:$0xff] %v5798_v35  ;;  %v1802_v61 = vmax.f32 %v5794_v39, %v5798_v35 }
 0x2c1   : > { %v5802_v40 = vpop.f32.mrf.mxu0 }
 0x2c2   : > { %8467 = vst [vmem:[#allocation121_spill] sm:$0xff] %v5802_v40  ;;  %1800 = vmax.xlane.f32.xlu1 %v1799_v32  ;;  %1803 = vmax.xlane.f32.xlu0 %v1802_v61 }
 0x2c3   : > { %v5806_v1 = vpop.f32.mrf.mxu0  ;;  %v5812_v45 = vpop.xlane.xlu0 %866 }
 0x2c4   : > { %8468 = vst [vmem:[#allocation122_spill] sm:$0xff] %v5806_v1  ;;  %v1805_v12 = vmax.f32 %v5802_v40, %v5806_v1 }
 0x2c6   : > { %1773 = vmax.xlane.f32.xlu0 %v1772_v33  ;;  %1806 = vmax.xlane.f32.xlu1 %v1805_v12 }
 0x2c7   : > { %v5814_v7 = vpop.xlane.xlu1 %869 }
 0x2ca   : > { %1776 = vmax.xlane.f32.xlu1 %v1775_v22 }
 0x2cb   : > { %v5816_v32 = vpop.xlane.xlu0 %872 }
 0x2cf   : > { %v5818_v61 = vpop.xlane.xlu1 %875 }
 0x2d3   : > { %v5820_v0 = vpop.xlane.xlu0 %878 }
 0x2d7   : > { %v5822_v6 = vpop.xlane.xlu1 %881 }
 0x2eb   : > { %v5824_v38 = vpop.xlane.xlu0 %1731 }
 0x2ef   : > { %v885_v33 = vpop.xlane.xlu0 %884  ;;  %v5826_v12 = vpop.xlane.xlu1 %1734 }
 0x2f0   : > { %v969_v21 = vsub.f32 %v5504_v23, %v885_v33  ;;  %v970_v22 = vsub.f32 %v5508_v62, %v885_v33 }
 0x2f2   : > { %v1053_v56 = vmul.f32 1.442695, %v969_v21  ;;  %v1055_v1 = vmul.f32 1.442695, %v970_v22 }
 0x2f3   : > { %v888_v40 = vpop.xlane.xlu1 %887  ;;  %v5830_v13 = vpop.xlane.xlu0 %1737 }
 0x2f4   : > { %4278 = vpow2.f32 %v1053_v56  ;;  %v971_v35 = vsub.f32 %v5512_v54, %v888_v40  ;;  %v972_v55 = vsub.f32 %v5516_v30, %v888_v40 }
 0x2f5   : > { %4280 = vpow2.f32 %v1055_v1 }
 0x2f6   : > { %v1057_v39 = vmul.f32 1.442695, %v971_v35  ;;  %v1059_v20 = vmul.f32 1.442695, %v972_v55 }
 0x2f7   : > { %v891_v28 = vpop.xlane.xlu0 %890  ;;  %v5834_v9 = vpop.xlane.xlu1 %1740 }
 0x2f8   : > { %4282 = vpow2.f32 %v1057_v39  ;;  %v973_v23 = vsub.f32 %v5520_v48, %v891_v28  ;;  %v974_v62 = vsub.f32 %v5524_v34, %v891_v28 }
 0x2f9   : > { %4284 = vpow2.f32 %v1059_v20 }
 0x2fa   : > { %v1061_v21 = vmul.f32 1.442695, %v973_v23  ;;  %v1063_v33 = vmul.f32 1.442695, %v974_v62 }
 0x2fb   : > { %v894_v22 = vpop.xlane.xlu1 %893  ;;  %v1744_v56 = vpop.xlane.xlu0 %1743 }
 0x2fc   : > { %4286 = vpow2.f32 %v1061_v21  ;;  %v975_v54 = vsub.f32 %v5528_v16, %v894_v22  ;;  %v976_v1 = vsub.f32 %v5532_v58, %v894_v22  ;;  %v1828_v35 = vsub.f32 %v5582_v36, %v1744_v56 }
 0x2fd   : > { %4288 = vpow2.f32 %v1063_v33  ;;  %v1829_v55 = vsub.f32 %v5586_v31, %v1744_v56 }
 0x2fe   : > { %v1065_v39 = vmul.f32 1.442695, %v975_v54  ;;  %v1067_v30 = vmul.f32 1.442695, %v976_v1  ;;  %v1912_v48 = vmul.f32 1.442695, %v1828_v35 }
 0x2ff   : > { %v1914_v40 = vmul.f32 1.442695, %v1829_v55  ;;  %v897_v34 = vpop.xlane.xlu0 %896  ;;  %v1747_v20 = vpop.xlane.xlu1 %1746 }
 0x300   : > { %4290 = vpow2.f32 %v1065_v39  ;;  %v977_v28 = vsub.f32 %v5536_v49, %v897_v34  ;;  %v978_v23 = vsub.f32 %v5540_v63, %v897_v34  ;;  %v1830_v16 = vsub.f32 %v5594_v37, %v1747_v20 }
 0x301   : > { %v5845_v62 = vpop.eup %4278  ;;  %4292 = vpow2.f32 %v1067_v30  ;;  %v1831_v36 = vsub.f32 %v5598_v42, %v1747_v20 }
 0x302   : > { %8469 = vst [vmem:[#allocation123_spill] sm:$0xff] %v5845_v62  ;;  %v5848_v58 = vpop.eup %4280  ;;  %4294 = vpow2.f32 %v1912_v48  ;;  %v1069_v31 = vmul.f32 1.442695, %v977_v28  ;;  %v1071_v21 = vmul.f32 1.442695, %v978_v23 }
 0x303   : > { %8470 = vst [vmem:[#allocation124_spill] sm:$0xff] %v5848_v58  ;;  %v1916_v33 = vmul.f32 1.442695, %v1830_v16  ;;  %4296 = vpow2.f32 %v1914_v40  ;;  %v1918_v22 = vmul.f32 1.442695, %v1831_v36  ;;  %v900_v56 = vpop.xlane.xlu1 %899  ;;  %v1750_v54 = vpop.xlane.xlu0 %1749  ;;  %v1171_v63 = vadd.f32 %v5848_v58, %v5845_v62 }
 0x304   : > { %4298 = vpow2.f32 %v1069_v31  ;;  %v979_v37 = vsub.f32 %v5546_v41, %v900_v56  ;;  %v980_v49 = vsub.f32 %v5550_v53, %v900_v56  ;;  %v1832_v42 = vsub.f32 %v5606_v17, %v1750_v54 }
 0x305   : > { %v5855_v1 = vpop.eup %4282  ;;  %4300 = vpow2.f32 %v1071_v21  ;;  %v1833_v35 = vsub.f32 %v5610_v11, %v1750_v54  ;;  %1172 = vadd.xlane.f32.xlu0 %v1171_v63 }
 0x306   : > { %8471 = vst [vmem:[#allocation125_spill] sm:$0xff] %v5855_v1  ;;  %v5858_v55 = vpop.eup %4284  ;;  %4302 = vpow2.f32 %v1916_v33  ;;  %v1073_v39 = vmul.f32 1.442695, %v979_v37  ;;  %v1075_v30 = vmul.f32 1.442695, %v980_v49 }
 0x307   : > { %8472 = vst [vmem:[#allocation126_spill] sm:$0xff] %v5858_v55  ;;  %v1920_v48 = vmul.f32 1.442695, %v1832_v42  ;;  %4304 = vpow2.f32 %v1918_v22  ;;  %v1922_v40 = vmul.f32 1.442695, %v1833_v35  ;;  %v1753_v34 = vpop.xlane.xlu1 %1752  ;;  %v1174_v41 = vadd.f32 %v5858_v55, %v5855_v1 }
 0x308   : > { %4306 = vpow2.f32 %v1073_v39  ;;  %v1834_v17 = vsub.f32 %v5618_v19, %v1753_v34  ;;  %v1835_v53 = vsub.f32 %v5622_v44, %v1753_v34  ;;  %v1766_v1 = vmax.f32 %v5674_v4, %v5678_v2 }
 0x309   : > { %v5864_v20 = vpop.eup %4286  ;;  %4308 = vpow2.f32 %v1075_v30  ;;  %1175 = vadd.xlane.f32.xlu1 %v1174_v41  ;;  %v965_v30 = vsub.f32 %v5484_v24, %v5820_v0 }
 0x30a   : > { %8473 = vst [vmem:[#allocation127_spill] sm:$0xff] %v5864_v20  ;;  %v5866_v11 = vpop.eup %4288  ;;  %4310 = vpow2.f32 %v1920_v48  ;;  %v1924_v28 = vmul.f32 1.442695, %v1834_v17  ;;  %v1926_v23 = vmul.f32 1.442695, %v1835_v53 }
 0x30b   : > { %4312 = vpow2.f32 %v1922_v40  ;;  %v1756_v16 = vpop.xlane.xlu0 %1755  ;;  %v1177_v36 = vadd.f32 %v5866_v11, %v5864_v20 }
 0x30c   : > { %4314 = vpow2.f32 %v1924_v28  ;;  %v1836_v31 = vsub.f32 %v5628_v18, %v1756_v16  ;;  %v1837_v19 = vsub.f32 %v5632_v3, %v1756_v16  ;;  %v1045_v16 = vmul.f32 1.442695, %v965_v30 }
 0x30d   : > { %v5872_v44 = vpop.eup %4290  ;;  %4316 = vpow2.f32 %v1926_v23  ;;  %1178 = vadd.xlane.f32.xlu0 %v1177_v36 }
 0x30e   : > { %8474 = vst [vmem:[#allocation128_spill] sm:$0xff] %v5872_v44  ;;  %v5874_v21 = vpop.eup %4292  ;;  %v1928_v33 = vmul.f32 1.442695, %v1836_v31  ;;  %v1930_v22 = vmul.f32 1.442695, %v1837_v19  ;;  %v1825_v31 = vsub.f32 %v5562_v26, %v5830_v13 }
 0x30f   : > { %v5876_v56 = vpop.eup %4294  ;;  %v5878_v54 = vpop.xlane.xlu0 %1725  ;;  %v1180_v37 = vadd.f32 %v5874_v21, %v5872_v44 }
 0x310   : > { %8475 = vst [vmem:[#allocation129_spill] sm:$0xff] %v5876_v56  ;;  %v1759_v63 = vpop.xlane.xlu1 %1758  ;;  %v5882_v49 = vpop.eup %4296  ;;  %4318 = vpow2.f32 %v1928_v33 }
 0x311   : > { %8476 = vst [vmem:[#allocation130_spill] sm:$0xff] %v5882_v49  ;;  %v1838_v3 = vsub.f32 %v5638_v10, %v1759_v63  ;;  %v5885_v18 = vpop.eup %4298  ;;  %4320 = vpow2.f32 %v1930_v22  ;;  %v1839_v42 = vsub.f32 %v5642_v14, %v1759_v63  ;;  %v2030_v35 = vadd.f32 %v5882_v49, %v5876_v56  ;;  %1181 = vadd.xlane.f32.xlu1 %v1180_v37 }
 0x312   : > { %v5890_v39 = vpop.eup %4300  ;;  %v966_v10 = vsub.f32 %v5488_v27, %v5820_v0  ;;  %v1824_v0 = vsub.f32 %v5558_v47, %v5830_v13  ;;  %v8481_v47 = vld [vmem:[#allocation51_spill] sm:$0xff] }
 0x313   : > { %v1932_v48 = vmul.f32 1.442695, %v1838_v3  ;;  %v5894_v40 = vpop.eup %4302  ;;  %v1934_v34 = vmul.f32 1.442695, %v1839_v42  ;;  %2031 = vadd.xlane.f32.xlu0 %v2030_v35  ;;  %v5898_v41 = vpop.xlane.xlu0 %860  ;;  %v1183_v17 = vadd.f32 %v5890_v39, %v5885_v18  ;;  %v967_v37 = vsub.f32 %v8481_v47, %v5822_v6  ;;  %v8483_v42 = vld [vmem:[#allocation52_spill] sm:$0xff] }
 0x314   : > { %8477 = vst [vmem:[#allocation131_spill] sm:$0xff] %v5894_v40  ;;  %v5900_v14 = vpop.xlane.xlu1 %1728  ;;  %v5904_v53 = vpop.eup %4304  ;;  %v1047_v36 = vmul.f32 1.442695, %v966_v10  ;;  %v968_v26 = vsub.f32 %v8483_v42, %v5822_v6  ;;  %v1904_v30 = vmul.f32 1.442695, %v1824_v0  ;;  %v8485_v6 = vld [vmem:[#allocation66_spill] sm:$0xff] }
 0x315   : > { %8478 = vst [vmem:[#allocation132_spill] sm:$0xff] %v5904_v53  ;;  %v5906_v28 = vpop.eup %4306  ;;  %v2033_v24 = vadd.f32 %v5904_v53, %v5894_v40  ;;  %4322 = vpow2.f32 %v1932_v48  ;;  %v1906_v48 = vmul.f32 1.442695, %v1825_v31  ;;  %v1826_v47 = vsub.f32 %v8485_v6, %v5834_v9  ;;  %v8493_v40 = vld [vmem:[#allocation48_spill] sm:$0xff] }
 0x316   : > { %v5910_v23 = vpop.eup %4308  ;;  %4324 = vpow2.f32 %v1934_v34  ;;  %v1051_v56 = vmul.f32 1.442695, %v968_v26  ;;  %v8489_v26 = vld [vmem:[#allocation47_spill] sm:$0xff]  ;;  %v962_v49 = vsub.f32 %v8493_v40, %v5816_v32 }
 0x317   : > { %v5914_v27 = vpop.eup %4310  ;;  %1184 = vadd.xlane.f32.xlu0 %v1183_v17  ;;  %2034 = vadd.xlane.f32.xlu1 %v2033_v24  ;;  %v5918_v19 = vpop.xlane.xlu0 %1719  ;;  %v1186_v22 = vadd.f32 %v5910_v23, %v5906_v28  ;;  %4326 = vpow2.f32 %v1045_v16  ;;  %v1049_v24 = vmul.f32 1.442695, %v967_v37  ;;  %v8487_v16 = vld [vmem:[#allocation68_spill] sm:$0xff] }
 0x318   : > { %8479 = vst [vmem:[#allocation133_spill] sm:$0xff] %v5914_v27  ;;  %v5920_v33 = vpop.xlane.xlu1 %863  ;;  %v5924_v63 = vpop.eup %4312  ;;  %4328 = vpow2.f32 %v1047_v36  ;;  %v1827_v0 = vsub.f32 %v8487_v16, %v5834_v9  ;;  %v961_v9 = vsub.f32 %v8489_v26, %v5816_v32  ;;  %v8497_v32 = vld [vmem:[#allocation60_spill] sm:$0xff] }
 0x319   : > { %8480 = vst [vmem:[#allocation134_spill] sm:$0xff] %v5924_v63  ;;  %v5928_v3 = vpop.eup %4314  ;;  %v2036_v13 = vadd.f32 %v5924_v63, %v5914_v27  ;;  %4330 = vpow2.f32 %v1904_v30  ;;  %v8491_v30 = vld [vmem:[#allocation71_spill] sm:$0xff]  ;;  %v1820_v40 = vsub.f32 %v8497_v32, %v5824_v38  ;;  %v1039_v63 = vmul.f32 1.442695, %v962_v49  ;;  %v8504_v49 = vld [vmem:[#allocation50_spill] sm:$0xff] }
 0x31a   : > { %8482 = vst [vmem:[#allocation51_spill] sm:$0xff] %v5928_v3  ;;  %v5934_v35 = vpop.eup %4316  ;;  %4332 = vpow2.f32 %v1906_v48  ;;  %v1910_v6 = vmul.f32 1.442695, %v1827_v0  ;;  %v8492_v48 = vld [vmem:[#allocation70_spill] sm:$0xff]  ;;  %v8496_v0 = vld [vmem:[#allocation44_spill] sm:$0xff] }
 0x31b   : > { %8484 = vst [vmem:[#allocation52_spill] sm:$0xff] %v5934_v35  ;;  %2037 = vadd.xlane.f32.xlu0 %v2036_v13  ;;  %1187 = vadd.xlane.f32.xlu1 %v1186_v22  ;;  %v5936_v10 = vpop.xlane.xlu0 %854  ;;  %v2039_v17 = vadd.f32 %v5934_v35, %v5928_v3  ;;  %4334 = vpow2.f32 %v1049_v24  ;;  %v1908_v13 = vmul.f32 1.442695, %v1826_v47  ;;  %v1037_v3 = vmul.f32 1.442695, %v961_v9 }
 0x31c   : > { %v5938_v34 = vpop.xlane.xlu1 %1722  ;;  %4336 = vpow2.f32 %v1051_v56  ;;  %v8495_v56 = vld [vmem:[#allocation43_spill] sm:$0xff] }
 0x31d   : > { %v5944_v42 = vpop.eup %4318  ;;  %v957_v47 = vsub.f32 %v8495_v56, %v5812_v45  ;;  %4338 = vpow2.f32 %v1908_v13  ;;  %v8499_v13 = vld [vmem:[#allocation61_spill] sm:$0xff] }
 0x31e   : > { %8486 = vst [vmem:[#allocation66_spill] sm:$0xff] %v5944_v42  ;;  %v5948_v36 = vpop.eup %4320  ;;  %4340 = vpow2.f32 %v1910_v6  ;;  %v1821_v56 = vsub.f32 %v8499_v13, %v5824_v38  ;;  %v8505_v38 = vld [vmem:[#allocation45_spill] sm:$0xff]  ;;  %v1896_v13 = vmul.f32 1.442695, %v1820_v40  ;;  %v8509_v40 = vld [vmem:[#allocation62_spill] sm:$0xff] }
 0x31f   : > { %8488 = vst [vmem:[#allocation68_spill] sm:$0xff] %v5948_v36  ;;  %2040 = vadd.xlane.f32.xlu1 %v2039_v17  ;;  %v5950_v31 = vpop.xlane.xlu0 %1713  ;;  %v2042_v37 = vadd.f32 %v5948_v36, %v5944_v42  ;;  %v907_v17 = vmax.f32 %v8492_v48, %v8491_v30  ;;  %v1029_v9 = vmul.f32 1.442695, %v957_v47  ;;  %v8503_v42 = vld [vmem:[#allocation72_spill] sm:$0xff]  ;;  %v964_v36 = vsub.f32 %v8504_v49, %v5818_v61  ;;  %v8507_v47 = vld [vmem:[#allocation46_spill] sm:$0xff] }
 0x320   : > { %v5952_v22 = vpop.xlane.xlu1 %857  ;;  %4342 = vpow2.f32 %v1037_v3  ;;  %v960_v58 = vsub.f32 %v8507_v47, %v5814_v7  ;;  %v1822_v49 = vsub.f32 %v8509_v40, %v5826_v12  ;;  %v8514_v40 = vld [vmem:[#allocation59_spill] sm:$0xff] }
 0x321   : > { %2043 = vadd.xlane.f32.xlu0 %v2042_v37  ;;  %v958_v37 = vsub.f32 %v8496_v0, %v5812_v45  ;;  %v8501_v0 = vld [vmem:[#allocation49_spill] sm:$0xff]  ;;  %4344 = vpow2.f32 %v1039_v63  ;;  %v1043_v63 = vmul.f32 1.442695, %v964_v36  ;;  %v1817_v55 = vsub.f32 %v8514_v40, %v5878_v54  ;;  %v8520_v40 = vld [vmem:[#allocation64_spill] sm:$0xff] }
 0x322   : > { %v5958_v16 = vpop.eup %4322  ;;  %v963_v32 = vsub.f32 %v8501_v0, %v5818_v61  ;;  %v1898_v0 = vmul.f32 1.442695, %v1821_v56  ;;  %4346 = vpow2.f32 %v1029_v9  ;;  %v8513_v9 = vld [vmem:[#allocation58_spill] sm:$0xff]  ;;  %v1900_v36 = vmul.f32 1.442695, %v1822_v49  ;;  %v8519_v49 = vld [vmem:[#allocation65_spill] sm:$0xff] }
 0x323   : > { %8490 = vst [vmem:[#allocation47_spill] sm:$0xff] %v5958_v16  ;;  %v5964_v27 = vpop.xlane.xlu0 %914  ;;  %v5968_v24 = vpop.eup %4324  ;;  %v1031_v35 = vmul.f32 1.442695, %v958_v37 }
 0x324   : > { %v5966_v53 = vpop.xlane.xlu1 %1716  ;;  %8494 = vst [vmem:[#allocation71_spill] sm:$0xff] %v5968_v24  ;;  %v2045_v26 = vadd.f32 %v5968_v24, %v5958_v16  ;;  %v5978_v62 = vpop.eup %4326  ;;  %v8502_v16 = vld [vmem:[#allocation73_spill] sm:$0xff]  ;;  %v1041_v3 = vmul.f32 1.442695, %v963_v32  ;;  %v1816_v32 = vsub.f32 %v8513_v9, %v5878_v54 }
 0x325   : > { %908 = vmax.xlane.f32.xlu0 %v907_v17  ;;  %8498 = vst [vmem:[#allocation70_spill] sm:$0xff] %v5978_v62  ;;  %v5988_v17 = vpop.eup %4328  ;;  %v910_v24 = vmax.f32 %v8503_v42, %v8502_v16  ;;  %4348 = vpow2.f32 %v1031_v35 }
 0x326   : > { %2046 = vadd.xlane.f32.xlu1 %v2045_v26  ;;  %8500 = vst [vmem:[#allocation48_spill] sm:$0xff] %v5988_v17  ;;  %v959_v26 = vsub.f32 %v8505_v38, %v5814_v7  ;;  %v5998_v20 = vpop.eup %4330  ;;  %v1165_v61 = vadd.f32 %v5988_v17, %v5978_v62  ;;  %v1769_v7 = vmax.f32 %v5686_v43, %v5688_v52  ;;  %4350 = vpow2.f32 %v1896_v13 }
 0x327   : > { %v5984_v45 = vpop.xlane.xlu0 %920  ;;  %8506 = vst [vmem:[#allocation43_spill] sm:$0xff] %v5998_v20  ;;  %v1035_v17 = vmul.f32 1.442695, %v960_v58  ;;  %4352 = vpow2.f32 %v1898_v0  ;;  %v8517_v0 = vld [vmem:[#allocation40_spill] sm:$0xff]  ;;  %v1888_v9 = vmul.f32 1.442695, %v1816_v32 }
 0x328   : > { %v5986_v6 = vpop.xlane.xlu1 %917  ;;  %v1033_v62 = vmul.f32 1.442695, %v959_v26  ;;  %4354 = vpow2.f32 %v1041_v3  ;;  %v8515_v26 = vld [vmem:[#allocation39_spill] sm:$0xff]  ;;  %v954_v54 = vsub.f32 %v8517_v0, %v5898_v41  ;;  %v1818_v3 = vsub.f32 %v5530_v5, %v5900_v14 }
 0x329   : > { %1767 = vmax.xlane.f32.xlu0 %v1766_v1  ;;  %v6008_v1 = vpop.eup %4332  ;;  %v953_v13 = vsub.f32 %v8515_v26, %v5898_v41  ;;  %4356 = vpow2.f32 %v1043_v63  ;;  %v901_v26 = vmax.f32 %v8520_v40, %v8519_v49  ;;  %v1890_v63 = vmul.f32 1.442695, %v1817_v55 }
 0x32a   : > { %911 = vmax.xlane.f32.xlu1 %v910_v24  ;;  %8508 = vst [vmem:[#allocation44_spill] sm:$0xff] %v6008_v1  ;;  %v6012_v38 = vpop.eup %4334  ;;  %v8511_v24 = vld [vmem:[#allocation63_spill] sm:$0xff]  ;;  %4358 = vpow2.f32 %v1033_v62  ;;  %v8521_v62 = vld [vmem:[#allocation54_spill] sm:$0xff]  ;;  %v1023_v5 = vmul.f32 1.442695, %v954_v54 }
 0x32b   : > { %v6002_v44 = vpop.xlane.xlu0 %926  ;;  %8510 = vst [vmem:[#allocation60_spill] sm:$0xff] %v6012_v38  ;;  %v1823_v56 = vsub.f32 %v8511_v24, %v5826_v12  ;;  %v6018_v47 = vpop.eup %4336  ;;  %v2024_v12 = vadd.f32 %v6008_v1, %v5998_v20  ;;  %4360 = vpow2.f32 %v1035_v17  ;;  %v1021_v0 = vmul.f32 1.442695, %v953_v13  ;;  %v8522_v20 = vld [vmem:[#allocation55_spill] sm:$0xff]  ;;  %v8526_v13 = vld [vmem:[#allocation82_spill] sm:$0xff] }
 0x32c   : > { %v6004_v37 = vpop.xlane.xlu1 %923  ;;  %8512 = vst [vmem:[#allocation61_spill] sm:$0xff] %v6018_v47  ;;  %4362 = vpow2.f32 %v1900_v36  ;;  %v1812_v32 = vsub.f32 %v8521_v62, %v5918_v19  ;;  %v1813_v1 = vsub.f32 %v8522_v20, %v5918_v19  ;;  %v8525_v36 = vld [vmem:[#allocation84_spill] sm:$0xff]  ;;  %v8527_v54 = vld [vmem:[#allocation42_spill] sm:$0xff] }
 0x32d   : > { %1166 = vadd.xlane.f32.xlu0 %v1165_v61  ;;  %v6032_v61 = vpop.eup %4338  ;;  %v1902_v58 = vmul.f32 1.442695, %v1823_v56  ;;  %v1819_v56 = vsub.f32 %v5534_v60, %v5900_v14  ;;  %v1892_v60 = vmul.f32 1.442695, %v1818_v3  ;;  %v8523_v14 = vld [vmem:[#allocation41_spill] sm:$0xff]  ;;  %v956_v62 = vsub.f32 %v8527_v54, %v5920_v33 }
 0x32e   : > { %1770 = vmax.xlane.f32.xlu1 %v1769_v7  ;;  %8516 = vst [vmem:[#allocation49_spill] sm:$0xff] %v6032_v61  ;;  %v1168_v7 = vadd.f32 %v6018_v47, %v6012_v38  ;;  %v6038_v24 = vpop.eup %4340  ;;  %v955_v17 = vsub.f32 %v8523_v14, %v5920_v33  ;;  %v1760_v38 = vmax.f32 %v8526_v13, %v8525_v36  ;;  %v1880_v3 = vmul.f32 1.442695, %v1812_v32  ;;  %v8532_v33 = vld [vmem:[#allocation37_spill] sm:$0xff] }
 0x32f   : > { %v6026_v35 = vpop.xlane.xlu0 %1779  ;;  %8518 = vst [vmem:[#allocation73_spill] sm:$0xff] %v6038_v24  ;;  %4364 = vpow2.f32 %v1902_v58  ;;  %v2027_v55 = vadd.f32 %v6038_v24, %v6032_v61  ;;  %v1894_v58 = vmul.f32 1.442695, %v1819_v56  ;;  %v8530_v61 = vld [vmem:[#allocation69_spill] sm:$0xff]  ;;  %v1882_v24 = vmul.f32 1.442695, %v1813_v1 }
 0x330   : > { %v6024_v52 = vpop.xlane.xlu1 %929  ;;  %4366 = vpow2.f32 %v1888_v9  ;;  %v1025_v47 = vmul.f32 1.442695, %v955_v17  ;;  %v8536_v13 = vld [vmem:[#allocation57_spill] sm:$0xff] }
 0x331   : > { %2025 = vadd.xlane.f32.xlu0 %v2024_v12  ;;  %4368 = vpow2.f32 %v1890_v63  ;;  %v8531_v63 = vld [vmem:[#allocation67_spill] sm:$0xff] }
 0x332   : > { %1169 = vadd.xlane.f32.xlu1 %v1168_v7  ;;  %v6058_v7 = vpop.eup %4342  ;;  %4370 = vpow2.f32 %v1021_v0  ;;  %v904_v56 = vmax.f32 %v8531_v63, %v8530_v61  ;;  %v8534_v0 = vld [vmem:[#allocation56_spill] sm:$0xff]  ;;  %v1815_v61 = vsub.f32 %v8536_v13, %v5938_v34 }
 0x333   : > { %v6046_v41 = vpop.xlane.xlu0 %932  ;;  %8524 = vst [vmem:[#allocation72_spill] sm:$0xff] %v6058_v7  ;;  %v6068_v9 = vpop.eup %4344  ;;  %4372 = vpow2.f32 %v1023_v5  ;;  %v1814_v32 = vsub.f32 %v8534_v0, %v5938_v34  ;;  %v1808_v34 = vsub.f32 %v5486_v25, %v5950_v31 }
 0x334   : > { %v6048_v12 = vpop.xlane.xlu1 %1782  ;;  %8528 = vst [vmem:[#allocation50_spill] sm:$0xff] %v6068_v9  ;;  %v6072_v14 = vpop.eup %4346  ;;  %4374 = vpow2.f32 %v1892_v60 }
 0x335   : > { %902 = vmax.xlane.f32.xlu0 %v901_v26  ;;  %v949_v26 = vsub.f32 %v5444_v50, %v5936_v10  ;;  %8529 = vst [vmem:[#allocation45_spill] sm:$0xff] %v6072_v14  ;;  %v6078_v54 = vpop.eup %4348  ;;  %4376 = vpow2.f32 %v1894_v58  ;;  %v1027_v50 = vmul.f32 1.442695, %v956_v62  ;;  %v8540_v58 = vld [vmem:[#allocation86_spill] sm:$0xff] }
 0x336   : > { %2028 = vadd.xlane.f32.xlu1 %v2027_v55  ;;  %v950_v55 = vsub.f32 %v8532_v33, %v5936_v10  ;;  %8533 = vst [vmem:[#allocation46_spill] sm:$0xff] %v6078_v54  ;;  %v6082_v36 = vpop.eup %4350  ;;  %v1159_v10 = vadd.f32 %v6068_v9, %v6058_v7  ;;  %4378 = vpow2.f32 %v1880_v3  ;;  %v8539_v33 = vld [vmem:[#allocation88_spill] sm:$0xff]  ;;  %v1809_v7 = vsub.f32 %v5490_v29, %v5950_v31  ;;  %v8542_v29 = vld [vmem:[#allocation38_spill] sm:$0xff] }
 0x337   : > { %v6066_v19 = vpop.xlane.xlu0 %1785  ;;  %8535 = vst [vmem:[#allocation62_spill] sm:$0xff] %v6082_v36  ;;  %v1013_v60 = vmul.f32 1.442695, %v949_v26  ;;  %v1763_v62 = vmax.f32 %v8540_v58, %v8539_v33  ;;  %4380 = vpow2.f32 %v1882_v24  ;;  %v1886_v26 = vmul.f32 1.442695, %v1815_v61 }
 0x338   : > { %v6064_v20 = vpop.xlane.xlu1 %935  ;;  %v1015_v0 = vmul.f32 1.442695, %v950_v55  ;;  %4382 = vpow2.f32 %v1025_v47  ;;  %v951_v9 = vsub.f32 %v5448_v57, %v5952_v22  ;;  %v952_v31 = vsub.f32 %v8542_v29, %v5952_v22  ;;  %v8544_v57 = vld [vmem:[#allocation74_spill] sm:$0xff] }
 0x339   : > { %1761 = vmax.xlane.f32.xlu0 %v1760_v38  ;;  %v6092_v38 = vpop.eup %4352  ;;  %4384 = vpow2.f32 %v1027_v50  ;;  %v1872_v61 = vmul.f32 1.442695, %v1808_v34  ;;  %v989_v50 = vsub.f32 %v8544_v57, %v5964_v27  ;;  %v1810_v57 = vsub.f32 %v5496_v46, %v5966_v53 }
 0x33a   : > { %905 = vmax.xlane.f32.xlu1 %v904_v56  ;;  %8537 = vst [vmem:[#allocation63_spill] sm:$0xff] %v6092_v38  ;;  %v6094_v17 = vpop.eup %4354  ;;  %v1884_v56 = vmul.f32 1.442695, %v1814_v32  ;;  %v2018_v25 = vadd.f32 %v6092_v38, %v6082_v36  ;;  %4386 = vpow2.f32 %v1013_v60  ;;  %v1874_v36 = vmul.f32 1.442695, %v1809_v7 }
 0x33b   : > { %v6086_v1 = vpop.xlane.xlu0 %938  ;;  %8538 = vst [vmem:[#allocation58_spill] sm:$0xff] %v6094_v17  ;;  %v6100_v13 = vpop.eup %4356  ;;  %4388 = vpow2.f32 %v1015_v0  ;;  %v1017_v60 = vmul.f32 1.442695, %v951_v9  ;;  %v1153_v0 = vadd.f32 %v6078_v54, %v6072_v14  ;;  %v1093_v9 = vmul.f32 1.442695, %v989_v50 }
 0x33c   : > { %v6088_v5 = vpop.xlane.xlu1 %1788  ;;  %v6104_v3 = vpop.eup %4358  ;;  %4390 = vpow2.f32 %v1884_v56  ;;  %v1005_v46 = vsub.f32 %v5714_v15, %v6086_v1  ;;  %v8552_v15 = vld [vmem:[#allocation113_spill] sm:$0xff] }
 0x33d   : > { %1160 = vadd.xlane.f32.xlu0 %v1159_v10  ;;  %8541 = vst [vmem:[#allocation59_spill] sm:$0xff] %v6104_v3  ;;  %v6114_v47 = vpop.eup %4360  ;;  %v1162_v10 = vadd.f32 %v6100_v13, %v6094_v17  ;;  %4392 = vpow2.f32 %v1886_v26  ;;  %v8548_v26 = vld [vmem:[#allocation53_spill] sm:$0xff] }
 0x33e   : > { %1764 = vmax.xlane.f32.xlu1 %v1763_v62  ;;  %v6118_v32 = vpop.eup %4362  ;;  %4394 = vpow2.f32 %v1872_v61 }
 0x33f   : > { %v6110_v55 = vpop.xlane.xlu0 %1791  ;;  %8543 = vst [vmem:[#allocation39_spill] sm:$0xff] %v6118_v32  ;;  %v6124_v62 = vpop.eup %4364  ;;  %4396 = vpow2.f32 %v1874_v36  ;;  %v1876_v36 = vmul.f32 1.442695, %v1810_v57 }
 0x340   : > { %v6108_v24 = vpop.xlane.xlu1 %941  ;;  %v6126_v38 = vpop.eup %4366  ;;  %v2021_v14 = vadd.f32 %v6124_v62, %v6118_v32  ;;  %4398 = vpow2.f32 %v1017_v60  ;;  %v8554_v32 = vld [vmem:[#allocation116_spill] sm:$0xff] }
 0x341   : > { %2019 = vadd.xlane.f32.xlu0 %v2018_v25  ;;  %8545 = vst [vmem:[#allocation40_spill] sm:$0xff] %v6126_v38  ;;  %v6132_v34 = vpop.eup %4368  ;;  %v1019_v25 = vmul.f32 1.442695, %v952_v31 }
 0x342   : > { %1163 = vadd.xlane.f32.xlu1 %v1162_v10  ;;  %8546 = vst [vmem:[#allocation65_spill] sm:$0xff] %v6132_v34  ;;  %v6138_v17 = vpop.eup %4370  ;;  %v1811_v10 = vsub.f32 %v8548_v26, %v5966_v53 }
 0x343   : > { %v945_v22 = vpop.xlane.xlu0 %944  ;;  %8547 = vst [vmem:[#allocation64_spill] sm:$0xff] %v6138_v17  ;;  %v6144_v54 = vpop.eup %4372  ;;  %4400 = vpow2.f32 %v1019_v25 }
 0x344   : > { %v6128_v29 = vpop.xlane.xlu1 %1794  ;;  %v1009_v56 = vsub.f32 %v5754_v51, %v945_v22  ;;  %v1010_v7 = vsub.f32 %v5764_v59, %v945_v22  ;;  %8549 = vst [vmem:[#allocation54_spill] sm:$0xff] %v6144_v54  ;;  %v6148_v31 = vpop.eup %4374  ;;  %v1006_v59 = vsub.f32 %v5724_v8, %v6086_v1  ;;  %v2012_v22 = vadd.f32 %v6132_v34, %v6126_v38 }
 0x345   : > { %1154 = vadd.xlane.f32.xlu0 %v1153_v0  ;;  %8550 = vst [vmem:[#allocation55_spill] sm:$0xff] %v6148_v31  ;;  %v6156_v0 = vpop.eup %4376  ;;  %4402 = vpow2.f32 %v1093_v9  ;;  %v1878_v60 = vmul.f32 1.442695, %v1811_v10  ;;  %v1147_v9 = vadd.f32 %v6144_v54, %v6138_v17  ;;  %v8561_v17 = vld [vmem:[#allocation120_spill] sm:$0xff] }
 0x346   : > { %v1133_v51 = vmul.f32 1.442695, %v1009_v56  ;;  %v1135_v61 = vmul.f32 1.442695, %v1010_v7  ;;  %2022 = vadd.xlane.f32.xlu1 %v2021_v14  ;;  %8551 = vst [vmem:[#allocation41_spill] sm:$0xff] %v6156_v0  ;;  %v6159_v26 = vpop.eup %4378  ;;  %v1156_v14 = vadd.f32 %v6114_v47, %v6104_v3 }
 0x347   : > { %v6152_v50 = vpop.xlane.xlu0 %1797  ;;  %8553 = vst [vmem:[#allocation42_spill] sm:$0xff] %v6159_v26  ;;  %v6164_v1 = vpop.eup %4380  ;;  %v1125_v7 = vmul.f32 1.442695, %v1005_v46  ;;  %v1127_v25 = vmul.f32 1.442695, %v1006_v59  ;;  %v8557_v46 = vld [vmem:[#allocation103_spill] sm:$0xff] }
 0x348   : > { %v948_v53 = vpop.xlane.xlu1 %947  ;;  %8555 = vst [vmem:[#allocation67_spill] sm:$0xff] %v6164_v1  ;;  %4404 = vpow2.f32 %v1133_v51  ;;  %v6166_v38 = vpop.eup %4382  ;;  %v1007_v51 = vsub.f32 %v8557_v46, %v6108_v24 }
 0x349   : > { %v1011_v56 = vsub.f32 %v8552_v15, %v948_v53  ;;  %v1012_v8 = vsub.f32 %v8554_v32, %v948_v53  ;;  %2013 = vadd.xlane.f32.xlu0 %v2012_v22  ;;  %8556 = vst [vmem:[#allocation37_spill] sm:$0xff] %v6166_v38  ;;  %4406 = vpow2.f32 %v1135_v61  ;;  %v2015_v32 = vadd.f32 %v6156_v0, %v6148_v31  ;;  %v6174_v10 = vpop.eup %4384  ;;  %v8558_v22 = vld [vmem:[#allocation119_spill] sm:$0xff] }
 0x34a   : > { %1157 = vadd.xlane.f32.xlu1 %v1156_v14  ;;  %4408 = vpow2.f32 %v1876_v36  ;;  %v6179_v61 = vpop.eup %4386  ;;  %v8560_v14 = vld [vmem:[#allocation106_spill] sm:$0xff] }
 0x34b   : > { %v1804_v15 = vpop.xlane.xlu0 %1803  ;;  %v1137_v53 = vmul.f32 1.442695, %v1011_v56  ;;  %8559 = vst [vmem:[#allocation56_spill] sm:$0xff] %v6179_v61  ;;  %4410 = vpow2.f32 %v1878_v60  ;;  %v1008_v34 = vsub.f32 %v8560_v14, %v6108_v24  ;;  %v1139_v3 = vmul.f32 1.442695, %v1012_v8  ;;  %v6184_v31 = vpop.eup %4388 }
 0x34c   : > { %v6168_v57 = vpop.xlane.xlu1 %1800  ;;  %v1868_v59 = vsub.f32 %v8558_v22, %v1804_v15  ;;  %v1869_v54 = vsub.f32 %v8561_v17, %v1804_v15  ;;  %4412 = vpow2.f32 %v1125_v7  ;;  %v6186_v0 = vpop.eup %4390  ;;  %v2006_v60 = vadd.f32 %v6164_v1, %v6159_v26  ;;  %v8562_v15 = vld [vmem:[#allocation114_spill] sm:$0xff] }
 0x34d   : > { %1148 = vadd.xlane.f32.xlu0 %v1147_v9  ;;  %4414 = vpow2.f32 %v1127_v25  ;;  %v1150_v24 = vadd.f32 %v6174_v10, %v6166_v38  ;;  %v6192_v8 = vpop.eup %4392  ;;  %v1129_v17 = vmul.f32 1.442695, %v1007_v51  ;;  %v1864_v7 = vsub.f32 %v8562_v15, %v6152_v50  ;;  %v8563_v9 = vld [vmem:[#allocation121_spill] sm:$0xff]  ;;  %v8567_v1 = vld [vmem:[#allocation90_spill] sm:$0xff]  ;;  %v8569_v15 = vld [vmem:[#allocation91_spill] sm:$0xff] }
 0x34e   : > { %v1992_v36 = vmul.f32 1.442695, %v1868_v59  ;;  %v1994_v56 = vmul.f32 1.442695, %v1869_v54  ;;  %2016 = vadd.xlane.f32.xlu1 %v2015_v32  ;;  %4416 = vpow2.f32 %v1137_v53  ;;  %v1131_v59 = vmul.f32 1.442695, %v1008_v34  ;;  %v6200_v26 = vpop.eup %4394 }
 0x34f   : > { %4418 = vpow2.f32 %v1139_v3  ;;  %v8564_v54 = vld [vmem:[#allocation115_spill] sm:$0xff]  ;;  %v8565_v32 = vld [vmem:[#allocation122_spill] sm:$0xff]  ;;  %8566 = vst [vmem:[#allocation57_spill] sm:$0xff] %v6200_v26  ;;  %v1001_v38 = vsub.f32 %v8567_v1, %v6046_v41  ;;  %v6204_v53 = vpop.eup %4396  ;;  %v1141_v34 = vadd.f32 %v6184_v31, %v6179_v61 }
 0x350   : > { %v1807_v46 = vpop.xlane.xlu1 %1806  ;;  %v1865_v25 = vsub.f32 %v8564_v54, %v6152_v50  ;;  %4420 = vpow2.f32 %v1992_v36  ;;  %8568 = vst [vmem:[#allocation88_spill] sm:$0xff] %v6204_v53  ;;  %v6210_v50 = vpop.eup %4398  ;;  %v8572_v54 = vld [vmem:[#allocation118_spill] sm:$0xff] }
 0x351   : > { %v1870_v22 = vsub.f32 %v8563_v9, %v1807_v46  ;;  %v1871_v14 = vsub.f32 %v8565_v32, %v1807_v46  ;;  %2007 = vadd.xlane.f32.xlu0 %v2006_v60  ;;  %v1002_v9 = vsub.f32 %v8569_v15, %v6046_v41  ;;  %4422 = vpow2.f32 %v1994_v56  ;;  %8570 = vst [vmem:[#allocation86_spill] sm:$0xff] %v6210_v50  ;;  %v8571_v60 = vld [vmem:[#allocation117_spill] sm:$0xff]  ;;  %v6214_v36 = vpop.eup %4400 }
 0x352   : > { %1151 = vadd.xlane.f32.xlu1 %v1150_v24  ;;  %4424 = vpow2.f32 %v1129_v17  ;;  %v1984_v46 = vmul.f32 1.442695, %v1864_v7  ;;  %v1866_v1 = vsub.f32 %v8571_v60, %v6168_v57  ;;  %v1867_v41 = vsub.f32 %v8572_v54, %v6168_v57  ;;  %v6220_v24 = vpop.eup %4402  ;;  %v8574_v17 = vld [vmem:[#allocation93_spill] sm:$0xff] }
 0x353   : > { %v1996_v51 = vmul.f32 1.442695, %v1870_v22  ;;  %v1998_v3 = vmul.f32 1.442695, %v1871_v14  ;;  %4426 = vpow2.f32 %v1131_v59  ;;  %v1986_v22 = vmul.f32 1.442695, %v1865_v25 }
 0x354   : > { %v2009_v56 = vadd.f32 %v6192_v8, %v6186_v0  ;;  %8573 = vst [vmem:[#allocation38_spill] sm:$0xff] %v6220_v24  ;;  %v1117_v32 = vmul.f32 1.442695, %v1001_v38  ;;  %v1003_v7 = vsub.f32 %v8574_v17, %v6064_v20  ;;  %v1119_v15 = vmul.f32 1.442695, %v1002_v9  ;;  %v8576_v59 = vld [vmem:[#allocation96_spill] sm:$0xff] }
 0x355   : > { %1142 = vadd.xlane.f32.xlu0 %v1141_v34  ;;  %4428 = vpow2.f32 %v1996_v51  ;;  %v6224_v14 = vpop.eup %4404  ;;  %v1004_v25 = vsub.f32 %v8576_v59, %v6064_v20  ;;  %v2000_v57 = vadd.f32 %v6204_v53, %v6200_v26  ;;  %v8577_v60 = vld [vmem:[#allocation109_spill] sm:$0xff]  ;;  %v1988_v54 = vmul.f32 1.442695, %v1866_v1  ;;  %v8578_v51 = vld [vmem:[#allocation110_spill] sm:$0xff] }
 0x356   : > { %8575 = vst [vmem:[#allocation74_spill] sm:$0xff] %v6224_v14  ;;  %4430 = vpow2.f32 %v1998_v3  ;;  %2010 = vadd.xlane.f32.xlu1 %v2009_v56  ;;  %v6230_v34 = vpop.eup %4406  ;;  %v1860_v38 = vsub.f32 %v8577_v60, %v6110_v55  ;;  %v1861_v9 = vsub.f32 %v8578_v51, %v6110_v55  ;;  %v1990_v61 = vmul.f32 1.442695, %v1867_v41  ;;  %v8579_v56 = vld [vmem:[#allocation83_spill] sm:$0xff]  ;;  %v8581_v1 = vld [vmem:[#allocation85_spill] sm:$0xff] }
 0x357   : > { %4432 = vpow2.f32 %v1984_v46  ;;  %v6234_v17 = vpop.eup %4408  ;;  %v1144_v20 = vadd.f32 %v6214_v36, %v6210_v50  ;;  %v997_v59 = vsub.f32 %v8579_v56, %v6002_v44  ;;  %v1121_v60 = vmul.f32 1.442695, %v1003_v7  ;;  %v8582_v51 = vld [vmem:[#allocation111_spill] sm:$0xff]  ;;  %v8584_v56 = vld [vmem:[#allocation112_spill] sm:$0xff] }
 0x358   : > { %4434 = vpow2.f32 %v1986_v22  ;;  %v6240_v3 = vpop.eup %4410  ;;  %v998_v26 = vsub.f32 %v8581_v1, %v6002_v44  ;;  %v1123_v55 = vmul.f32 1.442695, %v1004_v25  ;;  %v1231_v22 = vadd.f32 %v6230_v34, %v6224_v14 }
 0x359   : > { %2001 = vadd.xlane.f32.xlu0 %v2000_v57  ;;  %4436 = vpow2.f32 %v1117_v32  ;;  %v6244_v46 = vpop.eup %4412  ;;  %v1976_v57 = vmul.f32 1.442695, %v1860_v38  ;;  %v1862_v53 = vsub.f32 %v8582_v51, %v6128_v29  ;;  %v1978_v7 = vmul.f32 1.442695, %v1861_v9  ;;  %v8585_v38 = vld [vmem:[#allocation87_spill] sm:$0xff]  ;;  %v8587_v9 = vld [vmem:[#allocation89_spill] sm:$0xff] }
 0x35a   : > { %8580 = vst [vmem:[#allocation53_spill] sm:$0xff] %v6244_v46  ;;  %4438 = vpow2.f32 %v1119_v15  ;;  %1145 = vadd.xlane.f32.xlu1 %v1144_v20  ;;  %v6250_v41 = vpop.eup %4414  ;;  %v1863_v50 = vsub.f32 %v8584_v56, %v6128_v29  ;;  %v2003_v44 = vadd.f32 %v6240_v3, %v6234_v17  ;;  %v1109_v25 = vmul.f32 1.442695, %v997_v59  ;;  %v8590_v56 = vld [vmem:[#allocation105_spill] sm:$0xff] }
 0x35b   : > { %4440 = vpow2.f32 %v1988_v54  ;;  %v6254_v32 = vpop.eup %4416  ;;  %v999_v20 = vsub.f32 %v8585_v38, %v6024_v52  ;;  %v1111_v54 = vmul.f32 1.442695, %v998_v26  ;;  %v1000_v51 = vsub.f32 %v8587_v9, %v6024_v52 }
 0x35c   : > { %8583 = vst [vmem:[#allocation113_spill] sm:$0xff] %v6254_v32  ;;  %4442 = vpow2.f32 %v1990_v61  ;;  %v6260_v15 = vpop.eup %4418  ;;  %v8589_v61 = vld [vmem:[#allocation104_spill] sm:$0xff]  ;;  %v1857_v59 = vsub.f32 %v8590_v56, %v6066_v19  ;;  %v1980_v14 = vmul.f32 1.442695, %v1862_v53  ;;  %v8593_v53 = vld [vmem:[#allocation79_spill] sm:$0xff] }
 0x35d   : > { %1232 = vadd.xlane.f32.xlu0 %v1231_v22  ;;  %4444 = vpow2.f32 %v1121_v60  ;;  %v6264_v1 = vpop.eup %4420  ;;  %v1856_v22 = vsub.f32 %v8589_v61, %v6066_v19  ;;  %v1982_v60 = vmul.f32 1.442695, %v1863_v50  ;;  %v1234_v52 = vadd.f32 %v6260_v15, %v6254_v32 }
 0x35e   : > { %8586 = vst [vmem:[#allocation116_spill] sm:$0xff] %v6264_v1  ;;  %4446 = vpow2.f32 %v1123_v55  ;;  %2004 = vadd.xlane.f32.xlu1 %v2003_v44  ;;  %v6268_v29 = vpop.eup %4422  ;;  %v8592_v44 = vld [vmem:[#allocation78_spill] sm:$0xff]  ;;  %v1113_v61 = vmul.f32 1.442695, %v999_v20  ;;  %v1115_v50 = vmul.f32 1.442695, %v1000_v51 }
 0x35f   : > { %8588 = vst [vmem:[#allocation103_spill] sm:$0xff] %v6268_v29  ;;  %4448 = vpow2.f32 %v1976_v57  ;;  %v6274_v38 = vpop.eup %4424  ;;  %v2090_v26 = vadd.f32 %v6268_v29, %v6264_v1  ;;  %v993_v9 = vsub.f32 %v8592_v44, %v5984_v45  ;;  %v994_v57 = vsub.f32 %v8593_v53, %v5984_v45  ;;  %v8594_v29 = vld [vmem:[#allocation107_spill] sm:$0xff] }
 0x360   : > { %8591 = vst [vmem:[#allocation119_spill] sm:$0xff] %v6274_v38  ;;  %4450 = vpow2.f32 %v1978_v7  ;;  %v6280_v55 = vpop.eup %4426  ;;  %v1968_v56 = vmul.f32 1.442695, %v1856_v22  ;;  %v1970_v1 = vmul.f32 1.442695, %v1857_v59  ;;  %v1858_v32 = vsub.f32 %v8594_v29, %v6088_v5  ;;  %v8598_v59 = vld [vmem:[#allocation80_spill] sm:$0xff] }
 0x361   : > { %4452 = vpow2.f32 %v1109_v25  ;;  %2091 = vadd.xlane.f32.xlu0 %v2090_v26  ;;  %v8596_v25 = vld [vmem:[#allocation108_spill] sm:$0xff]  ;;  %v1225_v45 = vadd.f32 %v6250_v41, %v6244_v46  ;;  %v1101_v22 = vmul.f32 1.442695, %v993_v9  ;;  %v995_v26 = vsub.f32 %v8598_v59, %v6004_v37  ;;  %v8602_v53 = vld [vmem:[#allocation99_spill] sm:$0xff] }
 0x362   : > { %v6284_v19 = vpop.eup %4428  ;;  %4454 = vpow2.f32 %v1111_v54  ;;  %1235 = vadd.xlane.f32.xlu1 %v1234_v52  ;;  %v1859_v20 = vsub.f32 %v8596_v25, %v6088_v5  ;;  %v1103_v29 = vmul.f32 1.442695, %v994_v57  ;;  %v8600_v52 = vld [vmem:[#allocation81_spill] sm:$0xff]  ;;  %v1852_v25 = vsub.f32 %v8602_v53, %v6026_v35  ;;  %v8603_v9 = vld [vmem:[#allocation100_spill] sm:$0xff] }
 0x363   : > { %v6288_v7 = vpop.eup %4430  ;;  %4456 = vpow2.f32 %v1980_v14  ;;  %v996_v5 = vsub.f32 %v8600_v52, %v6004_v37  ;;  %v1853_v46 = vsub.f32 %v8603_v9, %v6026_v35  ;;  %v1972_v59 = vmul.f32 1.442695, %v1858_v32 }
 0x364   : > { %v6292_v44 = vpop.eup %4432  ;;  %4458 = vpow2.f32 %v1982_v60  ;;  %v2093_v54 = vadd.f32 %v6288_v7, %v6284_v19  ;;  %v1974_v57 = vmul.f32 1.442695, %v1859_v20  ;;  %v1105_v53 = vmul.f32 1.442695, %v995_v26 }
 0x365   : > { %8595 = vst [vmem:[#allocation106_spill] sm:$0xff] %v6292_v44  ;;  %v6300_v51 = vpop.eup %4434  ;;  %4460 = vpow2.f32 %v1113_v61  ;;  %1226 = vadd.xlane.f32.xlu0 %v1225_v45  ;;  %v1107_v32 = vmul.f32 1.442695, %v996_v5  ;;  %v1960_v9 = vmul.f32 1.442695, %v1852_v25  ;;  %v8609_v25 = vld [vmem:[#allocation76_spill] sm:$0xff] }
 0x366   : > { %8597 = vst [vmem:[#allocation120_spill] sm:$0xff] %v6300_v51  ;;  %v6304_v14 = vpop.eup %4436  ;;  %4462 = vpow2.f32 %v1115_v50  ;;  %2094 = vadd.xlane.f32.xlu1 %v2093_v54  ;;  %v2084_v37 = vadd.f32 %v6300_v51, %v6292_v44  ;;  %v1228_v50 = vadd.f32 %v6280_v55, %v6274_v38  ;;  %v8605_v54 = vld [vmem:[#allocation75_spill] sm:$0xff]  ;;  %v8607_v44 = vld [vmem:[#allocation102_spill] sm:$0xff] }
 0x367   : > { %8599 = vst [vmem:[#allocation114_spill] sm:$0xff] %v6304_v14  ;;  %v6308_v60 = vpop.eup %4438  ;;  %4464 = vpow2.f32 %v1968_v56  ;;  %v990_v52 = vsub.f32 %v8605_v54, %v5964_v27  ;;  %v1855_v51 = vsub.f32 %v8607_v44, %v6048_v12  ;;  %v1962_v27 = vmul.f32 1.442695, %v1853_v46  ;;  %v8610_v44 = vld [vmem:[#allocation77_spill] sm:$0xff] }
 0x368   : > { %8601 = vst [vmem:[#allocation121_spill] sm:$0xff] %v6308_v60  ;;  %v6314_v61 = vpop.eup %4440  ;;  %4466 = vpow2.f32 %v1970_v1  ;;  %v8606_v1 = vld [vmem:[#allocation101_spill] sm:$0xff]  ;;  %v1219_v26 = vadd.f32 %v6308_v60, %v6304_v14  ;;  %v992_v46 = vsub.f32 %v8610_v44, %v5986_v6  ;;  %v1777_v60 = vpop.xlane.xlu1 %1776 }
 0x369   : > { %8604 = vst [vmem:[#allocation115_spill] sm:$0xff] %v6314_v61  ;;  %v6320_v45 = vpop.eup %4442  ;;  %4468 = vpow2.f32 %v1101_v22  ;;  %v1854_v56 = vsub.f32 %v8606_v1, %v6048_v12  ;;  %2085 = vadd.xlane.f32.xlu0 %v2084_v37  ;;  %v1774_v22 = vpop.xlane.xlu0 %1773  ;;  %v1095_v37 = vmul.f32 1.442695, %v990_v52  ;;  %v1966_v54 = vmul.f32 1.442695, %v1855_v51  ;;  %v8611_v1 = vld [vmem:[#allocation94_spill] sm:$0xff] }
 0x36a   : > { %v6324_v35 = vpop.eup %4444  ;;  %4470 = vpow2.f32 %v1103_v29  ;;  %1229 = vadd.xlane.f32.xlu1 %v1228_v50  ;;  %v2087_v29 = vadd.f32 %v6320_v45, %v6314_v61  ;;  %v991_v50 = vsub.f32 %v8609_v25, %v5986_v6  ;;  %v1848_v14 = vsub.f32 %v8611_v1, %v1774_v22  ;;  %v8612_v25 = vld [vmem:[#allocation95_spill] sm:$0xff] }
 0x36b   : > { %v6328_v20 = vpop.eup %4446  ;;  %4472 = vpow2.f32 %v1972_v59  ;;  %v1964_v59 = vmul.f32 1.442695, %v1854_v56  ;;  %v1099_v51 = vmul.f32 1.442695, %v992_v46 }
 0x36c   : > { %v6332_v38 = vpop.eup %4448  ;;  %4474 = vpow2.f32 %v1974_v57  ;;  %v1222_v6 = vadd.f32 %v6328_v20, %v6324_v35  ;;  %v1097_v56 = vmul.f32 1.442695, %v991_v50 }
 0x36d   : > { %8608 = vst [vmem:[#allocation122_spill] sm:$0xff] %v6332_v38  ;;  %v6338_v5 = vpop.eup %4450  ;;  %4476 = vpow2.f32 %v1105_v53  ;;  %1220 = vadd.xlane.f32.xlu0 %v1219_v26  ;;  %v1849_v53 = vsub.f32 %v8612_v25, %v1774_v22  ;;  %v1952_v22 = vmul.f32 1.442695, %v1848_v14  ;;  %v8613_v26 = vld [vmem:[#allocation97_spill] sm:$0xff]  ;;  %v8615_v25 = vld [vmem:[#allocation98_spill] sm:$0xff] }
 0x36e   : > { %v6342_v12 = vpop.eup %4452  ;;  %4478 = vpow2.f32 %v1107_v32  ;;  %2088 = vadd.xlane.f32.xlu1 %v2087_v29  ;;  %v2078_v61 = vadd.f32 %v6338_v5, %v6332_v38  ;;  %v1850_v29 = vsub.f32 %v8613_v26, %v1777_v60  ;;  %v1851_v38 = vsub.f32 %v8615_v25, %v1777_v60 }
 0x36f   : > { %v6346_v57 = vpop.eup %4454  ;;  %4480 = vpow2.f32 %v1960_v9  ;;  %v1954_v1 = vmul.f32 1.442695, %v1849_v53 }
 0x370   : > { %v6349_v52 = vpop.eup %4456  ;;  %4482 = vpow2.f32 %v1962_v27  ;;  %v1958_v60 = vmul.f32 1.442695, %v1851_v38 }
 0x371   : > { %v6356_v32 = vpop.eup %4458  ;;  %4484 = vpow2.f32 %v1095_v37  ;;  %2079 = vadd.xlane.f32.xlu0 %v2078_v61  ;;  %v1213_v37 = vadd.f32 %v6346_v57, %v6342_v12 }
 0x372   : > { %v6358_v9 = vpop.eup %4460  ;;  %4486 = vpow2.f32 %v1964_v59  ;;  %1223 = vadd.xlane.f32.xlu1 %v1222_v6  ;;  %v2081_v50 = vadd.f32 %v6356_v32, %v6349_v52  ;;  %v1956_v59 = vmul.f32 1.442695, %v1850_v29 }
 0x373   : > { %v6360_v27 = vpop.eup %4462  ;;  %4488 = vpow2.f32 %v1966_v54 }
 0x374   : > { %v6363_v44 = vpop.eup %4464  ;;  %4490 = vpow2.f32 %v1097_v56  ;;  %v1216_v6 = vadd.f32 %v6360_v27, %v6358_v9 }
 0x375   : > { %8614 = vst [vmem:[#allocation90_spill] sm:$0xff] %v6363_v44  ;;  %v6370_v46 = vpop.eup %4466  ;;  %4492 = vpow2.f32 %v1099_v51  ;;  %1214 = vadd.xlane.f32.xlu0 %v1213_v37 }
 0x376   : > { %v6372_v61 = vpop.eup %4468  ;;  %2082 = vadd.xlane.f32.xlu1 %v2081_v50  ;;  %4494 = vpow2.f32 %v1952_v22  ;;  %v2072_v53 = vadd.f32 %v6370_v46, %v6363_v44 }
 0x377   : > { %8616 = vst [vmem:[#allocation91_spill] sm:$0xff] %v6372_v61  ;;  %v6374_v14 = vpop.eup %4470  ;;  %4496 = vpow2.f32 %v1954_v1 }
 0x378   : > { %8617 = vst [vmem:[#allocation117_spill] sm:$0xff] %v6374_v14  ;;  %v6376_v54 = vpop.eup %4472  ;;  %4498 = vpow2.f32 %v1956_v59  ;;  %v1207_v38 = vadd.f32 %v6374_v14, %v6372_v61 }
 0x379   : > { %8618 = vst [vmem:[#allocation118_spill] sm:$0xff] %v6376_v54  ;;  %v6382_v56 = vpop.eup %4474  ;;  %2073 = vadd.xlane.f32.xlu0 %v2072_v53  ;;  %4500 = vpow2.f32 %v1958_v60 }
 0x37a   : > { %v6384_v26 = vpop.eup %4476  ;;  %1217 = vadd.xlane.f32.xlu1 %v1216_v6  ;;  %v2075_v29 = vadd.f32 %v6382_v56, %v6376_v54 }
 0x37b   : > { %8619 = vst [vmem:[#allocation93_spill] sm:$0xff] %v6384_v26  ;;  %v6386_v51 = vpop.eup %4478 }
 0x37c   : > { %8620 = vst [vmem:[#allocation96_spill] sm:$0xff] %v6386_v51  ;;  %v6388_v22 = vpop.eup %4480  ;;  %v1210_v60 = vadd.f32 %v6386_v51, %v6384_v26 }
 0x37d   : > { %8621 = vst [vmem:[#allocation109_spill] sm:$0xff] %v6388_v22  ;;  %v6394_v1 = vpop.eup %4482  ;;  %1208 = vadd.xlane.f32.xlu0 %v1207_v38 }
 0x37e   : > { %8622 = vst [vmem:[#allocation110_spill] sm:$0xff] %v6394_v1  ;;  %v6396_v25 = vpop.eup %4484  ;;  %2076 = vadd.xlane.f32.xlu1 %v2075_v29  ;;  %v2066_v59 = vadd.f32 %v6394_v1, %v6388_v22 }
 0x37f   : > { %8623 = vst [vmem:[#allocation83_spill] sm:$0xff] %v6396_v25  ;;  %v6398_v37 = vpop.eup %4486  ;;  %v1201_v38 = vadd.f32 %v6396_v25, %v6220_v24 }
 0x380   : > { %8624 = vst [vmem:[#allocation85_spill] sm:$0xff] %v6398_v37  ;;  %v6400_v50 = vpop.eup %4488 }
 0x381   : > { %8625 = vst [vmem:[#allocation111_spill] sm:$0xff] %v6400_v50  ;;  %v6406_v53 = vpop.eup %4490  ;;  %2067 = vadd.xlane.f32.xlu0 %v2066_v59  ;;  %v2069_v29 = vadd.f32 %v6400_v50, %v6398_v37 }
 0x382   : > { %8626 = vst [vmem:[#allocation112_spill] sm:$0xff] %v6406_v53  ;;  %1211 = vadd.xlane.f32.xlu1 %v1210_v60  ;;  %v6408_v6 = vpop.eup %4492 }
 0x383   : > { %8627 = vst [vmem:[#allocation87_spill] sm:$0xff] %v6408_v6  ;;  %v6410_v61 = vpop.eup %4494  ;;  %v1204_v60 = vadd.f32 %v6408_v6, %v6406_v53 }
 0x384   : > { %8628 = vst [vmem:[#allocation89_spill] sm:$0xff] %v6410_v61  ;;  %v6416_v14 = vpop.eup %4496 }
 0x385   : > { %8629 = vst [vmem:[#allocation104_spill] sm:$0xff] %v6416_v14  ;;  %1202 = vadd.xlane.f32.xlu0 %v1201_v38  ;;  %v6418_v22 = vpop.eup %4498  ;;  %v2060_v59 = vadd.f32 %v6416_v14, %v6410_v61 }
 0x386   : > { %2070 = vadd.xlane.f32.xlu1 %v2069_v29  ;;  %8630 = vst [vmem:[#allocation105_spill] sm:$0xff] %v6418_v22  ;;  %v6424_v1 = vpop.eup %4500 }
 0x387   : > { %8631 = vst [vmem:[#allocation78_spill] sm:$0xff] %v6424_v1  ;;  %v2063_v24 = vadd.f32 %v6424_v1, %v6418_v22 }
 0x389   : > { %2061 = vadd.xlane.f32.xlu0 %v2060_v59 }
 0x38a   : > { %1205 = vadd.xlane.f32.xlu1 %v1204_v60 }
 0x38e   : > { %2064 = vadd.xlane.f32.xlu1 %v2063_v24  ;;  %v1173_v25 = vpop.xlane.xlu0 %1172 }
 0x392   : > { %v1176_v37 = vpop.xlane.xlu1 %1175 }
 0x396   : > { %v1179_v38 = vpop.xlane.xlu0 %1178 }
 0x39a   : > { %v1182_v29 = vpop.xlane.xlu1 %1181 }
 0x39b   : > { %4502 = vrcp.f32 %v1182_v29 }
 0x39c   : > { %v2032_v50 = vpop.xlane.xlu0 %2031 }
 0x3a0   : > { %v1185_v26 = vpop.xlane.xlu0 %1184  ;;  %v2035_v51 = vpop.xlane.xlu1 %2034 }
 0x3a1   : > { %4504 = vrcp.f32 %v1185_v26 }
 0x3a2   : > { %4506 = vrcp.f32 %v1179_v38 }
 0x3a4   : > { %v1188_v61 = vpop.xlane.xlu1 %1187  ;;  %v2038_v14 = vpop.xlane.xlu0 %2037 }
 0x3a5   : > { %4508 = vrcp.f32 %v1188_v61 }
 0x3a6   : > { %4510 = vrcp.f32 %v1176_v37 }
 0x3a7   : > { %4512 = vrcp.f32 %v1173_v25 }
 0x3a8   : > { %v2041_v59 = vpop.xlane.xlu1 %2040  ;;  %v4503_v22 = vpop.eup %4502 }
 0x3a9   : > { %4514 = vrcp.f32 %v2041_v59  ;;  %v1296_v37 = vmul.f32 %v4503_v22, %v5874_v21 }
 0x3aa   : > { %v2044_v60 = vpop.xlane.xlu0 %2043 }
 0x3ab   : > { %4516 = vrcp.f32 %v2044_v60 }
 0x3ac   : > { %4518 = vrcp.f32 %v2038_v14 }
 0x3ae   : > { %v909_v24 = vpop.xlane.xlu0 %908  ;;  %v4505_v6 = vpop.eup %4504 }
 0x3af   : > { %v985_v1 = vsub.f32 %v8492_v48, %v909_v24  ;;  %v986_v53 = vsub.f32 %v8491_v30, %v909_v24  ;;  %v2047_v29 = vpop.xlane.xlu1 %2046  ;;  %v4507_v38 = vpop.eup %4506  ;;  %v1298_v48 = vmul.f32 %v4505_v6, %v5890_v39 }
 0x3b0   : > { %4520 = vrcp.f32 %v2047_v29  ;;  %v1294_v39 = vmul.f32 %v4507_v38, %v5866_v11 }
 0x3b1   : > { %v1085_v26 = vmul.f32 1.442695, %v985_v1  ;;  %v1087_v54 = vmul.f32 1.442695, %v986_v53  ;;  %4522 = vrcp.f32 %v2032_v50  ;;  %v1297_v1 = vmul.f32 %v4505_v6, %v5885_v18  ;;  %v8633_v6 = vld [vmem:[#allocation126_spill] sm:$0xff] }
 0x3b2   : > { %v1768_v61 = vpop.xlane.xlu0 %1767  ;;  %v4509_v25 = vpop.eup %4508 }
 0x3b3   : > { %4524 = vpow2.f32 %v1085_v26  ;;  %v1844_v59 = vsub.f32 %v5674_v4, %v1768_v61  ;;  %v1845_v60 = vsub.f32 %v5678_v2, %v1768_v61  ;;  %v912_v30 = vpop.xlane.xlu1 %911  ;;  %v1300_v14 = vmul.f32 %v4509_v25, %v5910_v23  ;;  %v4511_v26 = vpop.eup %4510 }
 0x3b4   : > { %4526 = vpow2.f32 %v1087_v54  ;;  %v1299_v53 = vmul.f32 %v4509_v25, %v5906_v28  ;;  %v987_v21 = vsub.f32 %v8503_v42, %v912_v30  ;;  %v988_v29 = vsub.f32 %v8502_v16, %v912_v30  ;;  %v6440_v44 = vpop.eup %4512  ;;  %v8632_v16 = vld [vmem:[#allocation92_spill] sm:$0xff] }
 0x3b5   : > { %v1944_v50 = vmul.f32 1.442695, %v1844_v59  ;;  %v1946_v24 = vmul.f32 1.442695, %v1845_v60  ;;  %4528 = vrcp.f32 %v2035_v51  ;;  %v1350_v4 = vpack.c.bf16 %v1300_v14, %v1298_v48  ;;  %v8634_v60 = vld [vmem:[#allocation128_spill] sm:$0xff] }
 0x3b6   : > { %v1167_v2 = vpop.xlane.xlu0 %1166  ;;  %v1349_v61 = vpack.c.bf16 %v1299_v53, %v1297_v1  ;;  %v1089_v54 = vmul.f32 1.442695, %v987_v21  ;;  %v1091_v23 = vmul.f32 1.442695, %v988_v29  ;;  %v1348_v28 = vpack.c.bf16 %v1296_v37, %v1294_v39  ;;  %v6445_v59 = vpop.eup %4514  ;;  %v8635_v53 = vld [vmem:[#allocation124_spill] sm:$0xff] }
 0x3b7   : > { %4530 = vpow2.f32 %v1944_v50  ;;  %1367 = vmatprep.subr.bf16.mxu1 %v1350_v4  ;;  %v1771_v18 = vpop.xlane.xlu1 %1770  ;;  %v1292_v25 = vmul.f32 %v4511_v26, %v8633_v6  ;;  %v1295_v48 = vmul.f32 %v4503_v22, %v8634_v60  ;;  %v1290_v37 = vmul.f32 %v6440_v44, %v8635_v53 }
 0x3b8   : > { %4532 = vpow2.f32 %v1946_v24  ;;  %1368 = vmatpush1.bf16.xpose.msra.mxu1 %v1349_v61  ;;  %v1846_v42 = vsub.f32 %v5686_v43, %v1771_v18  ;;  %v1847_v51 = vsub.f32 %v8632_v16, %v1771_v18  ;;  %v4517_v30 = vpop.eup %4516  ;;  %v8636_v43 = vld [vmem:[#allocation127_spill] sm:$0xff] }
 0x3b9   : > { %4534 = vpow2.f32 %v1089_v54  ;;  %1369 = vmatprep.subr.bf16.mxu1 %v1348_v28  ;;  %v1293_v24 = vmul.f32 %v4507_v38, %v8636_v43  ;;  %v6451_v21 = vpop.eup %4518  ;;  %v1346_v29 = vpack.c.bf16 %v1292_v25, %v1290_v37  ;;  %v8637_v54 = vld [vmem:[#allocation68_spill] sm:$0xff]  ;;  %v8640_v25 = vld [vmem:[#allocation66_spill] sm:$0xff] }
 0x3ba   : > { %4536 = vpow2.f32 %v1091_v23  ;;  %v2026_v11 = vpop.xlane.xlu0 %2025  ;;  %v1948_v14 = vmul.f32 1.442695, %v1846_v42  ;;  %v1950_v1 = vmul.f32 1.442695, %v1847_v51  ;;  %v2157_v22 = vmul.f32 %v4517_v30, %v8637_v54  ;;  %v8638_v23 = vld [vmem:[#allocation52_spill] sm:$0xff]  ;;  %v8639_v42 = vld [vmem:[#allocation71_spill] sm:$0xff] }
 0x3bb   : > { %4538 = vrcp.f32 %v1167_v2  ;;  %v1170_v50 = vpop.xlane.xlu1 %1169  ;;  %v1347_v39 = vpack.c.bf16 %v1295_v48, %v1293_v24  ;;  %v2155_v18 = vmul.f32 %v6445_v59, %v8638_v23  ;;  %v2156_v60 = vmul.f32 %v4517_v30, %v8640_v25  ;;  %v8641_v48 = vld [vmem:[#allocation47_spill] sm:$0xff] }
 0x3bc   : > { %4540 = vpow2.f32 %v1948_v14 }
 0x3bd   : > { %v4521_v4 = vpop.eup %4520  ;;  %4542 = vpow2.f32 %v1950_v1  ;;  %v8642_v1 = vld [vmem:[#allocation134_spill] sm:$0xff] }
 0x3be   : > { %v903_v61 = vpop.xlane.xlu0 %902  ;;  %v6456_v28 = vpop.eup %4522  ;;  %4544 = vrcp.f32 %v1170_v50  ;;  %v2159_v16 = vmul.f32 %v4521_v4, %v8639_v42  ;;  %v2158_v14 = vmul.f32 %v4521_v4, %v8641_v48  ;;  %v2153_v53 = vmul.f32 %v6451_v21, %v8642_v1  ;;  %v8644_v4 = vld [vmem:[#allocation82_spill] sm:$0xff]  ;;  %v8645_v42 = vld [vmem:[#allocation84_spill] sm:$0xff]  ;;  %v8647_v48 = vld [vmem:[#allocation69_spill] sm:$0xff] }
 0x3bf   : > { %v981_v2 = vsub.f32 %v8520_v40, %v903_v61  ;;  %v982_v38 = vsub.f32 %v8519_v49, %v903_v61  ;;  %4546 = vrcp.f32 %v2026_v11  ;;  %v2029_v6 = vpop.xlane.xlu1 %2028  ;;  %v8643_v61 = vld [vmem:[#allocation125_spill] sm:$0xff] }
 0x3c0   : > { %v6461_v51 = vpop.eup %4524  ;;  %1370 = vmatpush1.bf16.xpose.msra.mxu1 %v1347_v39  ;;  %4548 = vrcp.f32 %v2029_v6  ;;  %v2209_v49 = vpack.c.bf16 %v2159_v16, %v2157_v22  ;;  %v2208_v24 = vpack.c.bf16 %v2158_v14, %v2156_v60  ;;  %v1291_v30 = vmul.f32 %v4511_v26, %v8643_v61  ;;  %v8646_v22 = vld [vmem:[#allocation123_spill] sm:$0xff] }
 0x3c1   : > { %v6467_v37 = vpop.eup %4526  ;;  %v1077_v50 = vmul.f32 1.442695, %v981_v2  ;;  %v1079_v43 = vmul.f32 1.442695, %v982_v38  ;;  %1371 = vmatprep.subr.bf16.mxu1 %v1346_v29  ;;  %v2207_v38 = vpack.c.bf16 %v2155_v18, %v2153_v53  ;;  %v1289_v16 = vmul.f32 %v6440_v44, %v8646_v22 }
 0x3c2   : > { %v1762_v40 = vpop.xlane.xlu0 %1761  ;;  %v1195_v11 = vadd.f32 %v6467_v37, %v6461_v51  ;;  %v6472_v54 = vpop.eup %4528  ;;  %2226 = vmatprep.subr.bf16.mxu0 %v2209_v49 }
 0x3c3   : > { %4550 = vpow2.f32 %v1077_v50  ;;  %v1840_v23 = vsub.f32 %v8644_v4, %v1762_v40  ;;  %v1841_v2 = vsub.f32 %v8645_v42, %v1762_v40  ;;  %2227 = vmatpush1.bf16.xpose.msra.mxu0 %v2208_v24  ;;  %v906_v29 = vpop.xlane.xlu1 %905  ;;  %v1345_v53 = vpack.c.bf16 %v1291_v30, %v1289_v16  ;;  %v8650_v4 = vld [vmem:[#allocation133_spill] sm:$0xff] }
 0x3c4   : > { %v6476_v39 = vpop.eup %4530  ;;  %4552 = vpow2.f32 %v1079_v43  ;;  %1196 = vadd.xlane.f32.xlu0 %v1195_v11  ;;  %v983_v60 = vsub.f32 %v8531_v63, %v906_v29  ;;  %v984_v14 = vsub.f32 %v8647_v48, %v906_v29  ;;  %2228 = vmatprep.subr.bf16.mxu0 %v2207_v38  ;;  %v8648_v43 = vld [vmem:[#allocation51_spill] sm:$0xff]  ;;  %v8649_v11 = vld [vmem:[#allocation132_spill] sm:$0xff]  ;;  %v8651_v38 = vld [vmem:[#allocation130_spill] sm:$0xff] }
 0x3c5   : > { %v6480_v6 = vpop.eup %4532  ;;  %v1936_v26 = vmul.f32 1.442695, %v1840_v23  ;;  %v1938_v25 = vmul.f32 1.442695, %v1841_v2  ;;  %v2154_v49 = vmul.f32 %v6445_v59, %v8648_v43  ;;  %v2151_v63 = vmul.f32 %v6472_v54, %v8649_v11 }
 0x3c6   : > { %v6484_v1 = vpop.eup %4534  ;;  %v1161_v18 = vpop.xlane.xlu0 %1160  ;;  %v2054_v50 = vadd.f32 %v6480_v6, %v6476_v39  ;;  %v1081_v40 = vmul.f32 1.442695, %v983_v60  ;;  %v1083_v24 = vmul.f32 1.442695, %v984_v14  ;;  %v2152_v23 = vmul.f32 %v6451_v21, %v8650_v4  ;;  %v8656_v4 = vld [vmem:[#allocation131_spill] sm:$0xff] }
 0x3c7   : > { %v6490_v44 = vpop.eup %4536  ;;  %4554 = vpow2.f32 %v1936_v26  ;;  %v1765_v61 = vpop.xlane.xlu1 %1764  ;;  %v2149_v29 = vmul.f32 %v6456_v28, %v8651_v38  ;;  %v8657_v38 = vld [vmem:[#allocation73_spill] sm:$0xff] }
 0x3c8   : > { %4556 = vpow2.f32 %v1938_v25  ;;  %2055 = vadd.xlane.f32.xlu0 %v2054_v50  ;;  %v1198_v30 = vadd.f32 %v6490_v44, %v6484_v1  ;;  %v4539_v42 = vpop.eup %4538  ;;  %1372 = vmatpush1.bf16.xpose.msra.mxu1 %v1345_v53  ;;  %v1842_v59 = vsub.f32 %v8540_v58, %v1765_v61  ;;  %v1843_v2 = vsub.f32 %v8539_v33, %v1765_v61  ;;  %v8652_v53 = vld [vmem:[#allocation48_spill] sm:$0xff] }
 0x3c9   : > { %4558 = vpow2.f32 %v1081_v40  ;;  %v6502_v22 = vpop.eup %4540  ;;  %v2206_v26 = vpack.c.bf16 %v2154_v49, %v2152_v23  ;;  %v2205_v48 = vpack.c.bf16 %v2151_v63, %v2149_v29  ;;  %v1286_v50 = vmul.f32 %v4539_v42, %v8652_v53  ;;  %v8653_v40 = vld [vmem:[#allocation61_spill] sm:$0xff] }
 0x3ca   : > { %4560 = vpow2.f32 %v1083_v24  ;;  %1199 = vadd.xlane.f32.xlu1 %v1198_v30  ;;  %v2020_v16 = vpop.xlane.xlu0 %2019  ;;  %v6504_v25 = vpop.eup %4542  ;;  %v1940_v21 = vmul.f32 1.442695, %v1842_v59  ;;  %v1942_v60 = vmul.f32 1.442695, %v1843_v2  ;;  %v8654_v24 = vld [vmem:[#allocation70_spill] sm:$0xff]  ;;  %v2150_v23 = vmul.f32 %v6472_v54, %v8656_v4 }
 0x3cb   : > { %4562 = vrcp.f32 %v1161_v18  ;;  %v4545_v14 = vpop.eup %4544  ;;  %2229 = vmatpush1.bf16.xpose.msra.mxu0 %v2206_v26  ;;  %v1164_v58 = vpop.xlane.xlu1 %1163  ;;  %v2057_v33 = vadd.f32 %v6504_v25, %v6502_v22  ;;  %v1285_v11 = vmul.f32 %v4539_v42, %v8654_v24  ;;  %v8655_v18 = vld [vmem:[#allocation60_spill] sm:$0xff] }
 0x3cc   : > { %4564 = vrcp.f32 %v2020_v16  ;;  %v4547_v43 = vpop.eup %4546  ;;  %2230 = vmatprep.subr.bf16.mxu0 %v2205_v48  ;;  %v1288_v49 = vmul.f32 %v4545_v14, %v8653_v40  ;;  %v1287_v61 = vmul.f32 %v4545_v14, %v8655_v18  ;;  %v8661_v18 = vld [vmem:[#allocation49_spill] sm:$0xff] }
 0x3cd   : > { %4566 = vpow2.f32 %v1940_v21  ;;  %v4549_v30 = vpop.eup %4548  ;;  %v8658_v21 = vld [vmem:[#allocation129_spill] sm:$0xff] }
 0x3ce   : > { %4568 = vpow2.f32 %v1942_v60  ;;  %2058 = vadd.xlane.f32.xlu1 %v2057_v33  ;;  %v1155_v63 = vpop.xlane.xlu0 %1154  ;;  %v1344_v59 = vpack.c.bf16 %v1288_v49, %v1286_v50  ;;  %v1343_v2 = vpack.c.bf16 %v1287_v61, %v1285_v11  ;;  %v2147_v29 = vmul.f32 %v4549_v30, %v8657_v38  ;;  %v8659_v60 = vld [vmem:[#allocation44_spill] sm:$0xff] }
 0x3cf   : > { %4570 = vrcp.f32 %v1164_v58  ;;  %v2023_v26 = vpop.xlane.xlu1 %2022  ;;  %v2148_v42 = vmul.f32 %v6456_v28, %v8658_v21  ;;  %v2145_v14 = vmul.f32 %v4547_v43, %v8659_v60  ;;  %v2146_v61 = vmul.f32 %v4549_v30, %v8661_v18 }
 0x3d0   : > { %v6515_v16 = vpop.eup %4550  ;;  %1373 = vmatprep.subr.bf16.mxu1 %v1344_v59  ;;  %4572 = vrcp.f32 %v2023_v26 }
 0x3d1   : > { %v6519_v48 = vpop.eup %4552  ;;  %1374 = vmatpush1.bf16.xpose.msra.mxu1 %v1343_v2  ;;  %v2204_v54 = vpack.c.bf16 %v2150_v23, %v2148_v42  ;;  %4574 = vrcp.f32 %v1155_v63  ;;  %v2203_v53 = vpack.c.bf16 %v2147_v29, %v2145_v14  ;;  %v8662_v2 = vld [vmem:[#allocation43_spill] sm:$0xff] }
 0x3d2   : > { %v2014_v33 = vpop.xlane.xlu0 %2013  ;;  %v1189_v58 = vadd.f32 %v6519_v48, %v6515_v16  ;;  %v2144_v38 = vmul.f32 %v4547_v43, %v8662_v2 }
 0x3d3   : > { %2231 = vmatpush1.bf16.xpose.msra.mxu0 %v2204_v54  ;;  %v1158_v40 = vpop.xlane.xlu1 %1157  ;;  %v8665_v54 = vld [vmem:[#allocation50_spill] sm:$0xff] }
 0x3d4   : > { %v6524_v50 = vpop.eup %4554  ;;  %1190 = vadd.xlane.f32.xlu0 %v1189_v58  ;;  %4576 = vrcp.f32 %v1158_v40  ;;  %2232 = vmatprep.subr.bf16.mxu0 %v2203_v53  ;;  %v2202_v42 = vpack.c.bf16 %v2146_v61, %v2144_v38  ;;  %v8666_v53 = vld [vmem:[#allocation72_spill] sm:$0xff] }
 0x3d5   : > { %8660 = vst [vmem:[#allocation79_spill] sm:$0xff] %v6524_v50  ;;  %v6526_v28 = vpop.eup %4556  ;;  %4578 = vrcp.f32 %v2014_v33 }
 0x3d6   : > { %v6528_v49 = vpop.eup %4558  ;;  %v1149_v24 = vpop.xlane.xlu0 %1148  ;;  %v2048_v11 = vadd.f32 %v6526_v28, %v6524_v50 }
 0x3d7   : > { %v6533_v4 = vpop.eup %4560  ;;  %v2017_v23 = vpop.xlane.xlu1 %2016 }
 0x3d8   : > { %v4563_v63 = vpop.eup %4562  ;;  %2049 = vadd.xlane.f32.xlu0 %v2048_v11  ;;  %v1192_v59 = vadd.f32 %v6533_v4, %v6528_v49  ;;  %4580 = vrcp.f32 %v2017_v23  ;;  %v8667_v11 = vld [vmem:[#allocation58_spill] sm:$0xff] }
 0x3d9   : > { %v4565_v29 = vpop.eup %4564  ;;  %4582 = vrcp.f32 %v1149_v24  ;;  %v1282_v58 = vmul.f32 %v4563_v63, %v8665_v54  ;;  %v1281_v40 = vmul.f32 %v4563_v63, %v8666_v53  ;;  %v8669_v54 = vld [vmem:[#allocation62_spill] sm:$0xff] }
 0x3da   : > { %v6538_v26 = vpop.eup %4566  ;;  %1193 = vadd.xlane.f32.xlu1 %v1192_v59  ;;  %v2008_v21 = vpop.xlane.xlu0 %2007  ;;  %v8668_v59 = vld [vmem:[#allocation63_spill] sm:$0xff] }
 0x3db   : > { %8663 = vst [vmem:[#allocation107_spill] sm:$0xff] %v6538_v26  ;;  %v6540_v60 = vpop.eup %4568  ;;  %2233 = vmatpush1.bf16.xpose.msra.mxu0 %v2202_v42  ;;  %v1152_v14 = vpop.xlane.xlu1 %1151  ;;  %v2141_v24 = vmul.f32 %v4565_v29, %v8668_v59 }
 0x3dc   : > { %8664 = vst [vmem:[#allocation108_spill] sm:$0xff] %v6540_v60  ;;  %v4571_v30 = vpop.eup %4570  ;;  %v2051_v33 = vadd.f32 %v6540_v60, %v6538_v26  ;;  %4584 = vrcp.f32 %v1152_v14  ;;  %v2140_v14 = vmul.f32 %v4565_v29, %v8669_v54  ;;  %v8670_v60 = vld [vmem:[#allocation39_spill] sm:$0xff]  ;;  %v8676_v54 = vld [vmem:[#allocation40_spill] sm:$0xff] }
 0x3dd   : > { %v1284_v43 = vmul.f32 %v4571_v30, %v6100_v13  ;;  %v1283_v18 = vmul.f32 %v4571_v30, %v8667_v11  ;;  %v4573_v23 = vpop.eup %4572  ;;  %4586 = vrcp.f32 %v2008_v21  ;;  %v8671_v21 = vld [vmem:[#allocation46_spill] sm:$0xff] }
 0x3de   : > { %2052 = vadd.xlane.f32.xlu1 %v2051_v33  ;;  %v1143_v61 = vpop.xlane.xlu0 %1142  ;;  %v2143_v42 = vmul.f32 %v4573_v23, %v6124_v62  ;;  %v4575_v26 = vpop.eup %4574  ;;  %v2142_v13 = vmul.f32 %v4573_v23, %v8670_v60  ;;  %v8672_v62 = vld [vmem:[#allocation59_spill] sm:$0xff] }
 0x3df   : > { %v1342_v2 = vpack.c.bf16 %v1284_v43, %v1282_v58  ;;  %v1341_v38 = vpack.c.bf16 %v1283_v18, %v1281_v40  ;;  %v2011_v50 = vpop.xlane.xlu1 %2010  ;;  %v1278_v58 = vmul.f32 %v4575_v26, %v8671_v21  ;;  %v8673_v18 = vld [vmem:[#allocation45_spill] sm:$0xff] }
 0x3e0   : > { %4588 = vrcp.f32 %v2011_v50  ;;  %v2201_v63 = vpack.c.bf16 %v2143_v42, %v2141_v24  ;;  %v2200_v53 = vpack.c.bf16 %v2142_v13, %v2140_v14  ;;  %v1277_v60 = vmul.f32 %v4575_v26, %v8673_v18  ;;  %v8677_v14 = vld [vmem:[#allocation55_spill] sm:$0xff] }
 0x3e1   : > { %1375 = vmatprep.subr.bf16.mxu1 %v1342_v2  ;;  %v4577_v30 = vpop.eup %4576  ;;  %4590 = vrcp.f32 %v1143_v61  ;;  %v8674_v61 = vld [vmem:[#allocation65_spill] sm:$0xff] }
 0x3e2   : > { %1376 = vmatpush1.bf16.xpose.msra.mxu1 %v1341_v38  ;;  %v2002_v33 = vpop.xlane.xlu0 %2001  ;;  %2234 = vmatprep.subr.bf16.mxu0 %v2201_v63  ;;  %v1280_v43 = vmul.f32 %v4577_v30, %v6114_v47  ;;  %v1279_v40 = vmul.f32 %v4577_v30, %v8672_v62  ;;  %v4579_v11 = vpop.eup %4578  ;;  %v8675_v38 = vld [vmem:[#allocation41_spill] sm:$0xff] }
 0x3e3   : > { %2235 = vmatpush1.bf16.xpose.msra.mxu0 %v2200_v53  ;;  %v1146_v29 = vpop.xlane.xlu1 %1145  ;;  %v2137_v2 = vmul.f32 %v4579_v11, %v8674_v61  ;;  %v2136_v47 = vmul.f32 %v4579_v11, %v8676_v54  ;;  %v8679_v62 = vld [vmem:[#allocation37_spill] sm:$0xff]  ;;  %v8682_v54 = vld [vmem:[#allocation42_spill] sm:$0xff] }
 0x3e4   : > { %4592 = vrcp.f32 %v1146_v29  ;;  %v1340_v50 = vpack.c.bf16 %v1280_v43, %v1278_v58  ;;  %v1339_v24 = vpack.c.bf16 %v1279_v40, %v1277_v60  ;;  %v8680_v60 = vld [vmem:[#allocation64_spill] sm:$0xff] }
 0x3e5   : > { %v4581_v23 = vpop.eup %4580  ;;  %4594 = vrcp.f32 %v2002_v33  ;;  %v8678_v33 = vld [vmem:[#allocation54_spill] sm:$0xff] }
 0x3e6   : > { %v1233_v59 = vpop.xlane.xlu0 %1232  ;;  %1377 = vmatprep.subr.bf16.mxu1 %v1340_v50  ;;  %v2139_v42 = vmul.f32 %v4581_v23, %v8675_v38  ;;  %v2138_v13 = vmul.f32 %v4581_v23, %v8677_v14  ;;  %v4583_v63 = vpop.eup %4582 }
 0x3e7   : > { %v2005_v30 = vpop.xlane.xlu1 %2004  ;;  %v1274_v58 = vmul.f32 %v4583_v63, %v8678_v33  ;;  %v1273_v50 = vmul.f32 %v4583_v63, %v8680_v60  ;;  %v8685_v60 = vld [vmem:[#allocation88_spill] sm:$0xff] }
 0x3e8   : > { %4596 = vrcp.f32 %v2005_v30  ;;  %v2199_v53 = vpack.c.bf16 %v2139_v42, %v2137_v2  ;;  %v2198_v26 = vpack.c.bf16 %v2138_v13, %v2136_v47 }
 0x3e9   : > { %v4585_v21 = vpop.eup %4584  ;;  %4598 = vrcp.f32 %v1233_v59 }
 0x3ea   : > { %1378 = vmatpush1.bf16.xpose.msra.mxu1 %v1339_v24  ;;  %2236 = vmatprep.subr.bf16.mxu0 %v2199_v53  ;;  %v1276_v43 = vmul.f32 %v4585_v21, %v6174_v10  ;;  %v1275_v40 = vmul.f32 %v4585_v21, %v8679_v62  ;;  %v4587_v29 = vpop.eup %4586  ;;  %v2092_v18 = vpop.xlane.xlu0 %2091  ;;  %v8681_v24 = vld [vmem:[#allocation67_spill] sm:$0xff]  ;;  %v8684_v62 = vld [vmem:[#allocation56_spill] sm:$0xff] }
 0x3eb   : > { %2237 = vmatpush1.bf16.xpose.msra.mxu0 %v2198_v26  ;;  %v1236_v11 = vpop.xlane.xlu1 %1235  ;;  %v2133_v38 = vmul.f32 %v4587_v29, %v8681_v24  ;;  %v2132_v10 = vmul.f32 %v4587_v29, %v8682_v54 }
 0x3ec   : > { %v1338_v23 = vpack.c.bf16 %v1276_v43, %v1274_v58  ;;  %4600 = vrcp.f32 %v1236_v11  ;;  %v1337_v2 = vpack.c.bf16 %v1275_v40, %v1273_v50 }
 0x3ed   : > { %v4589_v61 = vpop.eup %4588  ;;  %4602 = vrcp.f32 %v2092_v18 }
 0x3ee   : > { %1379 = vmatprep.subr.bf16.mxu1 %v1338_v23  ;;  %v2135_v42 = vmul.f32 %v4589_v61, %v6192_v8  ;;  %v2134_v47 = vmul.f32 %v4589_v61, %v6186_v0  ;;  %v4591_v14 = vpop.eup %4590  ;;  %v1227_v59 = vpop.xlane.xlu0 %1226  ;;  %v8683_v8 = vld [vmem:[#allocation86_spill] sm:$0xff]  ;;  %v8686_v23 = vld [vmem:[#allocation57_spill] sm:$0xff] }
 0x3ef   : > { %v2095_v13 = vpop.xlane.xlu1 %2094  ;;  %v1270_v21 = vmul.f32 %v4591_v14, %v6184_v31  ;;  %v1269_v40 = vmul.f32 %v4591_v14, %v8684_v62 }
 0x3f0   : > { %v2197_v30 = vpack.c.bf16 %v2135_v42, %v2133_v38  ;;  %v2196_v53 = vpack.c.bf16 %v2134_v47, %v2132_v10  ;;  %4604 = vrcp.f32 %v2095_v13  ;;  %v8687_v13 = vld [vmem:[#allocation74_spill] sm:$0xff] }
 0x3f1   : > { %v4593_v63 = vpop.eup %4592  ;;  %4606 = vrcp.f32 %v1227_v59 }
 0x3f2   : > { %1380 = vmatpush1.bf16.xpose.msra.mxu1 %v1337_v2  ;;  %v4595_v26 = vpop.eup %4594  ;;  %2238 = vmatprep.subr.bf16.mxu0 %v2197_v30  ;;  %v1272_v33 = vmul.f32 %v4593_v63, %v6214_v36  ;;  %v1271_v58 = vmul.f32 %v4593_v63, %v8683_v8  ;;  %v2086_v43 = vpop.xlane.xlu0 %2085 }
 0x3f3   : > { %2239 = vmatpush1.bf16.xpose.msra.mxu0 %v2196_v53  ;;  %v1230_v0 = vpop.xlane.xlu1 %1229  ;;  %v2129_v50 = vmul.f32 %v4595_v26, %v8685_v60  ;;  %v2128_v36 = vmul.f32 %v4595_v26, %v8686_v23 }
 0x3f4   : > { %v1336_v29 = vpack.c.bf16 %v1272_v33, %v1270_v21  ;;  %4608 = vrcp.f32 %v1230_v0  ;;  %v1335_v11 = vpack.c.bf16 %v1271_v58, %v1269_v40 }
 0x3f5   : > { %v4597_v18 = vpop.eup %4596  ;;  %4610 = vrcp.f32 %v2086_v43  ;;  %v8689_v43 = vld [vmem:[#allocation103_spill] sm:$0xff] }
 0x3f6   : > { %1381 = vmatprep.subr.bf16.mxu1 %v1336_v29  ;;  %v2131_v31 = vmul.f32 %v4597_v18, %v6240_v3  ;;  %v2130_v61 = vmul.f32 %v4597_v18, %v6234_v17  ;;  %v1221_v2 = vpop.xlane.xlu0 %1220  ;;  %v4599_v38 = vpop.eup %4598  ;;  %v8688_v17 = vld [vmem:[#allocation113_spill] sm:$0xff] }
 0x3f7   : > { %v2089_v24 = vpop.xlane.xlu1 %2088  ;;  %v1330_v59 = vmul.f32 %v4599_v38, %v6230_v34  ;;  %v1329_v30 = vmul.f32 %v4599_v38, %v8687_v13  ;;  %v8690_v34 = vld [vmem:[#allocation116_spill] sm:$0xff] }
 0x3f8   : > { %v2195_v42 = vpack.c.bf16 %v2131_v31, %v2129_v50  ;;  %v2194_v54 = vpack.c.bf16 %v2130_v61, %v2128_v36  ;;  %4612 = vrcp.f32 %v2089_v24  ;;  %v8692_v24 = vld [vmem:[#allocation119_spill] sm:$0xff] }
 0x3f9   : > { %v4601_v10 = vpop.eup %4600  ;;  %4614 = vrcp.f32 %v1221_v2 }
 0x3fa   : > { %1382 = vmatpush1.bf16.xpose.msra.mxu1 %v1335_v11  ;;  %2240 = vmatprep.subr.bf16.mxu0 %v2195_v42  ;;  %v2080_v47 = vpop.xlane.xlu0 %2079  ;;  %v1332_v3 = vmul.f32 %v4601_v10, %v6260_v15  ;;  %v1331_v53 = vmul.f32 %v4601_v10, %v8688_v17  ;;  %v4603_v63 = vpop.eup %4602  ;;  %v8694_v42 = vld [vmem:[#allocation9_spill] sm:$0xff]  ;;  %v8697_v17 = vld [vmem:[#allocation106_spill] sm:$0xff] }
 0x3fb   : > { %2241 = vmatpush1.bf16.xpose.msra.mxu0 %v2194_v54  ;;  %v1224_v14 = vpop.xlane.xlu1 %1223  ;;  %v2189_v0 = vmul.f32 %v4603_v63, %v8689_v43  ;;  %v2188_v40 = vmul.f32 %v4603_v63, %v8690_v34  ;;  %v8698_v63 = vld [vmem:[#allocation115_spill] sm:$0xff]  ;;  %v8700_v43 = vld [vmem:[#allocation13_spill] sm:$0xff] }
 0x3fc   : > { %4616 = vrcp.f32 %v1224_v14  ;;  %v1366_v26 = vpack.c.bf16 %v1332_v3, %v1330_v59  ;;  %v1365_v21 = vpack.c.bf16 %v1331_v53, %v1329_v30  ;;  %v8696_v59 = vld [vmem:[#allocation120_spill] sm:$0xff] }
 0x3fd   : > { %v4605_v33 = vpop.eup %4604  ;;  %4618 = vrcp.f32 %v2080_v47 }
 0x3fe   : > { %1383 = vmatprep.subr.bf16.mxu1 %v1366_v26  ;;  %v1215_v8 = vpop.xlane.xlu0 %1214  ;;  %v2191_v62 = vmul.f32 %v4605_v33, %v6288_v7  ;;  %v2190_v15 = vmul.f32 %v4605_v33, %v6284_v19  ;;  %v4607_v29 = vpop.eup %4606  ;;  %v8691_v7 = vld [vmem:[#allocation53_spill] sm:$0xff]  ;;  %v8693_v19 = vld [vmem:[#allocation11_spill] sm:$0xff] }
 0x3ff   : > { %v2083_v58 = vpop.xlane.xlu1 %2082  ;;  %v1326_v36 = vmul.f32 %v4607_v29, %v6250_v41  ;;  %v1325_v2 = vmul.f32 %v4607_v29, %v8691_v7  ;;  %v8695_v54 = vpack.c.bf16 %v8693_v19, %v8694_v42 }
 0x400   : > { %4620 = vrcp.f32 %v2083_v58  ;;  %v2225_v18 = vpack.c.bf16 %v2191_v62, %v2189_v0  ;;  %v2224_v11 = vpack.c.bf16 %v2190_v15, %v2188_v40  ;;  %v8699_v58 = vld [vmem:[#allocation15_spill] sm:$0xff]  ;;  %v8702_v62 = vld [vmem:[#allocation121_spill] sm:$0xff] }
 0x401   : > { %v4609_v60 = vpop.eup %4608  ;;  %4622 = vrcp.f32 %v1215_v8  ;;  %v8701_v0 = vpack.c.bf16 %v8699_v58, %v8700_v43  ;;  %v8708_v58 = vld [vmem:[#allocation96_spill] sm:$0xff] }
 0x402   : > { %1384 = vmatpush2.bf16.xpose.msra.mxu1 %v1365_v21  ;;  %v4611_v50 = vpop.eup %4610  ;;  %2242 = vmatprep.subr.bf16.mxu0 %v2225_v18  ;;  %v2074_v31 = vpop.xlane.xlu0 %2073  ;;  %v1328_v61 = vmul.f32 %v4609_v60, %v6280_v55  ;;  %v1327_v38 = vmul.f32 %v4609_v60, %v8692_v24  ;;  %v8703_v18 = vld [vmem:[#allocation114_spill] sm:$0xff] }
 0x403   : > { %v1218_v23 = vpop.xlane.xlu1 %1217  ;;  %2243 = vmatpush2.bf16.xpose.msra.mxu0 %v2224_v11  ;;  %v2185_v3 = vmul.f32 %v4611_v50, %v8696_v59  ;;  %v2184_v53 = vmul.f32 %v4611_v50, %v8697_v17  ;;  %v8705_v17 = vld [vmem:[#allocation90_spill] sm:$0xff] }
 0x404   : > { %4624 = vrcp.f32 %v1218_v23  ;;  %v1364_v10 = vpack.c.bf16 %v1328_v61, %v1326_v36  ;;  %v1363_v47 = vpack.c.bf16 %v1327_v38, %v1325_v2  ;;  %v8704_v38 = vld [vmem:[#allocation122_spill] sm:$0xff] }
 0x405   : > { %2298 = vxpose.xlu0.c.b16.start.end [1/1] (short) %v8695_v54, 128  ;;  %v4613_v14 = vpop.eup %4612  ;;  %4626 = vrcp.f32 %v2074_v31 }
 0x406   : > { %v4615_v13 = vpop.eup %4614  ;;  %1385 = vmatprep.subr.bf16.mxu1 %v1364_v10  ;;  %v1209_v41 = vpop.xlane.xlu0 %1208  ;;  %v2187_v30 = vmul.f32 %v4613_v14, %v6320_v45  ;;  %v2186_v26 = vmul.f32 %v4613_v14, %v8698_v63 }
 0x407   : > { %v2077_v55 = vpop.xlane.xlu1 %2076  ;;  %v1322_v34 = vmul.f32 %v4615_v13, %v8702_v62  ;;  %v1321_v11 = vmul.f32 %v4615_v13, %v8703_v18  ;;  %v8712_v18 = vld [vmem:[#allocation12_spill] sm:$0xff] }
 0x408   : > { %4628 = vrcp.f32 %v2077_v55  ;;  %v2223_v21 = vpack.c.bf16 %v2187_v30, %v2185_v3  ;;  %v2222_v33 = vpack.c.bf16 %v2186_v26, %v2184_v53 }
 0x409   : > { %v4617_v8 = vpop.eup %4616  ;;  %4630 = vrcp.f32 %v1209_v41 }
 0x40a   : > { %1386 = vmatpush2.bf16.xpose.msra.mxu1 %v1363_v47  ;;  %v4619_v40 = vpop.eup %4618  ;;  %2244 = vmatprep.subr.bf16.mxu0 %v2223_v21  ;;  %v2068_v15 = vpop.xlane.xlu0 %2067  ;;  %v1324_v29 = vmul.f32 %v4617_v8, %v6328_v20  ;;  %v1323_v60 = vmul.f32 %v4617_v8, %v6324_v35 }
 0x40b   : > { %3157 = vxpose.xlu1.c.b16.start.end [1/1] (short) %v8701_v0, 128  ;;  %v1212_v45 = vpop.xlane.xlu1 %1211  ;;  %2245 = vmatpush2.bf16.xpose.msra.mxu0 %v2222_v33  ;;  %v2181_v36 = vmul.f32 %v4619_v40, %v6338_v5  ;;  %v2180_v20 = vmul.f32 %v4619_v40, %v8704_v38  ;;  %v8707_v33 = vld [vmem:[#allocation117_spill] sm:$0xff]  ;;  %v8709_v0 = vld [vmem:[#allocation91_spill] sm:$0xff] }
 0x40c   : > { %4632 = vrcp.f32 %v1212_v45  ;;  %v1362_v50 = vpack.c.bf16 %v1324_v29, %v1322_v34  ;;  %v1361_v31 = vpack.c.bf16 %v1323_v60, %v1321_v11  ;;  %v8711_v29 = vld [vmem:[#allocation10_spill] sm:$0xff] }
 0x40d   : > { %v4621_v23 = vpop.eup %4620  ;;  %4634 = vrcp.f32 %v2068_v15  ;;  %v2295_v11 = vpack.c.bf16 %v8712_v18, %v8711_v29  ;;  %v8713_v60 = vld [vmem:[#allocation110_spill] sm:$0xff] }
 0x40e   : > { %v4623_v61 = vpop.eup %4622  ;;  %1387 = vmatprep.subr.bf16.mxu1 %v1362_v50  ;;  %v1203_v7 = vpop.xlane.xlu0 %1202  ;;  %v2183_v24 = vmul.f32 %v4621_v23, %v6356_v32  ;;  %v2182_v19 = vmul.f32 %v4621_v23, %v6349_v52 }
 0x40f   : > { %v2071_v2 = vpop.xlane.xlu1 %2070  ;;  %v1318_v10 = vmul.f32 %v4623_v61, %v6346_v57  ;;  %v1317_v59 = vmul.f32 %v4623_v61, %v6342_v12 }
 0x410   : > { %4636 = vrcp.f32 %v2071_v2  ;;  %v2221_v35 = vpack.c.bf16 %v2183_v24, %v2181_v36  ;;  %v2220_v42 = vpack.c.bf16 %v2182_v19, %v2180_v20  ;;  %v8715_v36 = vld [vmem:[#allocation109_spill] sm:$0xff] }
 0x411   : > { %v4625_v54 = vpop.eup %4624  ;;  %4638 = vrcp.f32 %v1203_v7  ;;  %v8716_v7 = vld [vmem:[#allocation85_spill] sm:$0xff] }
 0x412   : > { %1388 = vmatpush2.bf16.xpose.msra.mxu1 %v1361_v31  ;;  %2246 = vmatprep.subr.bf16.mxu0 %v2221_v35  ;;  %v2062_v5 = vpop.xlane.xlu0 %2061  ;;  %v1320_v14 = vmul.f32 %v4625_v54, %v6360_v27  ;;  %v1319_v32 = vmul.f32 %v4625_v54, %v6358_v9  ;;  %v4627_v3 = vpop.eup %4626  ;;  %v8706_v27 = vld [vmem:[#allocation118_spill] sm:$0xff]  ;;  %v8714_v31 = vld [vmem:[#allocation111_spill] sm:$0xff] }
 0x413   : > { %v1206_v47 = vpop.xlane.xlu1 %1205  ;;  %2247 = vmatpush2.bf16.xpose.msra.mxu0 %v2220_v42  ;;  %v2177_v57 = vmul.f32 %v4627_v3, %v6370_v46  ;;  %v2176_v53 = vmul.f32 %v4627_v3, %v8705_v17  ;;  %v8710_v46 = vld [vmem:[#allocation93_spill] sm:$0xff]  ;;  %v8717_v42 = vld [vmem:[#allocation83_spill] sm:$0xff] }
 0x414   : > { %4640 = vrcp.f32 %v1206_v47  ;;  %v1360_v52 = vpack.c.bf16 %v1320_v14, %v1318_v10  ;;  %v1359_v13 = vpack.c.bf16 %v1319_v32, %v1317_v59  ;;  %v8718_v10 = vld [vmem:[#allocation87_spill] sm:$0xff]  ;;  %v8719_v47 = vld [vmem:[#allocation38_spill] sm:$0xff]  ;;  %v8720_v59 = vld [vmem:[#allocation112_spill] sm:$0xff] }
 0x415   : > { %v4629_v41 = vpop.eup %4628  ;;  %4642 = vrcp.f32 %v2062_v5 }
 0x416   : > { %1389 = vmatprep.subr.bf16.mxu1 %v1360_v52  ;;  %v2179_v30 = vmul.f32 %v4629_v41, %v6382_v56  ;;  %v2178_v63 = vmul.f32 %v4629_v41, %v8706_v27  ;;  %v4631_v12 = vpop.eup %4630  ;;  %v8721_v52 = vld [vmem:[#allocation14_spill] sm:$0xff] }
 0x417   : > { %v2065_v55 = vpop.xlane.xlu1 %2064  ;;  %v1314_v8 = vmul.f32 %v4631_v12, %v8707_v33  ;;  %v1313_v62 = vmul.f32 %v4631_v12, %v8709_v0 }
 0x418   : > { %4644 = vrcp.f32 %v2065_v55  ;;  %v2219_v9 = vpack.c.bf16 %v2179_v30, %v2177_v57  ;;  %v2218_v26 = vpack.c.bf16 %v2178_v63, %v2176_v53  ;;  %v8723_v30 = vld [vmem:[#allocation104_spill] sm:$0xff]  ;;  %v8724_v53 = vld [vmem:[#allocation78_spill] sm:$0xff]  ;;  %v8725_v63 = vld [vmem:[#allocation89_spill] sm:$0xff] }
 0x419   : > { %v4633_v21 = vpop.eup %4632 }
 0x41a   : > { %1390 = vmatpush2.bf16.xpose.msra.mxu1 %v1359_v13  ;;  %2248 = vmatprep.subr.bf16.mxu0 %v2219_v9  ;;  %v1316_v43 = vmul.f32 %v4633_v21, %v8708_v58  ;;  %v1315_v34 = vmul.f32 %v4633_v21, %v8710_v46  ;;  %v4635_v56 = vpop.eup %4634  ;;  %v8722_v13 = vld [vmem:[#allocation16_spill] sm:$0xff]  ;;  %v8726_v9 = vld [vmem:[#allocation105_spill] sm:$0xff] }
 0x41b   : > { %2249 = vmatpush2.bf16.xpose.msra.mxu0 %v2218_v26  ;;  %v2173_v50 = vmul.f32 %v4635_v56, %v8713_v60  ;;  %v2172_v61 = vmul.f32 %v4635_v56, %v8715_v36  ;;  %v3154_v41 = vpack.c.bf16 %v8722_v13, %v8721_v52  ;;  %v8730_v13 = vld [vmem:[#allocation24_spill] sm:$0xff] }
 0x41c   : > { %v1358_v40 = vpack.c.bf16 %v1316_v43, %v1314_v8  ;;  %v1357_v15 = vpack.c.bf16 %v1315_v34, %v1313_v62 }
 0x41d   : > { %v4637_v45 = vpop.eup %4636 }
 0x41e   : > { %1391 = vmatprep.subr.bf16.mxu1 %v1358_v40  ;;  %v2175_v23 = vmul.f32 %v4637_v45, %v8714_v31  ;;  %v2174_v2 = vmul.f32 %v4637_v45, %v8716_v7  ;;  %v4639_v24 = vpop.eup %4638  ;;  %v2283_v7 = vld [vmem:[#allocation3 + $0x48] sm:$0xff] }
 0x41f   : > { %v1310_v54 = vmul.f32 %v4639_v24, %v8717_v42  ;;  %v1309_v14 = vmul.f32 %v4639_v24, %v8719_v47  ;;  %v3144_v42 = vld [vmem:[#allocation3 + $0x78] sm:$0xff] }
 0x420   : > { %v2217_v38 = vpack.c.bf16 %v2175_v23, %v2173_v50  ;;  %v2216_v20 = vpack.c.bf16 %v2174_v2, %v2172_v61  ;;  %v2285_v2 = vld [vmem:[#allocation3 + $0x58] sm:$0xff] }
 0x421   : > { %v4641_v19 = vpop.eup %4640 }
 0x422   : > { %1392 = vmatpush2.bf16.xpose.msra.mxu1 %v1357_v15  ;;  %2314 = vxpose.xlu0.c.b16.start.end [1/1] (short) %v2295_v11, 128  ;;  %v4643_v35 = vpop.eup %4642  ;;  %v1312_v5 = vmul.f32 %v4641_v19, %v8718_v10  ;;  %v1311_v32 = vmul.f32 %v4641_v19, %v8720_v59  ;;  %v8728_v19 = vld [vmem:[#allocation20_spill] sm:$0xff] }
 0x423   : > { %2250 = vmatprep.subr.bf16.mxu0 %v2217_v38  ;;  %v2169_v17 = vmul.f32 %v4643_v35, %v8723_v30  ;;  %v2168_v12 = vmul.f32 %v4643_v35, %v8725_v63  ;;  %v2289_v35 = vadd.f32 %v2285_v2, %v8728_v19  ;;  %v8732_v30 = vld [vmem:[#allocation79_spill] sm:$0xff]  ;;  %v8734_v63 = vld [vmem:[#allocation26_spill] sm:$0xff] }
 0x424   : > { %2251 = vmatpush2.bf16.xpose.msra.mxu0 %v2216_v20  ;;  %v1356_v55 = vpack.c.bf16 %v1312_v5, %v1310_v54  ;;  %v1355_v57 = vpack.c.bf16 %v1311_v32, %v1309_v14 }
 0x425   : > { %v4645_v3 = vpop.eup %4644 }
 0x426   : > { %v2171_v27 = vmul.f32 %v4645_v3, %v8724_v53  ;;  %v2170_v26 = vmul.f32 %v4645_v3, %v8726_v9  ;;  %1393 = vmatprep.subr.bf16.mxu1 %v1356_v55  ;;  %v8729_v3 = vld [vmem:[#allocation21_spill] sm:$0xff] }
 0x428   : > { %3173 = vxpose.xlu1.c.b16.start.end [1/1] (short) %v3154_v41, 128  ;;  %v2215_v21 = vpack.c.bf16 %v2171_v27, %v2169_v17  ;;  %v2214_v33 = vpack.c.bf16 %v2170_v26, %v2168_v12  ;;  %v3148_v41 = vadd.f32 %v3144_v42, %v8730_v13  ;;  %v8733_v17 = vld [vmem:[#allocation107_spill] sm:$0xff]  ;;  %v8735_v12 = vld [vmem:[#allocation25_spill] sm:$0xff] }
 0x429   : > { %v8736_v9 = vpack.c.bf16 %v8734_v63, %v8735_v12  ;;  %v8737_v26 = vld [vmem:[#allocation19_spill] sm:$0xff] }
 0x42a   : > { %1394 = vmatpush2.bf16.xpose.msra.mxu1 %v1355_v57  ;;  %2252 = vmatprep.subr.bf16.mxu0 %v2215_v21  ;;  %v8731_v57 = vld [vmem:[#allocation108_spill] sm:$0xff] }
 0x42c   : > { %2253 = vmatpush2.bf16.xpose.msra.mxu0 %v2214_v33  ;;  %v8740_v33 = vmov 0  }
 0x44d   : > { %v1197_v8 = vpop.xlane.xlu0 %1196 }
 0x44e   : > { %4646 = vrcp.f32 %v1197_v8  ;;  %v8741_v8 = vld [vmem:[#allocation28_spill] sm:$0xff] }
 0x451   : > { %v2056_v58 = vpop.xlane.xlu0 %2055 }
 0x453   : > { %v1200_v43 = vpop.xlane.xlu1 %1199 }
 0x454   : > { %4648 = vrcp.f32 %v1200_v43 }
 0x455   : > { %4650 = vrcp.f32 %v2056_v58  ;;  %v8742_v58 = vld [vmem:[#allocation27_spill] sm:$0xff] }
 0x456   : > { %v8743_v43 = vpack.c.bf16 %v8741_v8, %v8742_v58 }
 0x457   : > { %v2059_v0 = vpop.xlane.xlu1 %2058 }
 0x458   : > { %4652 = vrcp.f32 %v2059_v0  ;;  %v8744_v0 = vld [vmem:[#allocation23_spill] sm:$0xff] }
 0x45b   : > { %v4647_v46 = vpop.eup %4646 }
 0x45c   : > { %v1306_v56 = vmul.f32 %v4647_v46, %v6467_v37  ;;  %v1305_v45 = vmul.f32 %v4647_v46, %v6461_v51 }
 0x45d   : > { %v1191_v62 = vpop.xlane.xlu0 %1190 }
 0x45e   : > { %4654 = vrcp.f32 %v1191_v62  ;;  %v8745_v62 = vld [vmem:[#allocation22_spill] sm:$0xff] }
 0x45f   : > { %v8746_v46 = vpack.c.bf16 %v8744_v0, %v8745_v62 }
 0x461   : > { %v4649_v34 = vpop.eup %4648  ;;  %v2050_v18 = vpop.xlane.xlu0 %2049 }
 0x462   : > { %v4651_v40 = vpop.eup %4650  ;;  %v1308_v15 = vmul.f32 %v4649_v34, %v6490_v44  ;;  %v1307_v29 = vmul.f32 %v4649_v34, %v6484_v1 }
 0x463   : > { %v1194_v11 = vpop.xlane.xlu1 %1193  ;;  %v2165_v23 = vmul.f32 %v4651_v40, %v6480_v6  ;;  %v2164_v36 = vmul.f32 %v4651_v40, %v6476_v39  ;;  %v8727_v6 = vld [vmem:[#allocation17_spill] sm:$0xff] }
 0x464   : > { %4656 = vrcp.f32 %v1194_v11  ;;  %v1354_v60 = vpack.c.bf16 %v1308_v15, %v1306_v56  ;;  %v1353_v50 = vpack.c.bf16 %v1307_v29, %v1305_v45  ;;  %v2287_v20 = vadd.f32 %v2283_v7, %v8727_v6 }
 0x465   : > { %v4653_v31 = vpop.eup %4652  ;;  %4658 = vrcp.f32 %v2050_v18 }
 0x466   : > { %1395 = vmatprep.subr.bf16.mxu1 %v1354_v60  ;;  %v2167_v37 = vmul.f32 %v4653_v31, %v6504_v25  ;;  %v2166_v44 = vmul.f32 %v4653_v31, %v6502_v22  ;;  %v3142_v25 = vld [vmem:[#allocation3 + $0x68] sm:$0xff]  ;;  %v2297_v32 = vpack.c.bf16 %v2289_v35, %v2287_v20 }
 0x467   : > { %1396 = vmatpush2.bf16.xpose.msra.mxu1 %v1353_v50  ;;  %v2053_v51 = vpop.xlane.xlu1 %2052  ;;  %v3146_v52 = vadd.f32 %v3142_v25, %v8729_v3  ;;  %v2306_v34 = vpop.trf.xlu0 }
 0x468   : > { %4660 = vrcp.f32 %v2053_v51  ;;  %v2213_v1 = vpack.c.bf16 %v2167_v37, %v2165_v23  ;;  %v2212_v61 = vpack.c.bf16 %v2166_v44, %v2164_v36 }
 0x469   : > { %v3156_v27 = vpack.c.bf16 %v3148_v41, %v3146_v52 }
 0x46a   : > { %2254 = vmatprep.subr.bf16.mxu0 %v2213_v1 }
 0x46b   : > { %2255 = vmatpush2.bf16.xpose.msra.mxu0 %v2212_v61  ;;  %v4655_v24 = vpop.eup %4654  ;;  %v2307_v40 = vpop.trf.xlu0 }
 0x46c   : > { %v1302_v39 = vmul.f32 %v4655_v24, %v6519_v48  ;;  %v1301_v54 = vmul.f32 %v4655_v24, %v6515_v16 }
 0x46d   : > { %v3165_v56 = vpop.trf.xlu1 }
 0x46f   : > { %v2308_v45 = vpop.trf.xlu0 }
 0x471   : > { %v4657_v38 = vpop.eup %4656  ;;  %v3166_v15 = vpop.trf.xlu1 }
 0x472   : > { %v1304_v22 = vmul.f32 %v4657_v38, %v6533_v4  ;;  %v1303_v10 = vmul.f32 %v4657_v38, %v6528_v49  ;;  %v4659_v5 = vpop.eup %4658 }
 0x473   : > { %v2161_v55 = vmul.f32 %v4659_v5, %v6526_v28  ;;  %v2160_v4 = vmul.f32 %v4659_v5, %v8732_v30  ;;  %v8738_v28 = vld [vmem:[#allocation18_spill] sm:$0xff]  ;;  %v2309_v18 = vpop.trf.xlu0  ;;  %v8748_v5 = vld [vmem:[#allocation32_spill] sm:$0xff] }
 0x474   : > { %v1352_v47 = vpack.c.bf16 %v1304_v22, %v1302_v39  ;;  %v1351_v14 = vpack.c.bf16 %v1303_v10, %v1301_v54  ;;  %v8739_v21 = vpack.c.bf16 %v8737_v26, %v8738_v28  ;;  %v8747_v10 = vld [vmem:[#allocation30_spill] sm:$0xff] }
 0x475   : > { %v4661_v59 = vpop.eup %4660  ;;  %v3167_v29 = vpop.trf.xlu1 }
 0x476   : > { %1397 = vmatprep.subr.bf16.mxu1 %v1352_v47  ;;  %v2163_v48 = vmul.f32 %v4661_v59, %v8731_v57  ;;  %v2162_v16 = vmul.f32 %v4661_v59, %v8733_v17  ;;  %v3052_v47 = vpack.c.bf16 %v8748_v5, %v8747_v10  ;;  %v8749_v59 = vld [vmem:[#allocation34_spill] sm:$0xff] }
 0x477   : > { %1398 = vmatpush2.bf16.xpose.msra.mxu1 %v1351_v14  ;;  %v2310_v60 = vpop.trf.xlu0 }
 0x478   : > { %2392 = vmatprep.subr.bf16.mxu1 %v2297_v32  ;;  %v2211_v49 = vpack.c.bf16 %v2163_v48, %v2161_v55  ;;  %v2210_v53 = vpack.c.bf16 %v2162_v16, %v2160_v4  ;;  %v8750_v32 = vld [vmem:[#allocation36_spill] sm:$0xff] }
 0x479   : > { %v3168_v11 = vpop.trf.xlu1  ;;  %v3911_v3 = vpack.c.bf16 %v8750_v32, %v8749_v59 }
 0x47a   : > { %2256 = vmatprep.subr.bf16.mxu0 %v2211_v49 }
 0x47b   : > { %2257 = vmatpush2.bf16.xpose.msra.mxu0 %v2210_v53  ;;  %v2311_v31 = vpop.trf.xlu0 }
 0x47c   : > { %3251 = vmatprep.subr.bf16.mxu0 %v3156_v27 }
 0x47d   : > { %v3169_v50 = vpop.trf.xlu1 }
 0x47e   : > { %1400 = vmatmul.mubr.bf16.vlgmr.msra.gmra.mxu1 %v8736_v9 }
 0x47f   : > { %2393 = vmatpush1.bf16.msra.mxu1 %v8739_v21  ;;  %2410 = vmatprep.mubr.bf16.mxu1 %v8740_v33  ;;  %v2312_v37 = vpop.trf.xlu0 }
 0x481   : > { %v3170_v23 = vpop.trf.xlu1 }
 0x482   : > { %2259 = vmatmul.mubr.bf16.vlgmr.msra.gmra.mxu0 %v8743_v43 }
 0x483   : > { %3252 = vmatpush1.bf16.msra.mxu0 %v8746_v46  ;;  %3269 = vmatprep.mubr.bf16.mxu0 %v8740_v33  ;;  %v2313_v44 = vpop.trf.xlu0 }
 0x485   : > { %v3171_v36 = vpop.trf.xlu1 }
 0x486   : > { %4152 = vmatmul.mubr.msk.bf16.vlgmr.msra.gmra.mxu1 %vm611_vm1, %v2306_v34 }
 0x487   : > { %2420 = vmatprep.mubr.bf16.mxu1 %v8740_v33  ;;  %v2322_v1 = vpop.trf.xlu0 }
 0x489   : > { %v3172_v51 = vpop.trf.xlu1 }
 0x48a   : > { %4168 = vmatmul.mubr.msk.bf16.vlgmr.msra.gmra.mxu0 %vm611_vm1, %v3165_v56 }
 0x48b   : > { %3279 = vmatprep.mubr.bf16.mxu0 %v8740_v33  ;;  %v2323_v7 = vpop.trf.xlu0 }
 0x48d   : > { %v3181_v61 = vpop.trf.xlu1 }
 0x48e   : > { %4153 = vmatmul.mubr.msk.bf16.gmra.mxu1 %vm611_vm1, %v2307_v40 }
 0x48f   : > { %2430 = vmatprep.mubr.bf16.mxu1 %v8740_v33  ;;  %v2324_v24 = vpop.trf.xlu0 }
 0x491   : > { %v3182_v2 = vpop.trf.xlu1 }
 0x492   : > { %4169 = vmatmul.mubr.msk.bf16.gmra.mxu0 %vm611_vm1, %v3166_v15 }
 0x493   : > { %3289 = vmatprep.mubr.bf16.mxu0 %v8740_v33  ;;  %v2325_v6 = vpop.trf.xlu0 }
 0x495   : > { %v3183_v38 = vpop.trf.xlu1 }
 0x496   : > { %4154 = vmatmul.mubr.msk.bf16.gmra.mxu1 %vm611_vm1, %v2308_v45 }
 0x497   : > { %2440 = vmatprep.mubr.bf16.mxu1 %v8740_v33  ;;  %v2326_v19 = vpop.trf.xlu0 }
 0x499   : > { %v3184_v20 = vpop.trf.xlu1 }
 0x49a   : > { %4170 = vmatmul.mubr.msk.bf16.gmra.mxu0 %vm611_vm1, %v3167_v29 }
 0x49b   : > { %3299 = vmatprep.mubr.bf16.mxu0 %v8740_v33  ;;  %v2327_v25 = vpop.trf.xlu0 }
 0x49d   : > { %v3185_v35 = vpop.trf.xlu1 }
 0x49e   : > { %4155 = vmatmul.mubr.msk.bf16.gmra.mxu1 %vm611_vm1, %v2309_v18 }
 0x49f   : > { %2450 = vmatprep.mubr.bf16.mxu1 %v8740_v33  ;;  %v2328_v39 = vpop.trf.xlu0 }
 0x4a1   : > { %v3186_v42 = vpop.trf.xlu1 }
 0x4a2   : > { %4171 = vmatmul.mubr.msk.bf16.gmra.mxu0 %vm611_vm1, %v3168_v11 }
 0x4a3   : > { %3309 = vmatprep.mubr.bf16.mxu0 %v8740_v33  ;;  %v2329_v54 = vpop.trf.xlu0 }
 0x4a5   : > { %v3187_v22 = vpop.trf.xlu1 }
 0x4a6   : > { %4156 = vmatmul.mubr.msk.bf16.gmra.mxu1 %vm611_vm1, %v2310_v60 }
 0x4a7   : > { %2460 = vmatprep.mubr.bf16.mxu1 %v8740_v33 }
 0x4a9   : > { %v3188_v14 = vpop.trf.xlu1 }
 0x4aa   : > { %4172 = vmatmul.mubr.msk.bf16.gmra.mxu0 %vm611_vm1, %v3169_v50 }
 0x4ab   : > { %3319 = vmatprep.mubr.bf16.mxu0 %v8740_v33 }
 0x4ae   : > { %4157 = vmatmul.mubr.msk.bf16.gmra.mxu1 %vm611_vm1, %v2311_v31 }
 0x4af   : > { %2470 = vmatprep.mubr.bf16.mxu1 %v8740_v33 }
 0x4b2   : > { %4173 = vmatmul.mubr.msk.bf16.gmra.mxu0 %vm611_vm1, %v3170_v23 }
 0x4b3   : > { %3329 = vmatprep.mubr.bf16.mxu0 %v8740_v33 }
 0x4b6   : > { %4158 = vmatmul.mubr.msk.bf16.gmra.mxu1 %vm611_vm1, %v2312_v37 }
 0x4b7   : > { %2480 = vmatprep.mubr.bf16.mxu1 %v8740_v33 }
 0x4ba   : > { %4174 = vmatmul.mubr.msk.bf16.gmra.mxu0 %vm611_vm1, %v3171_v36 }
 0x4bb   : > { %3339 = vmatprep.mubr.bf16.mxu0 %v8740_v33 }
 0x4be   : > { %4159 = vmatmul.mubr.msk.bf16.gmra.mxu1 %vm611_vm1, %v2313_v44 }
 0x4bf   : > { %2490 = vmatprep.mubr.bf16.mxu1 %v8740_v33 }
 0x4c2   : > { %4175 = vmatmul.mubr.msk.bf16.gmra.mxu0 %vm611_vm1, %v3172_v51 }
 0x4c3   : > { %3349 = vmatprep.mubr.bf16.mxu0 %v8740_v33 }
 0x4c6   : > { %4160 = vmatmul.mubr.msk.bf16.gmra.mxu1 %vm611_vm1, %v2322_v1 }
 0x4c7   : > { %2500 = vmatprep.mubr.bf16.mxu1 %v8740_v33 }
 0x4ca   : > { %4176 = vmatmul.mubr.msk.bf16.gmra.mxu0 %vm611_vm1, %v3181_v61 }
 0x4cb   : > { %3359 = vmatprep.mubr.bf16.mxu0 %v8740_v33 }
 0x4ce   : > { %4161 = vmatmul.mubr.msk.bf16.gmra.mxu1 %vm611_vm1, %v2323_v7 }
 0x4cf   : > { %2510 = vmatprep.mubr.bf16.mxu1 %v8740_v33 }
 0x4d2   : > { %4177 = vmatmul.mubr.msk.bf16.gmra.mxu0 %vm611_vm1, %v3182_v2 }
 0x4d3   : > { %3369 = vmatprep.mubr.bf16.mxu0 %v8740_v33 }
 0x4d6   : > { %4162 = vmatmul.mubr.msk.bf16.gmra.mxu1 %vm611_vm1, %v2324_v24 }
 0x4d7   : > { %2520 = vmatprep.mubr.bf16.mxu1 %v8740_v33 }
 0x4da   : > { %4178 = vmatmul.mubr.msk.bf16.gmra.mxu0 %vm611_vm1, %v3183_v38 }
 0x4db   : > { %3379 = vmatprep.mubr.bf16.mxu0 %v8740_v33 }
 0x4de   : > { %4163 = vmatmul.mubr.msk.bf16.gmra.mxu1 %vm611_vm1, %v2325_v6 }
 0x4df   : > { %2530 = vmatprep.mubr.bf16.mxu1 %v8740_v33 }
 0x4e2   : > { %4179 = vmatmul.mubr.msk.bf16.gmra.mxu0 %vm611_vm1, %v3184_v20 }
 0x4e3   : > { %3389 = vmatprep.mubr.bf16.mxu0 %v8740_v33 }
 0x4e6   : > { %4164 = vmatmul.mubr.msk.bf16.gmra.mxu1 %vm611_vm1, %v2326_v19 }
 0x4e7   : > { %2540 = vmatprep.mubr.bf16.mxu1 %v8740_v33 }
 0x4ea   : > { %4180 = vmatmul.mubr.msk.bf16.gmra.mxu0 %vm611_vm1, %v3185_v35 }
 0x4eb   : > { %3399 = vmatprep.mubr.bf16.mxu0 %v8740_v33 }
 0x4ee   : > { %4165 = vmatmul.mubr.msk.bf16.gmra.mxu1 %vm611_vm1, %v2327_v25 }
 0x4ef   : > { %2550 = vmatprep.mubr.bf16.mxu1 %v8740_v33 }
 0x4f2   : > { %4181 = vmatmul.mubr.msk.bf16.gmra.mxu0 %vm611_vm1, %v3186_v42 }
 0x4f3   : > { %3409 = vmatprep.mubr.bf16.mxu0 %v8740_v33 }
 0x4f6   : > { %4166 = vmatmul.mubr.msk.bf16.gmra.mxu1 %vm611_vm1, %v2328_v39 }
 0x4f7   : > { %2560 = vmatprep.mubr.bf16.mxu1 %v8740_v33 }
 0x4fa   : > { %4182 = vmatmul.mubr.msk.bf16.gmra.mxu0 %vm611_vm1, %v3187_v22 }
 0x4fb   : > { %3419 = vmatprep.mubr.bf16.mxu0 %v8740_v33 }
 0x4fe   : > { %4167 = vmatmul.mubr.msk.bf16.gmra.mxu1 %vm611_vm1, %v2329_v54 }
 0x4ff   : > { %3117 = vmatprep.mubr.bf16.mxu1 %v3052_v47 }
 0x502   : > { %4183 = vmatmul.mubr.msk.bf16.gmra.mxu0 %vm611_vm1, %v3188_v14 }
 0x503   : > { %3976 = vmatprep.mubr.bf16.mxu0 %v3911_v3 }
 0x53e   : > { %v1401_v52 = vpop.f32.mrf.mxu1 }
 0x53f   : > { %1410 = vst [vmem:[%s6737_s27] sm:$0xff] %v1401_v52 }
 0x540   : > { %v1403_v13 = vpop.f32.mrf.mxu1 }
 0x541   : > { %1411 = vst [vmem:[%s6737_s27 + $0x8] sm:$0xff] %v1403_v13 }
 0x542   : > { %v1405_v41 = vpop.f32.mrf.mxu1  ;;  %v2260_v55 = vpop.f32.mrf.mxu0 }
 0x543   : > { %1412 = vst [vmem:[%s6737_s27 + $0x10] sm:$0xff] %v1405_v41  ;;  %2269 = vst [vmem:[%s6737_s27 + $0x20] sm:$0xff] %v2260_v55 }
 0x544   : > { %v1407_v57 = vpop.f32.mrf.mxu1  ;;  %v2262_v48 = vpop.f32.mrf.mxu0 }
 0x545   : > { %1413 = vst [vmem:[%s6737_s27 + $0x18] sm:$0xff] %v1407_v57  ;;  %2270 = vst [vmem:[%s6737_s27 + $0x28] sm:$0xff] %v2262_v48 }
 0x546   : > { %v2264_v30 = vpop.f32.mrf.mxu0  ;;  %v6745_v4 = vpop.f32.mrf.mxu1 }
 0x547   : > { %8751 = vst [vmem:[#allocation80_spill] sm:$0xff] %v6745_v4  ;;  %2271 = vst [vmem:[%s6737_s27 + $0x30] sm:$0xff] %v2264_v30 }
 0x548   : > { %v2266_v17 = vpop.f32.mrf.mxu0  ;;  %v6748_v16 = vpop.f32.mrf.mxu1 }
 0x549   : > { %8752 = vst [vmem:[#allocation81_spill] sm:$0xff] %v6748_v16  ;;  %2272 = vst [vmem:[%s6737_s27 + $0x38] sm:$0xff] %v2266_v17 }
 0x54a   : > { %v6751_v49 = vpop.f32.mrf.mxu1  ;;  %v6753_v53 = vpop.f32.mrf.mxu0 }
 0x54b   : > { %8753 = vst [vmem:[#allocation99_spill] sm:$0xff] %v6751_v49  ;;  %8754 = vst [vmem:[#allocation100_spill] sm:$0xff] %v6753_v53 }
 0x54c   : > { %v6755_v27 = vpop.f32.mrf.mxu1  ;;  %v6757_v63 = vpop.f32.mrf.mxu0 }
 0x54d   : > { %8755 = vst [vmem:[#allocation75_spill] sm:$0xff] %v6755_v27  ;;  %8756 = vst [vmem:[#allocation101_spill] sm:$0xff] %v6757_v63 }
 0x54e   : > { %v6759_v12 = vpop.f32.mrf.mxu1  ;;  %v6761_v9 = vpop.f32.mrf.mxu0 }
 0x54f   : > { %8757 = vst [vmem:[#allocation102_spill] sm:$0xff] %v6759_v12  ;;  %8758 = vst [vmem:[#allocation76_spill] sm:$0xff] %v6761_v9 }
 0x550   : > { %v6763_v26 = vpop.f32.mrf.mxu1  ;;  %v6765_v28 = vpop.f32.mrf.mxu0 }
 0x551   : > { %8759 = vst [vmem:[#allocation77_spill] sm:$0xff] %v6763_v26  ;;  %8760 = vst [vmem:[#allocation94_spill] sm:$0xff] %v6765_v28 }
 0x552   : > { %v6767_v21 = vpop.f32.mrf.mxu1  ;;  %v6769_v33 = vpop.f32.mrf.mxu0 }
 0x553   : > { %8761 = vst [vmem:[#allocation95_spill] sm:$0xff] %v6767_v21  ;;  %8762 = vst [vmem:[#allocation97_spill] sm:$0xff] %v6769_v33 }
 0x554   : > { %v6771_v8 = vpop.f32.mrf.mxu1  ;;  %v6773_v58 = vpop.f32.mrf.mxu0 }
 0x555   : > { %8763 = vst [vmem:[#allocation98_spill] sm:$0xff] %v6771_v8  ;;  %8764 = vst [vmem:[#allocation92_spill] sm:$0xff] %v6773_v58 }
 0x556   : > { %v6775_v43 = vpop.f32.mrf.mxu1  ;;  %v6777_v0 = vpop.f32.mrf.mxu0 }
 0x557   : > { %8765 = vst [vmem:[#allocation126_spill] sm:$0xff] %v6775_v43  ;;  %8766 = vst [vmem:[#allocation128_spill] sm:$0xff] %v6777_v0 }
 0x558   : > { %v6779_v62 = vpop.f32.mrf.mxu1  ;;  %v6781_v46 = vpop.f32.mrf.mxu0 }
 0x559   : > { %8767 = vst [vmem:[#allocation124_spill] sm:$0xff] %v6779_v62  ;;  %8768 = vst [vmem:[#allocation127_spill] sm:$0xff] %v6781_v46  ;;  %v2583_v34 = vmax.f32 %v6775_v43, %v6779_v62 }
 0x55a   : > { %v6785_v56 = vpop.f32.mrf.mxu1  ;;  %v6787_v40 = vpop.f32.mrf.mxu0 }
 0x55b   : > { %8769 = vst [vmem:[#allocation68_spill] sm:$0xff] %v6785_v56  ;;  %2584 = vmax.xlane.f32.xlu0 %v2583_v34 }
 0x55c   : > { %v6789_v15 = vpop.f32.mrf.mxu1  ;;  %v6791_v45 = vpop.f32.mrf.mxu0 }
 0x55d   : > { %8770 = vst [vmem:[#allocation52_spill] sm:$0xff] %v6789_v15  ;;  %8771 = vst [vmem:[#allocation71_spill] sm:$0xff] %v6791_v45  ;;  %v2586_v29 = vmax.f32 %v6785_v56, %v6789_v15 }
 0x55e   : > { %v6795_v18 = vpop.f32.mrf.mxu1  ;;  %v6797_v11 = vpop.f32.mrf.mxu0 }
 0x55f   : > { %8772 = vst [vmem:[#allocation66_spill] sm:$0xff] %v6797_v11  ;;  %2587 = vmax.xlane.f32.xlu1 %v2586_v29 }
 0x560   : > { %v6799_v60 = vpop.f32.mrf.mxu1  ;;  %v6801_v50 = vpop.f32.mrf.mxu0 }
 0x561   : > { %8773 = vst [vmem:[#allocation47_spill] sm:$0xff] %v6801_v50  ;;  %v2589_v31 = vmax.f32 %v6795_v18, %v6799_v60 }
 0x562   : > { %v6805_v23 = vpop.f32.mrf.mxu1  ;;  %v6807_v37 = vpop.f32.mrf.mxu0 }
 0x563   : > { %8774 = vst [vmem:[#allocation134_spill] sm:$0xff] %v6805_v23  ;;  %8775 = vst [vmem:[#allocation125_spill] sm:$0xff] %v6807_v37  ;;  %2590 = vmax.xlane.f32.xlu0 %v2589_v31 }
 0x564   : > { %v6809_v36 = vpop.f32.mrf.mxu1  ;;  %v6811_v44 = vpop.f32.mrf.mxu0 }
 0x565   : > { %8776 = vst [vmem:[#allocation82_spill] sm:$0xff] %v6809_v36  ;;  %8777 = vst [vmem:[#allocation84_spill] sm:$0xff] %v6811_v44  ;;  %v2592_v51 = vmax.f32 %v6805_v23, %v6809_v36  ;;  %v3448_v35 = vmax.f32 %v6807_v37, %v6811_v44 }
 0x566   : > { %v6815_v1 = vpop.f32.mrf.mxu1  ;;  %v6817_v61 = vpop.f32.mrf.mxu0 }
 0x567   : > { %8778 = vst [vmem:[#allocation123_spill] sm:$0xff] %v6817_v61  ;;  %2593 = vmax.xlane.f32.xlu1 %v2592_v51 }
 0x568   : > { %v6819_v7 = vpop.f32.mrf.mxu1  ;;  %v6821_v2 = vpop.f32.mrf.mxu0 }
 0x569   : > { %8779 = vst [vmem:[#allocation69_spill] sm:$0xff] %v6821_v2  ;;  %v2595_v24 = vmax.f32 %v6815_v1, %v6819_v7  ;;  %v3451_v10 = vmax.f32 %v6817_v61, %v6821_v2 }
 0x56a   : > { %v6825_v38 = vpop.f32.mrf.mxu1  ;;  %v6827_v6 = vpop.f32.mrf.mxu0 }
 0x56b   : > { %2596 = vmax.xlane.f32.xlu0 %v2595_v24 }
 0x56c   : > { %v6829_v20 = vpop.f32.mrf.mxu1  ;;  %v6831_v19 = vpop.f32.mrf.mxu0 }
 0x56d   : > { %v2598_v25 = vmax.f32 %v6825_v38, %v6829_v20  ;;  %v3454_v3 = vmax.f32 %v6827_v6, %v6831_v19 }
 0x56e   : > { %v6837_v42 = vpop.f32.mrf.mxu1  ;;  %v6839_v39 = vpop.f32.mrf.mxu0 }
 0x56f   : > { %2599 = vmax.xlane.f32.xlu1 %v2598_v25  ;;  %3449 = vmax.xlane.f32.xlu0 %v3448_v35 }
 0x570   : > { %v6841_v22 = vpop.f32.mrf.mxu1  ;;  %v6843_v54 = vpop.f32.mrf.mxu0 }
 0x571   : > { %v2601_v5 = vmax.f32 %v6837_v42, %v6841_v22  ;;  %v3457_v48 = vmax.f32 %v6839_v39, %v6843_v54 }
 0x572   : > { %v6849_v47 = vpop.f32.mrf.mxu1  ;;  %v6851_v14 = vpop.f32.mrf.mxu0 }
 0x573   : > { %2602 = vmax.xlane.f32.xlu0 %v2601_v5  ;;  %3452 = vmax.xlane.f32.xlu1 %v3451_v10 }
 0x574   : > { %v6853_v59 = vpop.f32.mrf.mxu1  ;;  %v6855_v32 = vpop.f32.mrf.mxu0 }
 0x575   : > { %v2604_v52 = vmax.f32 %v6849_v47, %v6853_v59  ;;  %v3460_v51 = vmax.f32 %v6851_v14, %v6855_v32 }
 0x576   : > { %v6861_v13 = vpop.f32.mrf.mxu1  ;;  %v6863_v41 = vpop.f32.mrf.mxu0 }
 0x577   : > { %2605 = vmax.xlane.f32.xlu1 %v2604_v52  ;;  %3455 = vmax.xlane.f32.xlu0 %v3454_v3 }
 0x578   : > { %v6865_v55 = vpop.f32.mrf.mxu1  ;;  %v6867_v57 = vpop.f32.mrf.mxu0 }
 0x579   : > { %v2607_v30 = vmax.f32 %v6861_v13, %v6865_v55  ;;  %v3463_v3 = vmax.f32 %v6863_v41, %v6867_v57 }
 0x57a   : > { %v6873_v17 = vpop.f32.mrf.mxu1  ;;  %v6875_v34 = vpop.f32.mrf.mxu0 }
 0x57b   : > { %2608 = vmax.xlane.f32.xlu0 %v2607_v30  ;;  %3458 = vmax.xlane.f32.xlu1 %v3457_v48 }
 0x57c   : > { %v6877_v29 = vpop.f32.mrf.mxu1  ;;  %v6879_v31 = vpop.f32.mrf.mxu0 }
 0x57d   : > { %v2610_v24 = vmax.f32 %v6873_v17, %v6877_v29 }
 0x57e   : > { %v6885_v35 = vpop.f32.mrf.mxu1  ;;  %v6887_v25 = vpop.f32.mrf.mxu0 }
 0x57f   : > { %2611 = vmax.xlane.f32.xlu1 %v2610_v24  ;;  %3461 = vmax.xlane.f32.xlu0 %v3460_v51  ;;  %v3466_v51 = vmax.f32 %v6875_v34, %v6879_v31 }
 0x580   : > { %v6889_v10 = vpop.f32.mrf.mxu1  ;;  %v6891_v5 = vpop.f32.mrf.mxu0 }
 0x581   : > { %v2613_v52 = vmax.f32 %v6885_v35, %v6889_v10 }
 0x582   : > { %v6897_v48 = vpop.f32.mrf.mxu1  ;;  %v6899_v30 = vpop.f32.mrf.mxu0 }
 0x583   : > { %2614 = vmax.xlane.f32.xlu0 %v2613_v52  ;;  %3464 = vmax.xlane.f32.xlu1 %v3463_v3  ;;  %v3469_v3 = vmax.f32 %v6887_v25, %v6891_v5 }
 0x584   : > { %v6901_v2 = vpop.f32.mrf.mxu1  ;;  %v6903_v24 = vpop.f32.mrf.mxu0 }
 0x585   : > { %v2616_v61 = vmax.f32 %v6897_v48, %v6901_v2  ;;  %v3472_v23 = vmax.f32 %v6899_v30, %v6903_v24 }
 0x586   : > { %v6909_v15 = vpop.f32.mrf.mxu1  ;;  %v6911_v56 = vpop.f32.mrf.mxu0 }
 0x587   : > { %8780 = vst [vmem:[#allocation51_spill] sm:$0xff] %v6909_v15  ;;  %2617 = vmax.xlane.f32.xlu1 %v2616_v61  ;;  %3467 = vmax.xlane.f32.xlu0 %v3466_v51  ;;  %v3442_v51 = vmax.f32 %v6787_v40, %v6791_v45 }
 0x588   : > { %v6913_v36 = vpop.f32.mrf.mxu1  ;;  %v6915_v52 = vpop.f32.mrf.mxu0 }
 0x589   : > { %8781 = vst [vmem:[#allocation132_spill] sm:$0xff] %v6913_v36  ;;  %v3475_v36 = vmax.f32 %v6911_v56, %v6915_v52 }
 0x58a   : > { %v6921_v44 = vpop.f32.mrf.mxu1  ;;  %v6923_v37 = vpop.f32.mrf.mxu0 }
 0x58b   : > { %8782 = vst [vmem:[#allocation133_spill] sm:$0xff] %v6921_v44  ;;  %8783 = vst [vmem:[#allocation130_spill] sm:$0xff] %v6923_v37  ;;  %3470 = vmax.xlane.f32.xlu1 %v3469_v3  ;;  %3473 = vmax.xlane.f32.xlu0 %v3472_v23  ;;  %v2577_v23 = vmax.f32 %v6759_v12, %v6763_v26 }
 0x58c   : > { %v6925_v15 = vpop.f32.mrf.mxu1  ;;  %v6927_v61 = vpop.f32.mrf.mxu0 }
 0x58d   : > { %8784 = vst [vmem:[#allocation48_spill] sm:$0xff] %v6925_v15  ;;  %8785 = vst [vmem:[#allocation61_spill] sm:$0xff] %v6927_v61  ;;  %v3445_v15 = vmax.f32 %v6797_v11, %v6801_v50  ;;  %v3439_v11 = vmax.f32 %v6777_v0, %v6781_v46  ;;  %v3433_v0 = vmax.f32 %v6761_v9, %v6765_v28 }
 0x58e   : > { %v6933_v62 = vpop.f32.mrf.mxu1  ;;  %v6935_v43 = vpop.f32.mrf.mxu0 }
 0x58f   : > { %8786 = vst [vmem:[#allocation70_spill] sm:$0xff] %v6935_v43  ;;  %3443 = vmax.xlane.f32.xlu0 %v3442_v51  ;;  %3476 = vmax.xlane.f32.xlu1 %v3475_v36  ;;  %v2580_v36 = vmax.f32 %v6767_v21, %v6771_v8  ;;  %v3436_v43 = vmax.f32 %v6769_v33, %v6773_v58 }
 0x590   : > { %v6937_v44 = vpop.f32.mrf.mxu1  ;;  %v6939_v3 = vpop.f32.mrf.mxu0  ;;  %v3430_v33 = vmax.f32 %v6753_v53, %v6757_v63 }
 0x591   : > { %8787 = vst [vmem:[#allocation60_spill] sm:$0xff] %v6939_v3 }
 0x592   : > { %v6945_v37 = vpop.f32.mrf.mxu1  ;;  %v6947_v61 = vpop.f32.mrf.mxu0 }
 0x593   : > { %2578 = vmax.xlane.f32.xlu0 %v2577_v23  ;;  %3446 = vmax.xlane.f32.xlu1 %v3445_v15  ;;  %v2571_v15 = vmax.f32 %v6745_v4, %v6748_v16 }
 0x594   : > { %v6949_v45 = vpop.f32.mrf.mxu1  ;;  %v6951_v51 = vpop.f32.mrf.mxu0 }
 0x596   : > { %v6957_v3 = vpop.f32.mrf.mxu1  ;;  %v6959_v26 = vpop.f32.mrf.mxu0 }
 0x597   : > { %8788 = vst [vmem:[#allocation131_spill] sm:$0xff] %v6957_v3  ;;  %3437 = vmax.xlane.f32.xlu0 %v3436_v43  ;;  %2581 = vmax.xlane.f32.xlu1 %v2580_v36  ;;  %v2574_v36 = vmax.f32 %v6751_v49, %v6755_v27 }
 0x598   : > { %v6961_v50 = vpop.f32.mrf.mxu1  ;;  %v6963_v23 = vpop.f32.mrf.mxu0 }
 0x599   : > { %8789 = vst [vmem:[#allocation73_spill] sm:$0xff] %v6961_v50  ;;  %v2631_v46 = vmax.f32 %v6957_v3, %v6961_v50 }
 0x59a   : > { %v6969_v8 = vpop.f32.mrf.mxu1  ;;  %v6971_v21 = vpop.f32.mrf.mxu0 }
 0x59b   : > { %8790 = vst [vmem:[#allocation129_spill] sm:$0xff] %v6969_v8  ;;  %8791 = vst [vmem:[#allocation44_spill] sm:$0xff] %v6971_v21  ;;  %2572 = vmax.xlane.f32.xlu0 %v2571_v15  ;;  %3440 = vmax.xlane.f32.xlu1 %v3439_v11 }
 0x59c   : > { %v6973_v58 = vpop.f32.mrf.mxu1  ;;  %v6975_v43 = vpop.f32.mrf.mxu0 }
 0x59d   : > { %8792 = vst [vmem:[#allocation49_spill] sm:$0xff] %v6973_v58  ;;  %8793 = vst [vmem:[#allocation43_spill] sm:$0xff] %v6975_v43  ;;  %v2634_v63 = vmax.f32 %v6969_v8, %v6973_v58 }
 0x59e   : > { %v6981_v16 = vpop.f32.mrf.mxu1  ;;  %v6983_v4 = vpop.f32.mrf.mxu0 }
 0x59f   : > { %8794 = vst [vmem:[#allocation50_spill] sm:$0xff] %v6981_v16  ;;  %8795 = vst [vmem:[#allocation72_spill] sm:$0xff] %v6983_v4  ;;  %3431 = vmax.xlane.f32.xlu0 %v3430_v33  ;;  %2575 = vmax.xlane.f32.xlu1 %v2574_v36 }
 0x5a0   : > { %v6987_v11 = vpop.f32.mrf.mxu1  ;;  %v6989_v15 = vpop.f32.mrf.mxu0 }
 0x5a1   : > { %8796 = vst [vmem:[#allocation58_spill] sm:$0xff] %v6987_v11  ;;  %8797 = vst [vmem:[#allocation63_spill] sm:$0xff] %v6989_v15  ;;  %v2637_v53 = vmax.f32 %v6981_v16, %v6987_v11 }
 0x5a2   : > { %v6993_v27 = vpop.f32.mrf.mxu1  ;;  %v6995_v49 = vpop.f32.mrf.mxu0 }
 0x5a3   : > { %8798 = vst [vmem:[#allocation62_spill] sm:$0xff] %v6993_v27  ;;  %8799 = vst [vmem:[#allocation39_spill] sm:$0xff] %v6995_v49  ;;  %2632 = vmax.xlane.f32.xlu0 %v2631_v46  ;;  %3434 = vmax.xlane.f32.xlu1 %v3433_v0 }
 0x5a4   : > { %v7001_v33 = vpop.f32.mrf.mxu1  ;;  %v7003_v36 = vpop.f32.mrf.mxu0 }
 0x5a5   : > { %8800 = vst [vmem:[#allocation46_spill] sm:$0xff] %v7001_v33  ;;  %8801 = vst [vmem:[#allocation59_spill] sm:$0xff] %v7003_v36  ;;  %v2640_v28 = vmax.f32 %v6993_v27, %v7001_v33  ;;  %v3496_v11 = vmax.f32 %v6995_v49, %v7003_v36 }
 0x5a6   : > { %v7005_v50 = vpop.f32.mrf.mxu1  ;;  %v7007_v3 = vpop.f32.mrf.mxu0 }
 0x5a7   : > { %8802 = vst [vmem:[#allocation45_spill] sm:$0xff] %v7005_v50  ;;  %8803 = vst [vmem:[#allocation65_spill] sm:$0xff] %v7007_v3  ;;  %2638 = vmax.xlane.f32.xlu0 %v2637_v53  ;;  %2635 = vmax.xlane.f32.xlu1 %v2634_v63 }
 0x5a8   : > { %v7011_v9 = vpop.f32.mrf.mxu1  ;;  %v7013_v58 = vpop.f32.mrf.mxu0 }
 0x5a9   : > { %8804 = vst [vmem:[#allocation41_spill] sm:$0xff] %v7011_v9  ;;  %8805 = vst [vmem:[#allocation40_spill] sm:$0xff] %v7013_v58  ;;  %v2643_v0 = vmax.f32 %v7005_v50, %v7011_v9  ;;  %v3499_v9 = vmax.f32 %v7007_v3, %v7013_v58 }
 0x5aa   : > { %v7017_v46 = vpop.f32.mrf.mxu1  ;;  %v7019_v8 = vpop.f32.mrf.mxu0 }
 0x5ab   : > { %8806 = vst [vmem:[#allocation55_spill] sm:$0xff] %v7017_v46  ;;  %8807 = vst [vmem:[#allocation54_spill] sm:$0xff] %v7019_v8  ;;  %2644 = vmax.xlane.f32.xlu0 %v2643_v0  ;;  %2641 = vmax.xlane.f32.xlu1 %v2640_v28 }
 0x5ac   : > { %v7023_v16 = vpop.f32.mrf.mxu1  ;;  %v7025_v53 = vpop.f32.mrf.mxu0 }
 0x5ad   : > { %8808 = vst [vmem:[#allocation37_spill] sm:$0xff] %v7023_v16  ;;  %8809 = vst [vmem:[#allocation64_spill] sm:$0xff] %v7025_v53  ;;  %v2646_v63 = vmax.f32 %v7017_v46, %v7023_v16  ;;  %v3502_v16 = vmax.f32 %v7019_v8, %v7025_v53 }
 0x5ae   : > { %v7029_v33 = vpop.f32.mrf.mxu1  ;;  %v7031_v27 = vpop.f32.mrf.mxu0 }
 0x5af   : > { %8810 = vst [vmem:[#allocation67_spill] sm:$0xff] %v7029_v33  ;;  %8811 = vst [vmem:[#allocation42_spill] sm:$0xff] %v7031_v27  ;;  %2647 = vmax.xlane.f32.xlu1 %v2646_v63  ;;  %3497 = vmax.xlane.f32.xlu0 %v3496_v11 }
 0x5b0   : > { %v7035_v50 = vpop.f32.mrf.mxu1  ;;  %v7037_v0 = vpop.f32.mrf.mxu0 }
 0x5b1   : > { %8812 = vst [vmem:[#allocation86_spill] sm:$0xff] %v7035_v50  ;;  %8813 = vst [vmem:[#allocation56_spill] sm:$0xff] %v7037_v0  ;;  %v2649_v28 = vmax.f32 %v7029_v33, %v7035_v50  ;;  %v3505_v50 = vmax.f32 %v7031_v27, %v7037_v0 }
 0x5b2   : > { %v7041_v36 = vpop.f32.mrf.mxu1  ;;  %v7043_v49 = vpop.f32.mrf.mxu0 }
 0x5b3   : > { %8814 = vst [vmem:[#allocation88_spill] sm:$0xff] %v7041_v36  ;;  %8815 = vst [vmem:[#allocation57_spill] sm:$0xff] %v7043_v49  ;;  %2650 = vmax.xlane.f32.xlu0 %v2649_v28  ;;  %3500 = vmax.xlane.f32.xlu1 %v3499_v9 }
 0x5b4   : > { %v7047_v46 = vpop.f32.mrf.mxu1  ;;  %v7049_v63 = vpop.f32.mrf.mxu0 }
 0x5b5   : > { %8816 = vst [vmem:[#allocation74_spill] sm:$0xff] %v7047_v46  ;;  %8817 = vst [vmem:[#allocation113_spill] sm:$0xff] %v7049_v63  ;;  %v2652_v11 = vmax.f32 %v7041_v36, %v7047_v46  ;;  %v3508_v46 = vmax.f32 %v7043_v49, %v7049_v63 }
 0x5b6   : > { %v7053_v58 = vpop.f32.mrf.mxu1  ;;  %v7055_v3 = vpop.f32.mrf.mxu0 }
 0x5b7   : > { %8818 = vst [vmem:[#allocation103_spill] sm:$0xff] %v7053_v58  ;;  %8819 = vst [vmem:[#allocation116_spill] sm:$0xff] %v7055_v3  ;;  %2653 = vmax.xlane.f32.xlu1 %v2652_v11  ;;  %3503 = vmax.xlane.f32.xlu0 %v3502_v16 }
 0x5b8   : > { %v7059_v33 = vpop.f32.mrf.mxu1  ;;  %v7061_v28 = vpop.f32.mrf.mxu0 }
 0x5b9   : > { %8820 = vst [vmem:[#allocation53_spill] sm:$0xff] %v7059_v33  ;;  %8821 = vst [vmem:[#allocation119_spill] sm:$0xff] %v7061_v28  ;;  %v2655_v9 = vmax.f32 %v7053_v58, %v7059_v33  ;;  %v3511_v33 = vmax.f32 %v7055_v3, %v7061_v28 }
 0x5ba   : > { %v7065_v53 = vpop.f32.mrf.mxu1  ;;  %v7067_v8 = vpop.f32.mrf.mxu0 }
 0x5bb   : > { %8822 = vst [vmem:[#allocation11_spill] sm:$0xff] %v7065_v53  ;;  %8823 = vst [vmem:[#allocation9_spill] sm:$0xff] %v7067_v8  ;;  %2656 = vmax.xlane.f32.xlu0 %v2655_v9  ;;  %3506 = vmax.xlane.f32.xlu1 %v3505_v50 }
 0x5bc   : > { %v7071_v36 = vpop.f32.mrf.mxu1  ;;  %v7073_v11 = vpop.f32.mrf.mxu0 }
 0x5bd   : > { %8824 = vst [vmem:[#allocation120_spill] sm:$0xff] %v7071_v36  ;;  %8825 = vst [vmem:[#allocation106_spill] sm:$0xff] %v7073_v11  ;;  %v2658_v16 = vmax.f32 %v7065_v53, %v7071_v36  ;;  %v3514_v36 = vmax.f32 %v7067_v8, %v7073_v11  ;;  %v3493_v8 = vmax.f32 %v6983_v4, %v6989_v15 }
 0x5be   : > { %v7077_v0 = vpop.f32.mrf.mxu1  ;;  %v7079_v27 = vpop.f32.mrf.mxu0 }
 0x5bf   : > { %8826 = vst [vmem:[#allocation115_spill] sm:$0xff] %v7077_v0  ;;  %8827 = vst [vmem:[#allocation15_spill] sm:$0xff] %v7079_v27  ;;  %2659 = vmax.xlane.f32.xlu1 %v2658_v16  ;;  %3509 = vmax.xlane.f32.xlu0 %v3508_v46 }
 0x5c0   : > { %v7083_v58 = vpop.f32.mrf.mxu1  ;;  %v7085_v9 = vpop.f32.mrf.mxu0 }
 0x5c1   : > { %8828 = vst [vmem:[#allocation13_spill] sm:$0xff] %v7083_v58  ;;  %8829 = vst [vmem:[#allocation121_spill] sm:$0xff] %v7085_v9  ;;  %v2661_v50 = vmax.f32 %v7077_v0, %v7083_v58  ;;  %v3517_v3 = vmax.f32 %v7079_v27, %v7085_v9 }
 0x5c2   : > { %v7089_v63 = vpop.f32.mrf.mxu1  ;;  %v7091_v49 = vpop.f32.mrf.mxu0 }
 0x5c3   : > { %8830 = vst [vmem:[#allocation114_spill] sm:$0xff] %v7089_v63  ;;  %8831 = vst [vmem:[#allocation122_spill] sm:$0xff] %v7091_v49  ;;  %2662 = vmax.xlane.f32.xlu0 %v2661_v50  ;;  %3512 = vmax.xlane.f32.xlu1 %v3511_v33  ;;  %v3490_v33 = vmax.f32 %v6971_v21, %v6975_v43 }
 0x5c4   : > { %v7095_v53 = vpop.f32.mrf.mxu1  ;;  %v7097_v16 = vpop.f32.mrf.mxu0 }
 0x5c5   : > { %8832 = vst [vmem:[#allocation90_spill] sm:$0xff] %v7095_v53  ;;  %8833 = vst [vmem:[#allocation118_spill] sm:$0xff] %v7097_v16  ;;  %v2664_v46 = vmax.f32 %v7089_v63, %v7095_v53  ;;  %v3520_v58 = vmax.f32 %v7091_v49, %v7097_v16 }
 0x5c6   : > { %v7101_v28 = vpop.f32.mrf.mxu0 }
 0x5c7   : > { %8834 = vst [vmem:[#allocation117_spill] sm:$0xff] %v7101_v28  ;;  %2665 = vmax.xlane.f32.xlu1 %v2664_v46  ;;  %3515 = vmax.xlane.f32.xlu0 %v3514_v36 }
 0x5c8   : > { %v7107_v11 = vpop.f32.mrf.mxu0 }
 0x5c9   : > { %8835 = vst [vmem:[#allocation96_spill] sm:$0xff] %v7107_v11  ;;  %v3523_v50 = vmax.f32 %v7101_v28, %v7107_v11 }
 0x5cb   : > { %3518 = vmax.xlane.f32.xlu1 %v3517_v3  ;;  %3521 = vmax.xlane.f32.xlu0 %v3520_v58 }
 0x5cf   : > { %3491 = vmax.xlane.f32.xlu0 %v3490_v33  ;;  %3524 = vmax.xlane.f32.xlu1 %v3523_v50 }
 0x5d3   : > { %3494 = vmax.xlane.f32.xlu1 %v3493_v8 }
 0x5e4   : > { %v7115_v36 = vpop.xlane.xlu0 %2584 }
 0x5e8   : > { %v7117_v46 = vpop.xlane.xlu1 %2587 }
 0x5ec   : > { %v7119_v9 = vpop.xlane.xlu0 %2590 }
 0x5f0   : > { %v7121_v27 = vpop.xlane.xlu1 %2593 }
 0x5f4   : > { %v7123_v43 = vpop.xlane.xlu0 %2596 }
 0x5f8   : > { %v7125_v58 = vpop.xlane.xlu0 %3449  ;;  %v7127_v3 = vpop.xlane.xlu1 %2599 }
 0x5fc   : > { %v2603_v21 = vpop.xlane.xlu0 %2602  ;;  %v7129_v11 = vpop.xlane.xlu1 %3452 }
 0x5fd   : > { %v2687_v33 = vsub.f32 %v6837_v42, %v2603_v21  ;;  %v2688_v8 = vsub.f32 %v6841_v22, %v2603_v21 }
 0x5ff   : > { %v2771_v50 = vmul.f32 1.442695, %v2687_v33  ;;  %v2773_v15 = vmul.f32 1.442695, %v2688_v8 }
 0x600   : > { %v7133_v4 = vpop.xlane.xlu0 %3455  ;;  %v2606_v28 = vpop.xlane.xlu1 %2605 }
 0x601   : > { %4662 = vpow2.f32 %v2771_v50  ;;  %v2689_v16 = vsub.f32 %v6849_v47, %v2606_v28  ;;  %v2690_v49 = vsub.f32 %v6853_v59, %v2606_v28 }
 0x602   : > { %4664 = vpow2.f32 %v2773_v15 }
 0x603   : > { %v2775_v53 = vmul.f32 1.442695, %v2689_v16  ;;  %v2777_v63 = vmul.f32 1.442695, %v2690_v49 }
 0x604   : > { %v2609_v0 = vpop.xlane.xlu0 %2608  ;;  %v7137_v12 = vpop.xlane.xlu1 %3458 }
 0x605   : > { %v2691_v42 = vsub.f32 %v6861_v13, %v2609_v0  ;;  %v2692_v21 = vsub.f32 %v6865_v55, %v2609_v0  ;;  %4666 = vpow2.f32 %v2775_v53 }
 0x606   : > { %4668 = vpow2.f32 %v2777_v63 }
 0x607   : > { %v2779_v22 = vmul.f32 1.442695, %v2691_v42  ;;  %v2781_v33 = vmul.f32 1.442695, %v2692_v21 }
 0x608   : > { %v3462_v8 = vpop.xlane.xlu0 %3461  ;;  %v2612_v50 = vpop.xlane.xlu1 %2611 }
 0x609   : > { %4670 = vpow2.f32 %v2779_v22  ;;  %v3546_v47 = vsub.f32 %v6851_v14, %v3462_v8  ;;  %v3547_v59 = vsub.f32 %v6855_v32, %v3462_v8  ;;  %v2693_v49 = vsub.f32 %v6873_v17, %v2612_v50 }
 0x60a   : > { %4672 = vpow2.f32 %v2781_v33  ;;  %v2694_v15 = vsub.f32 %v6877_v29, %v2612_v50 }
 0x60b   : > { %v3630_v28 = vmul.f32 1.442695, %v3546_v47  ;;  %v3632_v13 = vmul.f32 1.442695, %v3547_v59  ;;  %v2783_v16 = vmul.f32 1.442695, %v2693_v49 }
 0x60c   : > { %v2785_v55 = vmul.f32 1.442695, %v2694_v15  ;;  %v2615_v53 = vpop.xlane.xlu0 %2614  ;;  %v3465_v0 = vpop.xlane.xlu1 %3464 }
 0x60d   : > { %4674 = vpow2.f32 %v3630_v28  ;;  %v2695_v63 = vsub.f32 %v6885_v35, %v2615_v53  ;;  %v2696_v42 = vsub.f32 %v6889_v10, %v2615_v53  ;;  %v3548_v14 = vsub.f32 %v6863_v41, %v3465_v0 }
 0x60e   : > { %v7148_v21 = vpop.eup %4662  ;;  %4676 = vpow2.f32 %v3632_v13  ;;  %v3549_v32 = vsub.f32 %v6867_v57, %v3465_v0 }
 0x60f   : > { %8836 = vst [vmem:[#allocation91_spill] sm:$0xff] %v7148_v21  ;;  %v7151_v17 = vpop.eup %4664  ;;  %4678 = vpow2.f32 %v2783_v16  ;;  %v2787_v29 = vmul.f32 1.442695, %v2695_v63  ;;  %v2789_v22 = vmul.f32 1.442695, %v2696_v42 }
 0x610   : > { %v3634_v33 = vmul.f32 1.442695, %v3548_v14  ;;  %4680 = vpow2.f32 %v2785_v55  ;;  %v3636_v8 = vmul.f32 1.442695, %v3549_v32  ;;  %v3468_v50 = vpop.xlane.xlu0 %3467  ;;  %v2618_v47 = vpop.xlane.xlu1 %2617  ;;  %v2889_v35 = vadd.f32 %v7151_v17, %v7148_v21 }
 0x611   : > { %4682 = vpow2.f32 %v2787_v29  ;;  %v3550_v41 = vsub.f32 %v6875_v34, %v3468_v50  ;;  %v3551_v10 = vsub.f32 %v6879_v31, %v3468_v50  ;;  %v2697_v57 = vsub.f32 %v6897_v48, %v2618_v47 }
 0x612   : > { %4684 = vpow2.f32 %v2789_v22  ;;  %v2698_v59 = vsub.f32 %v6901_v2, %v2618_v47  ;;  %2890 = vadd.xlane.f32.xlu0 %v2889_v35  ;;  %v7159_v13 = vpop.eup %4666  ;;  %v2683_v35 = vsub.f32 %v6815_v1, %v7123_v43 }
 0x613   : > { %4686 = vpow2.f32 %v3634_v33  ;;  %v3638_v49 = vmul.f32 1.442695, %v3550_v41  ;;  %v3640_v15 = vmul.f32 1.442695, %v3551_v10  ;;  %v2791_v28 = vmul.f32 1.442695, %v2697_v57  ;;  %v7161_v0 = vpop.eup %4668 }
 0x614   : > { %8837 = vst [vmem:[#allocation93_spill] sm:$0xff] %v7159_v13  ;;  %4688 = vpow2.f32 %v3636_v8  ;;  %v2793_v16 = vmul.f32 1.442695, %v2698_v59  ;;  %v3474_v55 = vpop.xlane.xlu0 %3473  ;;  %v3471_v53 = vpop.xlane.xlu1 %3470  ;;  %v2892_v42 = vadd.f32 %v7161_v0, %v7159_v13  ;;  %v2684_v57 = vsub.f32 %v6819_v7, %v7123_v43 }
 0x615   : > { %4690 = vpow2.f32 %v3638_v49  ;;  %v3554_v34 = vsub.f32 %v6899_v30, %v3474_v55  ;;  %v3555_v31 = vsub.f32 %v6903_v24, %v3474_v55  ;;  %v3552_v2 = vsub.f32 %v6887_v25, %v3471_v53 }
 0x616   : > { %v7166_v48 = vpop.eup %4670  ;;  %4692 = vpow2.f32 %v3640_v15  ;;  %v3553_v63 = vsub.f32 %v6891_v5, %v3471_v53  ;;  %2893 = vadd.xlane.f32.xlu1 %v2892_v42  ;;  %v2763_v7 = vmul.f32 1.442695, %v2683_v35  ;;  %v3542_v43 = vsub.f32 %v6827_v6, %v7133_v4 }
 0x617   : > { %v7171_v14 = vpop.eup %4672  ;;  %4694 = vpow2.f32 %v2791_v28  ;;  %v3646_v32 = vmul.f32 1.442695, %v3554_v34  ;;  %v3648_v29 = vmul.f32 1.442695, %v3555_v31  ;;  %v3642_v22 = vmul.f32 1.442695, %v3552_v2 }
 0x618   : > { %4696 = vpow2.f32 %v2793_v16  ;;  %v3644_v30 = vmul.f32 1.442695, %v3553_v63  ;;  %v7173_v24 = vpop.xlane.xlu0 %3443  ;;  %v3477_v25 = vpop.xlane.xlu1 %3476  ;;  %v2895_v33 = vadd.f32 %v7171_v14, %v7166_v48  ;;  %v2765_v53 = vmul.f32 1.442695, %v2684_v57 }
 0x619   : > { %4698 = vpow2.f32 %v3646_v32  ;;  %v3556_v5 = vsub.f32 %v6911_v56, %v3477_v25  ;;  %v3557_v50 = vsub.f32 %v6915_v52, %v3477_v25  ;;  %v3543_v34 = vsub.f32 %v6831_v19, %v7133_v4 }
 0x61a   : > { %v7178_v8 = vpop.eup %4674  ;;  %4700 = vpow2.f32 %v3648_v29  ;;  %2896 = vadd.xlane.f32.xlu0 %v2895_v33  ;;  %v2685_v6 = vsub.f32 %v6825_v38, %v7127_v3  ;;  %v2686_v29 = vsub.f32 %v6829_v20, %v7127_v3  ;;  %v3545_v57 = vsub.f32 %v6843_v54, %v7137_v12 }
 0x61b   : > { %8838 = vst [vmem:[#allocation10_spill] sm:$0xff] %v7178_v8  ;;  %v7181_v47 = vpop.eup %4676  ;;  %4702 = vpow2.f32 %v3642_v22  ;;  %v3650_v41 = vmul.f32 1.442695, %v3556_v5  ;;  %v3652_v56 = vmul.f32 1.442695, %v3557_v50  ;;  %v3544_v50 = vsub.f32 %v6839_v39, %v7137_v12 }
 0x61c   : > { %8839 = vst [vmem:[#allocation12_spill] sm:$0xff] %v7181_v47  ;;  %v7185_v10 = vpop.eup %4678  ;;  %4704 = vpow2.f32 %v3644_v30  ;;  %v7189_v59 = vpop.xlane.xlu0 %2578  ;;  %v3748_v52 = vadd.f32 %v7181_v47, %v7178_v8  ;;  %v3622_v22 = vmul.f32 1.442695, %v3542_v43  ;;  %v3624_v25 = vmul.f32 1.442695, %v3543_v34 }
 0x61d   : > { %v7191_v49 = vpop.xlane.xlu1 %3446  ;;  %v7195_v15 = vpop.eup %4680  ;;  %4706 = vpow2.f32 %v3650_v41  ;;  %v2767_v5 = vmul.f32 1.442695, %v2685_v6  ;;  %v2769_v41 = vmul.f32 1.442695, %v2686_v29  ;;  %v3626_v12 = vmul.f32 1.442695, %v3544_v50 }
 0x61e   : > { %v7197_v28 = vpop.eup %4682  ;;  %3749 = vadd.xlane.f32.xlu0 %v3748_v52  ;;  %v2898_v1 = vadd.f32 %v7195_v15, %v7185_v10  ;;  %4708 = vpow2.f32 %v3652_v56  ;;  %v3628_v54 = vmul.f32 1.442695, %v3545_v57  ;;  %v2625_v29 = vmax.f32 %v6933_v62, %v6937_v44 }
 0x61f   : > { %v7201_v16 = vpop.eup %4684  ;;  %4710 = vpow2.f32 %v2763_v7 }
 0x620   : > { %v7205_v55 = vpop.eup %4686  ;;  %2899 = vadd.xlane.f32.xlu1 %v2898_v1  ;;  %v7209_v31 = vpop.xlane.xlu0 %3437  ;;  %v2901_v63 = vadd.f32 %v7201_v16, %v7197_v28  ;;  %4712 = vpow2.f32 %v2765_v53 }
 0x621   : > { %8840 = vst [vmem:[#allocation110_spill] sm:$0xff] %v7205_v55  ;;  %v7211_v2 = vpop.xlane.xlu1 %2581  ;;  %v7215_v42 = vpop.eup %4688  ;;  %4714 = vpow2.f32 %v3622_v22 }
 0x622   : > { %8841 = vst [vmem:[#allocation111_spill] sm:$0xff] %v7215_v42  ;;  %v7219_v32 = vpop.eup %4690  ;;  %2902 = vadd.xlane.f32.xlu0 %v2901_v63  ;;  %v3751_v4 = vadd.f32 %v7215_v42, %v7205_v55  ;;  %4716 = vpow2.f32 %v3624_v25  ;;  %v2679_v63 = vsub.f32 %v6795_v18, %v7119_v9  ;;  %v8850_v18 = vld [vmem:[#allocation124_spill] sm:$0xff]  ;;  %v2628_v55 = vmax.f32 %v6945_v37, %v6949_v45 }
 0x623   : > { %8842 = vst [vmem:[#allocation109_spill] sm:$0xff] %v7219_v32  ;;  %v7225_v19 = vpop.eup %4692  ;;  %4718 = vpow2.f32 %v2767_v5  ;;  %v8849_v5 = vld [vmem:[#allocation126_spill] sm:$0xff] }
 0x624   : > { %8843 = vst [vmem:[#allocation85_spill] sm:$0xff] %v7225_v19  ;;  %v7227_v30 = vpop.eup %4694  ;;  %3752 = vadd.xlane.f32.xlu1 %v3751_v4  ;;  %v7229_v33 = vpop.xlane.xlu0 %2572  ;;  %v3754_v20 = vadd.f32 %v7225_v19, %v7219_v32  ;;  %4720 = vpow2.f32 %v2769_v41  ;;  %v2680_v4 = vsub.f32 %v6799_v60, %v7119_v9  ;;  %v2675_v50 = vsub.f32 %v8849_v5, %v7115_v36  ;;  %v8851_v9 = vld [vmem:[#allocation125_spill] sm:$0xff] }
 0x625   : > { %v7231_v38 = vpop.xlane.xlu1 %3440  ;;  %v7235_v3 = vpop.eup %4696  ;;  %4722 = vpow2.f32 %v3626_v12  ;;  %v2676_v41 = vsub.f32 %v8850_v18, %v7115_v36  ;;  %v2755_v60 = vmul.f32 1.442695, %v2679_v63  ;;  %v8853_v12 = vld [vmem:[#allocation84_spill] sm:$0xff]  ;;  %v8855_v18 = vld [vmem:[#allocation134_spill] sm:$0xff] }
 0x626   : > { %v7239_v35 = vpop.eup %4698  ;;  %3755 = vadd.xlane.f32.xlu0 %v3754_v20  ;;  %v2904_v56 = vadd.f32 %v7235_v3, %v7227_v30  ;;  %4724 = vpow2.f32 %v3628_v54  ;;  %v2757_v8 = vmul.f32 1.442695, %v2680_v4  ;;  %v3539_v5 = vsub.f32 %v8853_v12, %v7125_v58  ;;  %v8856_v4 = vld [vmem:[#allocation82_spill] sm:$0xff] }
 0x627   : > { %8844 = vst [vmem:[#allocation83_spill] sm:$0xff] %v7239_v35  ;;  %v7245_v52 = vpop.eup %4700  ;;  %v2747_v63 = vmul.f32 1.442695, %v2675_v50  ;;  %v2749_v47 = vmul.f32 1.442695, %v2676_v41  ;;  %v2682_v32 = vsub.f32 %v8856_v4, %v7121_v27  ;;  %4726 = vpow2.f32 %v2755_v60  ;;  %v8859_v50 = vld [vmem:[#allocation52_spill] sm:$0xff] }
 0x628   : > { %v7247_v1 = vpop.eup %4702  ;;  %2905 = vadd.xlane.f32.xlu1 %v2904_v56  ;;  %v7249_v7 = vpop.xlane.xlu0 %3431  ;;  %v3760_v43 = vadd.f32 %v7245_v52, %v7239_v35  ;;  %v3538_v56 = vsub.f32 %v8851_v9, %v7125_v58  ;;  %v2681_v9 = vsub.f32 %v8855_v18, %v7121_v27  ;;  %v8857_v58 = vld [vmem:[#allocation68_spill] sm:$0xff]  ;;  %v2678_v42 = vsub.f32 %v8859_v50, %v7117_v46  ;;  %v8898_v35 = vld [vmem:[#allocation101_spill] sm:$0xff] }
 0x629   : > { %8845 = vst [vmem:[#allocation87_spill] sm:$0xff] %v7247_v1  ;;  %v7251_v39 = vpop.xlane.xlu1 %2575  ;;  %v7255_v53 = vpop.eup %4704  ;;  %4728 = vpow2.f32 %v2757_v8  ;;  %v3616_v18 = vmul.f32 1.442695, %v3539_v5  ;;  %v2761_v8 = vmul.f32 1.442695, %v2682_v32 }
 0x62a   : > { %8846 = vst [vmem:[#allocation38_spill] sm:$0xff] %v7255_v53  ;;  %3761 = vadd.xlane.f32.xlu0 %v3760_v43  ;;  %v3757_v34 = vadd.f32 %v7255_v53, %v7247_v1  ;;  %v7261_v6 = vpop.eup %4706  ;;  %v3614_v12 = vmul.f32 1.442695, %v3538_v56  ;;  %4730 = vpow2.f32 %v2747_v63  ;;  %v2759_v60 = vmul.f32 1.442695, %v2681_v9  ;;  %v8861_v56 = vld [vmem:[#allocation123_spill] sm:$0xff] }
 0x62b   : > { %8847 = vst [vmem:[#allocation112_spill] sm:$0xff] %v7261_v6  ;;  %v7271_v20 = vpop.eup %4708  ;;  %v3540_v4 = vsub.f32 %v8861_v56, %v7129_v11  ;;  %4732 = vpow2.f32 %v2749_v47  ;;  %v3534_v63 = vsub.f32 %v6787_v40, %v7173_v24  ;;  %v2753_v9 = vmul.f32 1.442695, %v2678_v42  ;;  %v8865_v56 = vld [vmem:[#allocation71_spill] sm:$0xff]  ;;  %v8868_v42 = vld [vmem:[#allocation77_spill] sm:$0xff]  ;;  %v8889_v53 = vld [vmem:[#allocation128_spill] sm:$0xff] }
 0x62c   : > { %3758 = vadd.xlane.f32.xlu1 %v3757_v34  ;;  %v7267_v22 = vpop.xlane.xlu0 %2632  ;;  %8848 = vst [vmem:[#allocation14_spill] sm:$0xff] %v7271_v20  ;;  %v3763_v57 = vadd.f32 %v7271_v20, %v7261_v6  ;;  %v7281_v43 = vpop.eup %4710  ;;  %v3484_v34 = vmax.f32 %v6947_v61, %v6951_v51  ;;  %4734 = vpow2.f32 %v3614_v12 }
 0x62d   : > { %v7269_v25 = vpop.xlane.xlu1 %3434  ;;  %8852 = vst [vmem:[#allocation16_spill] sm:$0xff] %v7281_v43  ;;  %4736 = vpow2.f32 %v3616_v18  ;;  %v3618_v32 = vmul.f32 1.442695, %v3540_v4 }
 0x62e   : > { %2626 = vmax.xlane.f32.xlu0 %v2625_v29  ;;  %v7291_v29 = vpop.eup %4712  ;;  %4738 = vpow2.f32 %v2759_v60  ;;  %v8870_v60 = vld [vmem:[#allocation66_spill] sm:$0xff] }
 0x62f   : > { %8854 = vst [vmem:[#allocation104_spill] sm:$0xff] %v7291_v29  ;;  %v7301_v21 = vpop.eup %4714  ;;  %v2883_v27 = vadd.f32 %v7291_v29, %v7281_v43  ;;  %v3535_v29 = vsub.f32 %v8865_v56, %v7173_v24  ;;  %4740 = vpow2.f32 %v2761_v8  ;;  %v2672_v24 = vsub.f32 %v8868_v42, %v7189_v59  ;;  %v8871_v56 = vld [vmem:[#allocation132_spill] sm:$0xff] }
 0x630   : > { %3764 = vadd.xlane.f32.xlu1 %v3763_v57  ;;  %v7287_v36 = vpop.xlane.xlu0 %2638  ;;  %v2677_v57 = vsub.f32 %v8857_v58, %v7117_v46  ;;  %8858 = vst [vmem:[#allocation78_spill] sm:$0xff] %v7301_v21  ;;  %v3487_v46 = vmax.f32 %v6959_v26, %v6963_v23  ;;  %v3536_v4 = vsub.f32 %v8870_v60, %v7191_v49 }
 0x631   : > { %v7289_v54 = vpop.xlane.xlu1 %2635  ;;  %v3608_v8 = vmul.f32 1.442695, %v3535_v29  ;;  %v2741_v60 = vmul.f32 1.442695, %v2672_v24  ;;  %v8880_v24 = vld [vmem:[#allocation98_spill] sm:$0xff] }
 0x632   : > { %3485 = vmax.xlane.f32.xlu0 %v3484_v34  ;;  %v7311_v34 = vpop.eup %4716  ;;  %v2751_v43 = vmul.f32 1.442695, %v2677_v57  ;;  %v8866_v57 = vld [vmem:[#allocation102_spill] sm:$0xff] }
 0x633   : > { %8860 = vst [vmem:[#allocation89_spill] sm:$0xff] %v7311_v34  ;;  %v7315_v58 = vpop.eup %4718  ;;  %v2671_v12 = vsub.f32 %v8866_v57, %v7189_v59  ;;  %v8872_v57 = vld [vmem:[#allocation51_spill] sm:$0xff] }
 0x634   : > { %2629 = vmax.xlane.f32.xlu1 %v2628_v55  ;;  %v7305_v1 = vpop.xlane.xlu0 %2644  ;;  %8862 = vst [vmem:[#allocation105_spill] sm:$0xff] %v7315_v58  ;;  %v8863_v55 = vld [vmem:[#allocation69_spill] sm:$0xff]  ;;  %v7321_v50 = vpop.eup %4720  ;;  %4742 = vpow2.f32 %v2751_v43 }
 0x635   : > { %v7307_v41 = vpop.xlane.xlu1 %2641  ;;  %v3541_v5 = vsub.f32 %v8863_v55, %v7129_v11  ;;  %8864 = vst [vmem:[#allocation17_spill] sm:$0xff] %v7321_v50  ;;  %v3742_v11 = vadd.f32 %v7311_v34, %v7301_v21  ;;  %v2886_v18 = vadd.f32 %v7321_v50, %v7315_v58  ;;  %v3606_v55 = vmul.f32 1.442695, %v3534_v63  ;;  %v8874_v43 = vld [vmem:[#allocation97_spill] sm:$0xff]  ;;  %v8875_v58 = vld [vmem:[#allocation92_spill] sm:$0xff] }
 0x636   : > { %2884 = vadd.xlane.f32.xlu0 %v2883_v27  ;;  %v7335_v27 = vpop.eup %4722  ;;  %v2619_v21 = vmax.f32 %v8872_v57, %v8871_v56  ;;  %4744 = vpow2.f32 %v2753_v9  ;;  %v2739_v42 = vmul.f32 1.442695, %v2671_v12  ;;  %v3530_v63 = vsub.f32 %v8874_v43, %v7209_v31  ;;  %v8876_v9 = vld [vmem:[#allocation95_spill] sm:$0xff]  ;;  %v8879_v12 = vld [vmem:[#allocation130_spill] sm:$0xff] }
 0x637   : > { %8867 = vst [vmem:[#allocation20_spill] sm:$0xff] %v7335_v27  ;;  %v3620_v40 = vmul.f32 1.442695, %v3541_v5  ;;  %v8873_v5 = vld [vmem:[#allocation47_spill] sm:$0xff]  ;;  %4746 = vpow2.f32 %v3618_v32  ;;  %v3531_v50 = vsub.f32 %v8875_v58, %v7209_v31  ;;  %v8878_v32 = vld [vmem:[#allocation61_spill] sm:$0xff]  ;;  %v2674_v43 = vsub.f32 %v8880_v24, %v7211_v2 }
 0x638   : > { %3488 = vmax.xlane.f32.xlu1 %v3487_v46  ;;  %v7327_v13 = vpop.xlane.xlu0 %3497  ;;  %v7341_v46 = vpop.eup %4724  ;;  %v3537_v34 = vsub.f32 %v8873_v5, %v7191_v49  ;;  %v3610_v49 = vmul.f32 1.442695, %v3536_v4  ;;  %v3478_v19 = vmax.f32 %v8879_v12, %v8878_v32  ;;  %v8887_v24 = vld [vmem:[#allocation81_spill] sm:$0xff] }
 0x639   : > { %v7329_v47 = vpop.xlane.xlu1 %2647  ;;  %8869 = vst [vmem:[#allocation21_spill] sm:$0xff] %v7341_v46  ;;  %4748 = vpow2.f32 %v3620_v40  ;;  %v3745_v29 = vadd.f32 %v7341_v46, %v7335_v27  ;;  %v7361_v5 = vpop.eup %4726  ;;  %v8884_v27 = vld [vmem:[#allocation133_spill] sm:$0xff]  ;;  %v2668_v12 = vsub.f32 %v8887_v24, %v7229_v33 }
 0x63a   : > { %3743 = vadd.xlane.f32.xlu0 %v3742_v11  ;;  %4750 = vpow2.f32 %v3606_v55  ;;  %8877 = vst [vmem:[#allocation24_spill] sm:$0xff] %v7361_v5  ;;  %v3612_v40 = vmul.f32 1.442695, %v3537_v34  ;;  %v7371_v58 = vpop.eup %4728  ;;  %v3598_v55 = vmul.f32 1.442695, %v3530_v63  ;;  %v8885_v34 = vld [vmem:[#allocation80_spill] sm:$0xff] }
 0x63b   : > { %4752 = vpow2.f32 %v3608_v8  ;;  %8881 = vst [vmem:[#allocation108_spill] sm:$0xff] %v7371_v58  ;;  %v7373_v4 = vpop.eup %4730  ;;  %v3600_v8 = vmul.f32 1.442695, %v3531_v50  ;;  %v2667_v32 = vsub.f32 %v8885_v34, %v7229_v33  ;;  %v2745_v63 = vmul.f32 1.442695, %v2674_v43  ;;  %v8892_v33 = vld [vmem:[#allocation60_spill] sm:$0xff] }
 0x63c   : > { %2887 = vadd.xlane.f32.xlu1 %v2886_v18  ;;  %v7349_v59 = vpop.xlane.xlu0 %2650  ;;  %v2673_v18 = vsub.f32 %v8876_v9, %v7211_v2  ;;  %4754 = vpow2.f32 %v2739_v42  ;;  %8882 = vst [vmem:[#allocation79_spill] sm:$0xff] %v7373_v4  ;;  %v8883_v9 = vld [vmem:[#allocation48_spill] sm:$0xff]  ;;  %v7379_v2 = vpop.eup %4732  ;;  %v8893_v34 = vld [vmem:[#allocation70_spill] sm:$0xff] }
 0x63d   : > { %v7351_v11 = vpop.xlane.xlu1 %3500  ;;  %v2622_v46 = vmax.f32 %v8884_v27, %v8883_v9  ;;  %4756 = vpow2.f32 %v2741_v60  ;;  %8886 = vst [vmem:[#allocation107_spill] sm:$0xff] %v7379_v2  ;;  %v7383_v42 = vpop.eup %4734  ;;  %v3532_v9 = vsub.f32 %v8889_v53, %v7231_v38  ;;  %v2731_v43 = vmul.f32 1.442695, %v2667_v32  ;;  %v8894_v53 = vld [vmem:[#allocation127_spill] sm:$0xff] }
 0x63e   : > { %2620 = vmax.xlane.f32.xlu0 %v2619_v21  ;;  %4758 = vpow2.f32 %v3610_v49  ;;  %8888 = vst [vmem:[#allocation26_spill] sm:$0xff] %v7383_v42  ;;  %v7393_v49 = vpop.eup %4736  ;;  %v2733_v27 = vmul.f32 1.442695, %v2668_v12  ;;  %v8900_v12 = vld [vmem:[#allocation99_spill] sm:$0xff] }
 0x63f   : > { %4760 = vpow2.f32 %v3612_v40  ;;  %8890 = vst [vmem:[#allocation25_spill] sm:$0xff] %v7393_v49  ;;  %v3481_v40 = vmax.f32 %v8893_v34, %v8892_v33  ;;  %v3527_v33 = vsub.f32 %v8898_v35, %v7249_v7 }
 0x640   : > { %3746 = vadd.xlane.f32.xlu1 %v3745_v29  ;;  %v7367_v21 = vpop.xlane.xlu0 %3503  ;;  %v2743_v29 = vmul.f32 1.442695, %v2673_v18  ;;  %4762 = vpow2.f32 %v3598_v55  ;;  %v7395_v18 = vpop.eup %4738  ;;  %v3602_v55 = vmul.f32 1.442695, %v3532_v9 }
 0x641   : > { %v7369_v31 = vpop.xlane.xlu1 %2653  ;;  %8891 = vst [vmem:[#allocation19_spill] sm:$0xff] %v7395_v18  ;;  %4764 = vpow2.f32 %v3600_v8  ;;  %v7401_v24 = vpop.eup %4740 }
 0x642   : > { %3479 = vmax.xlane.f32.xlu0 %v3478_v19  ;;  %v2877_v19 = vadd.f32 %v7371_v58, %v7361_v5  ;;  %8895 = vst [vmem:[#allocation18_spill] sm:$0xff] %v7401_v24  ;;  %4766 = vpow2.f32 %v2743_v29  ;;  %v8896_v5 = vld [vmem:[#allocation100_spill] sm:$0xff]  ;;  %v7405_v6 = vpop.eup %4742 }
 0x643   : > { %v3526_v58 = vsub.f32 %v8896_v5, %v7249_v7  ;;  %8897 = vst [vmem:[#allocation28_spill] sm:$0xff] %v7405_v6  ;;  %4768 = vpow2.f32 %v2745_v63  ;;  %v7415_v29 = vpop.eup %4744  ;;  %v2669_v5 = vsub.f32 %v8900_v12, %v7251_v39  ;;  %v8902_v63 = vld [vmem:[#allocation75_spill] sm:$0xff]  ;;  %v2880_v7 = vadd.f32 %v7401_v24, %v7395_v18 }
 0x644   : > { %2623 = vmax.xlane.f32.xlu1 %v2622_v46  ;;  %v7387_v50 = vpop.xlane.xlu0 %2656  ;;  %v3533_v46 = vsub.f32 %v8894_v53, %v7231_v38  ;;  %v3736_v38 = vadd.f32 %v7393_v49, %v7383_v42  ;;  %8899 = vst [vmem:[#allocation27_spill] sm:$0xff] %v7415_v29  ;;  %4770 = vpow2.f32 %v2731_v43  ;;  %v2670_v35 = vsub.f32 %v8902_v63, %v7251_v39  ;;  %v8907_v18 = vld [vmem:[#allocation115_spill] sm:$0xff] }
 0x645   : > { %v7389_v60 = vpop.xlane.xlu1 %3506  ;;  %4772 = vpow2.f32 %v2733_v27  ;;  %v3590_v53 = vmul.f32 1.442695, %v3526_v58  ;;  %v3592_v49 = vmul.f32 1.442695, %v3527_v33  ;;  %v2871_v43 = vadd.f32 %v7379_v2, %v7373_v4  ;;  %v8908_v58 = vld [vmem:[#allocation13_spill] sm:$0xff] }
 0x646   : > { %2878 = vadd.xlane.f32.xlu0 %v2877_v19  ;;  %v7419_v19 = vpop.eup %4746  ;;  %v3604_v9 = vmul.f32 1.442695, %v3533_v46  ;;  %4774 = vpow2.f32 %v3602_v55  ;;  %v2735_v46 = vmul.f32 1.442695, %v2669_v5  ;;  %v2737_v33 = vmul.f32 1.442695, %v2670_v35 }
 0x647   : > { %8901 = vst [vmem:[#allocation23_spill] sm:$0xff] %v7419_v19  ;;  %v8910_v55 = vld [vmem:[#allocation94_spill] sm:$0xff] }
 0x648   : > { %3482 = vmax.xlane.f32.xlu1 %v3481_v40  ;;  %v7409_v32 = vpop.xlane.xlu0 %3509  ;;  %v7425_v40 = vpop.eup %4748  ;;  %4776 = vpow2.f32 %v3604_v9 }
 0x649   : > { %v7411_v8 = vpop.xlane.xlu1 %2659  ;;  %8903 = vst [vmem:[#allocation22_spill] sm:$0xff] %v7425_v40  ;;  %v7427_v42 = vpop.eup %4750  ;;  %v3739_v4 = vadd.f32 %v7425_v40, %v7419_v19  ;;  %4778 = vpow2.f32 %v3590_v53 }
 0x64a   : > { %3737 = vadd.xlane.f32.xlu0 %v3736_v38  ;;  %8904 = vst [vmem:[#allocation30_spill] sm:$0xff] %v7427_v42  ;;  %v7433_v39 = vpop.eup %4752  ;;  %v8906_v38 = vld [vmem:[#allocation76_spill] sm:$0xff]  ;;  %4780 = vpow2.f32 %v3592_v49 }
 0x64b   : > { %8905 = vst [vmem:[#allocation32_spill] sm:$0xff] %v7433_v39  ;;  %v3528_v63 = vsub.f32 %v8906_v38, %v7269_v25  ;;  %v7439_v20 = vpop.eup %4754  ;;  %v3730_v9 = vadd.f32 %v7433_v39, %v7427_v42  ;;  %4782 = vpow2.f32 %v2735_v46 }
 0x64c   : > { %2881 = vadd.xlane.f32.xlu1 %v2880_v7  ;;  %v2663_v12 = vpop.xlane.xlu0 %2662  ;;  %8909 = vst [vmem:[#allocation34_spill] sm:$0xff] %v7439_v20  ;;  %v3529_v7 = vsub.f32 %v8910_v55, %v7269_v25  ;;  %v7445_v2 = vpop.eup %4756  ;;  %4784 = vpow2.f32 %v2737_v33 }
 0x64d   : > { %v7429_v34 = vpop.xlane.xlu1 %3512  ;;  %v2727_v27 = vsub.f32 %v8907_v18, %v2663_v12  ;;  %v2728_v24 = vsub.f32 %v8908_v58, %v2663_v12  ;;  %8911 = vst [vmem:[#allocation36_spill] sm:$0xff] %v7445_v2  ;;  %v7447_v38 = vpop.eup %4758  ;;  %v3594_v25 = vmul.f32 1.442695, %v3528_v63 }
 0x64e   : > { %2872 = vadd.xlane.f32.xlu0 %v2871_v43  ;;  %v7451_v35 = vpop.eup %4760  ;;  %v8912_v43 = vld [vmem:[#allocation114_spill] sm:$0xff]  ;;  %v3596_v53 = vmul.f32 1.442695, %v3529_v7 }
 0x64f   : > { %v2851_v5 = vmul.f32 1.442695, %v2727_v27  ;;  %v2853_v18 = vmul.f32 1.442695, %v2728_v24  ;;  %v7454_v19 = vpop.eup %4762  ;;  %v8914_v27 = vld [vmem:[#allocation90_spill] sm:$0xff]  ;;  %v8916_v24 = vld [vmem:[#allocation103_spill] sm:$0xff] }
 0x650   : > { %3740 = vadd.xlane.f32.xlu1 %v3739_v4  ;;  %v3516_v12 = vpop.xlane.xlu0 %3515  ;;  %8913 = vst [vmem:[#allocation126_spill] sm:$0xff] %v7454_v19  ;;  %v2874_v4 = vadd.f32 %v7415_v29, %v7405_v6  ;;  %v7459_v49 = vpop.eup %4764  ;;  %v2723_v42 = vsub.f32 %v8916_v24, %v7387_v50  ;;  %v8920_v24 = vld [vmem:[#allocation9_spill] sm:$0xff]  ;;  %v8922_v29 = vld [vmem:[#allocation118_spill] sm:$0xff] }
 0x651   : > { %v2666_v58 = vpop.xlane.xlu1 %2665  ;;  %8915 = vst [vmem:[#allocation124_spill] sm:$0xff] %v7459_v49  ;;  %4786 = vpow2.f32 %v2851_v5  ;;  %v7463_v63 = vpop.eup %4766  ;;  %v3582_v5 = vsub.f32 %v8920_v24, %v3516_v12 }
 0x652   : > { %v2729_v55 = vsub.f32 %v8912_v43, %v2666_v58  ;;  %v2730_v40 = vsub.f32 %v8914_v27, %v2666_v58  ;;  %3731 = vadd.xlane.f32.xlu0 %v3730_v9  ;;  %8917 = vst [vmem:[#allocation125_spill] sm:$0xff] %v7463_v63  ;;  %v8918_v43 = vld [vmem:[#allocation53_spill] sm:$0xff]  ;;  %4788 = vpow2.f32 %v2853_v18  ;;  %v2865_v9 = vadd.f32 %v7445_v2, %v7439_v20  ;;  %v7471_v27 = vpop.eup %4768 }
 0x653   : > { %v2724_v39 = vsub.f32 %v8918_v43, %v7387_v50  ;;  %8919 = vst [vmem:[#allocation84_spill] sm:$0xff] %v7471_v27  ;;  %4790 = vpow2.f32 %v3594_v25  ;;  %v8923_v50 = vld [vmem:[#allocation106_spill] sm:$0xff]  ;;  %v2843_v43 = vmul.f32 1.442695, %v2723_v42 }
 0x654   : > { %v2855_v46 = vmul.f32 1.442695, %v2729_v55  ;;  %v2857_v33 = vmul.f32 1.442695, %v2730_v40  ;;  %2875 = vadd.xlane.f32.xlu1 %v2874_v4  ;;  %v3522_v7 = vpop.xlane.xlu0 %3521  ;;  %v8921_v55 = vld [vmem:[#allocation122_spill] sm:$0xff]  ;;  %4792 = vpow2.f32 %v3596_v53  ;;  %v3583_v18 = vsub.f32 %v8923_v50, %v3516_v12  ;;  %v7479_v4 = vpop.eup %4770  ;;  %v8928_v50 = vld [vmem:[#allocation96_spill] sm:$0xff] }
 0x655   : > { %v7467_v58 = vpop.xlane.xlu1 %3518  ;;  %v3586_v6 = vsub.f32 %v8921_v55, %v3522_v7  ;;  %v3587_v56 = vsub.f32 %v8922_v29, %v3522_v7  ;;  %v3733_v40 = vadd.f32 %v7451_v35, %v7447_v38  ;;  %8924 = vst [vmem:[#allocation134_spill] sm:$0xff] %v7479_v4  ;;  %v7481_v25 = vpop.eup %4772  ;;  %v2845_v24 = vmul.f32 1.442695, %v2724_v39  ;;  %v8925_v7 = vld [vmem:[#allocation11_spill] sm:$0xff]  ;;  %v8927_v39 = vld [vmem:[#allocation120_spill] sm:$0xff] }
 0x656   : > { %2866 = vadd.xlane.f32.xlu0 %v2865_v9  ;;  %4794 = vpow2.f32 %v2855_v46  ;;  %v3724_v29 = vadd.f32 %v7459_v49, %v7454_v19  ;;  %v2868_v12 = vadd.f32 %v7471_v27, %v7463_v63  ;;  %v7487_v53 = vpop.eup %4774  ;;  %v2725_v42 = vsub.f32 %v8925_v7, %v7411_v8  ;;  %v8929_v49 = vld [vmem:[#allocation67_spill] sm:$0xff] }
 0x657   : > { %v3710_v20 = vmul.f32 1.442695, %v3586_v6  ;;  %v3712_v2 = vmul.f32 1.442695, %v3587_v56  ;;  %4796 = vpow2.f32 %v2857_v33  ;;  %v3702_v46 = vmul.f32 1.442695, %v3582_v5  ;;  %v7495_v19 = vpop.eup %4776 }
 0x658   : > { %3734 = vadd.xlane.f32.xlu1 %v3733_v40  ;;  %v8926_v6 = vld [vmem:[#allocation117_spill] sm:$0xff]  ;;  %v2726_v33 = vsub.f32 %v8927_v39, %v7411_v8  ;;  %v3704_v9 = vmul.f32 1.442695, %v3583_v18  ;;  %v2719_v63 = vsub.f32 %v8929_v49, %v7349_v59  ;;  %v7499_v7 = vpop.eup %4778  ;;  %v2847_v18 = vmul.f32 1.442695, %v2725_v42 }
 0x659   : > { %v3525_v55 = vpop.xlane.xlu1 %3524  ;;  %4798 = vpow2.f32 %v3710_v20  ;;  %8930 = vst [vmem:[#allocation82_spill] sm:$0xff] %v7499_v7  ;;  %v8931_v20 = vld [vmem:[#allocation86_spill] sm:$0xff]  ;;  %v7505_v8 = vpop.eup %4780  ;;  %v8935_v42 = vld [vmem:[#allocation57_spill] sm:$0xff] }
 0x65a   : > { %v3588_v56 = vsub.f32 %v8926_v6, %v3525_v55  ;;  %4800 = vpow2.f32 %v3712_v2  ;;  %v3589_v40 = vsub.f32 %v8928_v50, %v3525_v55  ;;  %3725 = vadd.xlane.f32.xlu0 %v3724_v29  ;;  %v2720_v5 = vsub.f32 %v8931_v20, %v7349_v59  ;;  %8932 = vst [vmem:[#allocation68_spill] sm:$0xff] %v7505_v8  ;;  %v8933_v55 = vld [vmem:[#allocation15_spill] sm:$0xff] }
 0x65b   : > { %4802 = vpow2.f32 %v2843_v43  ;;  %v2859_v2 = vadd.f32 %v7481_v25, %v7479_v4  ;;  %v3584_v49 = vsub.f32 %v8933_v55, %v7467_v58  ;;  %v7509_v43 = vpop.eup %4782  ;;  %v2849_v29 = vmul.f32 1.442695, %v2726_v33  ;;  %v8937_v33 = vld [vmem:[#allocation113_spill] sm:$0xff] }
 0x65c   : > { %v3714_v27 = vmul.f32 1.442695, %v3588_v56  ;;  %4804 = vpow2.f32 %v2845_v24  ;;  %v3716_v6 = vmul.f32 1.442695, %v3589_v40  ;;  %2869 = vadd.xlane.f32.xlu1 %v2868_v12  ;;  %v8934_v56 = vld [vmem:[#allocation121_spill] sm:$0xff]  ;;  %v3727_v24 = vadd.f32 %v7495_v19, %v7487_v53  ;;  %v7515_v12 = vpop.eup %4784 }
 0x65d   : > { %4806 = vpow2.f32 %v3702_v46  ;;  %v3585_v59 = vsub.f32 %v8934_v56, %v7467_v58  ;;  %v2835_v39 = vmul.f32 1.442695, %v2719_v63  ;;  %v3578_v46 = vsub.f32 %v8935_v42, %v7409_v32 }
 0x65e   : > { %4808 = vpow2.f32 %v3704_v9  ;;  %2860 = vadd.xlane.f32.xlu0 %v2859_v2  ;;  %v7519_v50 = vpop.eup %4786  ;;  %v2837_v40 = vmul.f32 1.442695, %v2720_v5  ;;  %v3579_v9 = vsub.f32 %v8937_v33, %v7409_v32  ;;  %v3718_v58 = vadd.f32 %v7505_v8, %v7499_v7  ;;  %v8938_v2 = vld [vmem:[#allocation88_spill] sm:$0xff] }
 0x65f   : > { %4810 = vpow2.f32 %v3714_v27  ;;  %8936 = vst [vmem:[#allocation52_spill] sm:$0xff] %v7519_v50  ;;  %v7525_v20 = vpop.eup %4788  ;;  %v2721_v63 = vsub.f32 %v8938_v2, %v7369_v31  ;;  %v3706_v55 = vmul.f32 1.442695, %v3584_v49  ;;  %v8939_v27 = vld [vmem:[#allocation74_spill] sm:$0xff]  ;;  %v3708_v42 = vmul.f32 1.442695, %v3585_v59 }
 0x660   : > { %4812 = vpow2.f32 %v3716_v6  ;;  %3728 = vadd.xlane.f32.xlu1 %v3727_v24  ;;  %v7529_v56 = vpop.eup %4790  ;;  %v2722_v5 = vsub.f32 %v8939_v27, %v7369_v31  ;;  %v2862_v32 = vadd.f32 %v7515_v12, %v7509_v43  ;;  %v8940_v24 = vld [vmem:[#allocation45_spill] sm:$0xff]  ;;  %v3694_v2 = vmul.f32 1.442695, %v3578_v46  ;;  %v8943_v27 = vld [vmem:[#allocation116_spill] sm:$0xff] }
 0x661   : > { %4814 = vpow2.f32 %v2847_v18  ;;  %v7535_v6 = vpop.eup %4792  ;;  %v2715_v33 = vsub.f32 %v8940_v24, %v7305_v1  ;;  %v8942_v49 = vld [vmem:[#allocation41_spill] sm:$0xff]  ;;  %v3696_v31 = vmul.f32 1.442695, %v3579_v9  ;;  %v3580_v8 = vsub.f32 %v8943_v27, %v7429_v34  ;;  %v8945_v24 = vld [vmem:[#allocation119_spill] sm:$0xff] }
 0x662   : > { %4816 = vpow2.f32 %v2849_v29  ;;  %3719 = vadd.xlane.f32.xlu0 %v3718_v58  ;;  %v2716_v7 = vsub.f32 %v8942_v49, %v7305_v1  ;;  %v2949_v29 = vadd.f32 %v7525_v20, %v7519_v50  ;;  %v2839_v58 = vmul.f32 1.442695, %v2721_v63  ;;  %v8947_v63 = vld [vmem:[#allocation54_spill] sm:$0xff] }
 0x663   : > { %4818 = vpow2.f32 %v2835_v39  ;;  %v7539_v18 = vpop.eup %4794  ;;  %v2841_v46 = vmul.f32 1.442695, %v2722_v5  ;;  %v3581_v4 = vsub.f32 %v8945_v24, %v7429_v34  ;;  %v3721_v1 = vadd.f32 %v7535_v6, %v7529_v56  ;;  %v8949_v5 = vld [vmem:[#allocation64_spill] sm:$0xff] }
 0x664   : > { %8941 = vst [vmem:[#allocation123_spill] sm:$0xff] %v7539_v18  ;;  %4820 = vpow2.f32 %v2837_v40  ;;  %2863 = vadd.xlane.f32.xlu1 %v2862_v32  ;;  %v7545_v59 = vpop.eup %4796  ;;  %v2827_v9 = vmul.f32 1.442695, %v2715_v33  ;;  %v3574_v32 = vsub.f32 %v8947_v63, %v7367_v21  ;;  %v3575_v27 = vsub.f32 %v8949_v5, %v7367_v21 }
 0x665   : > { %4822 = vpow2.f32 %v3706_v55  ;;  %v2829_v55 = vmul.f32 1.442695, %v2716_v7  ;;  %v3698_v24 = vmul.f32 1.442695, %v3580_v8  ;;  %v3700_v50 = vmul.f32 1.442695, %v3581_v4 }
 0x666   : > { %v7549_v39 = vpop.eup %4798  ;;  %4824 = vpow2.f32 %v3708_v42  ;;  %2950 = vadd.xlane.f32.xlu0 %v2949_v29  ;;  %v8950_v29 = vld [vmem:[#allocation55_spill] sm:$0xff]  ;;  %v2952_v21 = vadd.f32 %v7545_v59, %v7539_v18  ;;  %v8955_v8 = vld [vmem:[#allocation58_spill] sm:$0xff] }
 0x667   : > { %8944 = vst [vmem:[#allocation69_spill] sm:$0xff] %v7549_v39  ;;  %v7555_v40 = vpop.eup %4800  ;;  %4826 = vpow2.f32 %v3694_v2  ;;  %v2717_v33 = vsub.f32 %v8950_v29, %v7329_v47  ;;  %v8952_v2 = vld [vmem:[#allocation37_spill] sm:$0xff]  ;;  %v3686_v29 = vmul.f32 1.442695, %v3574_v32 }
 0x668   : > { %8946 = vst [vmem:[#allocation71_spill] sm:$0xff] %v7555_v40  ;;  %v7559_v49 = vpop.eup %4802  ;;  %4828 = vpow2.f32 %v3696_v31  ;;  %3722 = vadd.xlane.f32.xlu1 %v3721_v1  ;;  %v3808_v34 = vadd.f32 %v7555_v40, %v7549_v39  ;;  %v2718_v7 = vsub.f32 %v8952_v2, %v7329_v47  ;;  %v8954_v1 = vld [vmem:[#allocation50_spill] sm:$0xff]  ;;  %v2712_v39 = vsub.f32 %v8955_v8, %v7287_v36 }
 0x669   : > { %8948 = vst [vmem:[#allocation102_spill] sm:$0xff] %v7559_v49  ;;  %v7565_v42 = vpop.eup %4804  ;;  %4830 = vpow2.f32 %v2839_v58  ;;  %v2711_v5 = vsub.f32 %v8954_v1, %v7287_v36  ;;  %v3688_v47 = vmul.f32 1.442695, %v3575_v27  ;;  %v8956_v2 = vld [vmem:[#allocation42_spill] sm:$0xff]  ;;  %v8958_v1 = vld [vmem:[#allocation56_spill] sm:$0xff] }
 0x66a   : > { %v7569_v63 = vpop.eup %4806  ;;  %4832 = vpow2.f32 %v2841_v46  ;;  %3809 = vadd.xlane.f32.xlu0 %v3808_v34  ;;  %v2943_v4 = vadd.f32 %v7565_v42, %v7559_v49  ;;  %v2831_v34 = vmul.f32 1.442695, %v2717_v33  ;;  %v3576_v40 = vsub.f32 %v8956_v2, %v7389_v60  ;;  %v8959_v33 = vld [vmem:[#allocation39_spill] sm:$0xff] }
 0x66b   : > { %8951 = vst [vmem:[#allocation77_spill] sm:$0xff] %v7569_v63  ;;  %v7575_v31 = vpop.eup %4808  ;;  %4834 = vpow2.f32 %v2827_v9  ;;  %v2833_v32 = vmul.f32 1.442695, %v2718_v7  ;;  %v3577_v18 = vsub.f32 %v8958_v1, %v7389_v60  ;;  %v2819_v27 = vmul.f32 1.442695, %v2711_v5  ;;  %v8961_v7 = vld [vmem:[#allocation59_spill] sm:$0xff] }
 0x66c   : > { %8953 = vst [vmem:[#allocation66_spill] sm:$0xff] %v7575_v31  ;;  %v7579_v58 = vpop.eup %4810  ;;  %4836 = vpow2.f32 %v2829_v55  ;;  %2953 = vadd.xlane.f32.xlu1 %v2952_v21  ;;  %v3570_v21 = vsub.f32 %v8959_v33, %v7327_v13  ;;  %v3571_v2 = vsub.f32 %v8961_v7, %v7327_v13  ;;  %v3802_v60 = vadd.f32 %v7575_v31, %v7569_v63  ;;  %v8968_v31 = vld [vmem:[#allocation65_spill] sm:$0xff] }
 0x66d   : > { %v7585_v46 = vpop.eup %4812  ;;  %4838 = vpow2.f32 %v3698_v24  ;;  %v2821_v24 = vmul.f32 1.442695, %v2712_v39  ;;  %v3690_v1 = vmul.f32 1.442695, %v3576_v40  ;;  %v3692_v49 = vmul.f32 1.442695, %v3577_v18 }
 0x66e   : > { %v7589_v9 = vpop.eup %4814  ;;  %4840 = vpow2.f32 %v3700_v50  ;;  %2944 = vadd.xlane.f32.xlu0 %v2943_v4  ;;  %v3811_v36 = vadd.f32 %v7585_v46, %v7579_v58  ;;  %v8963_v4 = vld [vmem:[#allocation62_spill] sm:$0xff]  ;;  %v8967_v40 = vld [vmem:[#allocation73_spill] sm:$0xff] }
 0x66f   : > { %8957 = vst [vmem:[#allocation51_spill] sm:$0xff] %v7589_v9  ;;  %v7595_v55 = vpop.eup %4816  ;;  %4842 = vpow2.f32 %v3686_v29  ;;  %v2713_v5 = vsub.f32 %v8963_v4, %v7307_v41  ;;  %v8964_v29 = vld [vmem:[#allocation46_spill] sm:$0xff]  ;;  %v3678_v4 = vmul.f32 1.442695, %v3570_v21  ;;  %v2708_v63 = vsub.f32 %v8967_v40, %v7267_v22 }
 0x670   : > { %v7599_v8 = vpop.eup %4818  ;;  %4844 = vpow2.f32 %v3688_v47  ;;  %3812 = vadd.xlane.f32.xlu1 %v3811_v36  ;;  %v2714_v39 = vsub.f32 %v8964_v29, %v7307_v41  ;;  %v2946_v13 = vadd.f32 %v7595_v55, %v7589_v9  ;;  %v8965_v36 = vld [vmem:[#allocation131_spill] sm:$0xff]  ;;  %v3680_v41 = vmul.f32 1.442695, %v3571_v2  ;;  %v8969_v9 = vld [vmem:[#allocation40_spill] sm:$0xff] }
 0x671   : > { %8960 = vst [vmem:[#allocation47_spill] sm:$0xff] %v7599_v8  ;;  %v7605_v50 = vpop.eup %4820  ;;  %4846 = vpow2.f32 %v2831_v34  ;;  %v2707_v7 = vsub.f32 %v8965_v36, %v7267_v22  ;;  %v2823_v29 = vmul.f32 1.442695, %v2713_v5  ;;  %v3572_v36 = vsub.f32 %v8968_v31, %v7351_v11  ;;  %v8970_v5 = vld [vmem:[#allocation44_spill] sm:$0xff] }
 0x672   : > { %8962 = vst [vmem:[#allocation97_spill] sm:$0xff] %v7605_v50  ;;  %v7609_v33 = vpop.eup %4822  ;;  %4848 = vpow2.f32 %v2833_v32  ;;  %3803 = vadd.xlane.f32.xlu0 %v3802_v60  ;;  %v3492_v32 = vpop.xlane.xlu0 %3491  ;;  %v2937_v18 = vadd.f32 %v7605_v50, %v7599_v8  ;;  %v2825_v21 = vmul.f32 1.442695, %v2714_v39  ;;  %v3573_v22 = vsub.f32 %v8969_v9, %v7351_v11  ;;  %v8972_v9 = vld [vmem:[#allocation129_spill] sm:$0xff] }
 0x673   : > { %v7615_v47 = vpop.eup %4824  ;;  %4850 = vpow2.f32 %v2819_v27  ;;  %v3566_v40 = vsub.f32 %v8970_v5, %v3492_v32  ;;  %v2813_v31 = vmul.f32 1.442695, %v2708_v63  ;;  %v8973_v5 = vld [vmem:[#allocation49_spill] sm:$0xff] }
 0x674   : > { %v7619_v34 = vpop.eup %4826  ;;  %4852 = vpow2.f32 %v2821_v24  ;;  %2947 = vadd.xlane.f32.xlu1 %v2946_v13  ;;  %v3805_v24 = vadd.f32 %v7615_v47, %v7609_v33  ;;  %v2811_v13 = vmul.f32 1.442695, %v2707_v7  ;;  %v3682_v7 = vmul.f32 1.442695, %v3572_v36 }
 0x675   : > { %8966 = vst [vmem:[#allocation92_spill] sm:$0xff] %v7619_v34  ;;  %v7625_v60 = vpop.eup %4828  ;;  %4854 = vpow2.f32 %v3690_v1  ;;  %v8971_v1 = vld [vmem:[#allocation43_spill] sm:$0xff]  ;;  %v2710_v50 = vsub.f32 %v8973_v5, %v7289_v54  ;;  %v3684_v63 = vmul.f32 1.442695, %v3573_v22  ;;  %v8975_v22 = vld [vmem:[#allocation72_spill] sm:$0xff] }
 0x676   : > { %v7629_v27 = vpop.eup %4830  ;;  %4856 = vpow2.f32 %v3692_v49  ;;  %2938 = vadd.xlane.f32.xlu0 %v2937_v18  ;;  %v3567_v39 = vsub.f32 %v8971_v1, %v3492_v32  ;;  %v3796_v11 = vadd.f32 %v7625_v60, %v7619_v34  ;;  %v2709_v18 = vsub.f32 %v8972_v9, %v7289_v54 }
 0x677   : > { %v7635_v2 = vpop.eup %4832  ;;  %4858 = vpow2.f32 %v3678_v4  ;;  %v3670_v1 = vmul.f32 1.442695, %v3566_v40  ;;  %v2817_v5 = vmul.f32 1.442695, %v2710_v50 }
 0x678   : > { %v7638_v8 = vpop.eup %4834  ;;  %4860 = vpow2.f32 %v3680_v41  ;;  %3806 = vadd.xlane.f32.xlu1 %v3805_v24  ;;  %v3495_v41 = vpop.xlane.xlu1 %3494  ;;  %v2940_v32 = vadd.f32 %v7635_v2, %v7629_v27 }
 0x679   : > { %v7643_v49 = vpop.eup %4836  ;;  %4862 = vpow2.f32 %v2823_v29  ;;  %v3672_v29 = vmul.f32 1.442695, %v3567_v39 }
 0x67a   : > { %v7647_v4 = vpop.eup %4838  ;;  %4864 = vpow2.f32 %v2825_v21  ;;  %3797 = vadd.xlane.f32.xlu0 %v3796_v11  ;;  %v2931_v36 = vadd.f32 %v7643_v49, %v7638_v8  ;;  %v2815_v21 = vmul.f32 1.442695, %v2709_v18  ;;  %v3568_v11 = vsub.f32 %v8975_v22, %v3495_v41 }
 0x67b   : > { %v7653_v24 = vpop.eup %4840  ;;  %4866 = vpow2.f32 %v2811_v13  ;;  %v8976_v13 = vld [vmem:[#allocation63_spill] sm:$0xff] }
 0x67c   : > { %v7655_v34 = vpop.eup %4842  ;;  %4868 = vpow2.f32 %v2813_v31  ;;  %2941 = vadd.xlane.f32.xlu1 %v2940_v32  ;;  %v3569_v40 = vsub.f32 %v8976_v13, %v3495_v41  ;;  %v3799_v31 = vadd.f32 %v7653_v24, %v7647_v4  ;;  %v3674_v50 = vmul.f32 1.442695, %v3568_v11 }
 0x67d   : > { %8974 = vst [vmem:[#allocation95_spill] sm:$0xff] %v7655_v34  ;;  %v7659_v54 = vpop.eup %4844  ;;  %4870 = vpow2.f32 %v3682_v7 }
 0x67e   : > { %v7662_v9 = vpop.eup %4846  ;;  %4872 = vpow2.f32 %v3684_v63  ;;  %2932 = vadd.xlane.f32.xlu0 %v2931_v36  ;;  %v3790_v18 = vadd.f32 %v7659_v54, %v7655_v34  ;;  %v3676_v41 = vmul.f32 1.442695, %v3569_v40 }
 0x67f   : > { %v7667_v39 = vpop.eup %4848  ;;  %4874 = vpow2.f32 %v3670_v1 }
 0x680   : > { %v7669_v32 = vpop.eup %4850  ;;  %4876 = vpow2.f32 %v3672_v29  ;;  %3800 = vadd.xlane.f32.xlu1 %v3799_v31  ;;  %v2934_v36 = vadd.f32 %v7667_v39, %v7662_v9 }
 0x681   : > { %8977 = vst [vmem:[#allocation98_spill] sm:$0xff] %v7669_v32  ;;  %v7673_v7 = vpop.eup %4852  ;;  %4878 = vpow2.f32 %v2815_v21 }
 0x682   : > { %8978 = vst [vmem:[#allocation80_spill] sm:$0xff] %v7673_v7  ;;  %v7675_v63 = vpop.eup %4854  ;;  %4880 = vpow2.f32 %v2817_v5  ;;  %3791 = vadd.xlane.f32.xlu0 %v3790_v18  ;;  %v2925_v29 = vadd.f32 %v7673_v7, %v7669_v32 }
 0x683   : > { %8979 = vst [vmem:[#allocation81_spill] sm:$0xff] %v7675_v63  ;;  %v7679_v1 = vpop.eup %4856  ;;  %4882 = vpow2.f32 %v3674_v50 }
 0x684   : > { %8980 = vst [vmem:[#allocation128_spill] sm:$0xff] %v7679_v1  ;;  %v7681_v22 = vpop.eup %4858  ;;  %2935 = vadd.xlane.f32.xlu1 %v2934_v36  ;;  %4884 = vpow2.f32 %v3676_v41  ;;  %v3793_v11 = vadd.f32 %v7679_v1, %v7675_v63 }
 0x685   : > { %8981 = vst [vmem:[#allocation127_spill] sm:$0xff] %v7681_v22  ;;  %v7685_v13 = vpop.eup %4860 }
 0x686   : > { %8982 = vst [vmem:[#allocation100_spill] sm:$0xff] %v7685_v13  ;;  %v7687_v21 = vpop.eup %4862  ;;  %2926 = vadd.xlane.f32.xlu0 %v2925_v29  ;;  %v3784_v31 = vadd.f32 %v7685_v13, %v7681_v22 }
 0x687   : > { %8983 = vst [vmem:[#allocation101_spill] sm:$0xff] %v7687_v21  ;;  %v7691_v5 = vpop.eup %4864 }
 0x688   : > { %8984 = vst [vmem:[#allocation99_spill] sm:$0xff] %v7691_v5  ;;  %v7693_v40 = vpop.eup %4866  ;;  %3794 = vadd.xlane.f32.xlu1 %v3793_v11  ;;  %v2928_v50 = vadd.f32 %v7691_v5, %v7687_v21 }
 0x689   : > { %8985 = vst [vmem:[#allocation75_spill] sm:$0xff] %v7693_v40  ;;  %v7697_v18 = vpop.eup %4868 }
 0x68a   : > { %8986 = vst [vmem:[#allocation76_spill] sm:$0xff] %v7697_v18  ;;  %v7699_v36 = vpop.eup %4870  ;;  %3785 = vadd.xlane.f32.xlu0 %v3784_v31  ;;  %v2919_v32 = vadd.f32 %v7697_v18, %v7693_v40 }
 0x68b   : > { %8987 = vst [vmem:[#allocation115_spill] sm:$0xff] %v7699_v36  ;;  %v7703_v41 = vpop.eup %4872 }
 0x68c   : > { %8988 = vst [vmem:[#allocation13_spill] sm:$0xff] %v7703_v41  ;;  %v7705_v29 = vpop.eup %4874  ;;  %2929 = vadd.xlane.f32.xlu1 %v2928_v50  ;;  %v3787_v22 = vadd.f32 %v7703_v41, %v7699_v36 }
 0x68d   : > { %8989 = vst [vmem:[#allocation94_spill] sm:$0xff] %v7705_v29  ;;  %v7709_v11 = vpop.eup %4876 }
 0x68e   : > { %8990 = vst [vmem:[#allocation114_spill] sm:$0xff] %v7709_v11  ;;  %v7711_v7 = vpop.eup %4878  ;;  %2920 = vadd.xlane.f32.xlu0 %v2919_v32  ;;  %v3778_v13 = vadd.f32 %v7709_v11, %v7705_v29 }
 0x68f   : > { %8991 = vst [vmem:[#allocation90_spill] sm:$0xff] %v7711_v7  ;;  %v7715_v31 = vpop.eup %4880 }
 0x690   : > { %8992 = vst [vmem:[#allocation103_spill] sm:$0xff] %v7715_v31  ;;  %3788 = vadd.xlane.f32.xlu1 %v3787_v22  ;;  %v7719_v21 = vpop.eup %4882  ;;  %v2922_v50 = vadd.f32 %v7715_v31, %v7711_v7 }
 0x691   : > { %8993 = vst [vmem:[#allocation53_spill] sm:$0xff] %v7719_v21  ;;  %v7723_v40 = vpop.eup %4884 }
 0x692   : > { %3779 = vadd.xlane.f32.xlu0 %v3778_v13  ;;  %8994 = vst [vmem:[#allocation9_spill] sm:$0xff] %v7723_v40  ;;  %v3781_v32 = vadd.f32 %v7723_v40, %v7719_v21 }
 0x694   : > { %2923 = vadd.xlane.f32.xlu1 %v2922_v50 }
 0x698   : > { %3782 = vadd.xlane.f32.xlu1 %v3781_v32 }
 0x69b   : > { %v2891_v18 = vpop.xlane.xlu0 %2890 }
 0x69f   : > { %v2894_v41 = vpop.xlane.xlu1 %2893 }
 0x6a3   : > { %v2897_v36 = vpop.xlane.xlu0 %2896 }
 0x6a7   : > { %v3750_v22 = vpop.xlane.xlu0 %3749 }
 0x6a9   : > { %v2900_v5 = vpop.xlane.xlu1 %2899 }
 0x6aa   : > { %4886 = vrcp.f32 %v2900_v5 }
 0x6ab   : > { %v2903_v63 = vpop.xlane.xlu0 %2902 }
 0x6ac   : > { %4888 = vrcp.f32 %v2903_v63 }
 0x6ad   : > { %v3753_v29 = vpop.xlane.xlu1 %3752  ;;  %4890 = vrcp.f32 %v2897_v36 }
 0x6af   : > { %v3756_v13 = vpop.xlane.xlu0 %3755 }
 0x6b1   : > { %v2906_v11 = vpop.xlane.xlu1 %2905 }
 0x6b2   : > { %4892 = vrcp.f32 %v2906_v11 }
 0x6b3   : > { %v3762_v7 = vpop.xlane.xlu0 %3761  ;;  %4894 = vrcp.f32 %v2891_v18 }
 0x6b4   : > { %4896 = vrcp.f32 %v2894_v41 }
 0x6b5   : > { %v3759_v50 = vpop.xlane.xlu1 %3758  ;;  %4898 = vrcp.f32 %v3762_v7 }
 0x6b6   : > { %4900 = vrcp.f32 %v3750_v22 }
 0x6b7   : > { %v2627_v21 = vpop.xlane.xlu0 %2626  ;;  %4902 = vrcp.f32 %v3759_v50  ;;  %v4887_v63 = vpop.eup %4886 }
 0x6b8   : > { %v2703_v32 = vsub.f32 %v6933_v62, %v2627_v21  ;;  %v2704_v40 = vsub.f32 %v6937_v44, %v2627_v21 }
 0x6b9   : > { %v3765_v31 = vpop.xlane.xlu1 %3764  ;;  %v4889_v11 = vpop.eup %4888 }
 0x6ba   : > { %v2803_v34 = vmul.f32 1.442695, %v2703_v32  ;;  %v2805_v5 = vmul.f32 1.442695, %v2704_v40  ;;  %4904 = vrcp.f32 %v3765_v31  ;;  %v4891_v22 = vpop.eup %4890 }
 0x6bb   : > { %4906 = vrcp.f32 %v3756_v13  ;;  %v3486_v36 = vpop.xlane.xlu0 %3485  ;;  %v3016_v13 = vmul.f32 %v4889_v11, %v7201_v16 }
 0x6bc   : > { %4908 = vpow2.f32 %v2803_v34  ;;  %v3562_v18 = vsub.f32 %v6947_v61, %v3486_v36  ;;  %v3563_v7 = vsub.f32 %v6951_v51, %v3486_v36  ;;  %v3014_v34 = vmul.f32 %v4887_v63, %v7195_v15 }
 0x6bd   : > { %4910 = vpow2.f32 %v2805_v5  ;;  %v2630_v41 = vpop.xlane.xlu1 %2629  ;;  %v3015_v5 = vmul.f32 %v4889_v11, %v7197_v28 }
 0x6be   : > { %v3662_v62 = vmul.f32 1.442695, %v3562_v18  ;;  %v3664_v1 = vmul.f32 1.442695, %v3563_v7  ;;  %v2705_v44 = vsub.f32 %v6945_v37, %v2630_v41  ;;  %v2706_v21 = vsub.f32 %v6949_v45, %v2630_v41 }
 0x6bf   : > { %v4893_v40 = vpop.eup %4892  ;;  %4912 = vrcp.f32 %v3753_v29  ;;  %v2885_v31 = vpop.xlane.xlu0 %2884  ;;  %v3012_v45 = vmul.f32 %v4891_v22, %v7171_v14 }
 0x6c0   : > { %4914 = vpow2.f32 %v3662_v62  ;;  %v2807_v61 = vmul.f32 1.442695, %v2705_v44  ;;  %v2809_v50 = vmul.f32 1.442695, %v2706_v21  ;;  %v3018_v51 = vmul.f32 %v4893_v40, %v7235_v3  ;;  %v7739_v36 = vpop.eup %4894 }
 0x6c1   : > { %4916 = vpow2.f32 %v3664_v1  ;;  %v3489_v32 = vpop.xlane.xlu1 %3488  ;;  %v3017_v37 = vmul.f32 %v4893_v40, %v7227_v30  ;;  %v7743_v18 = vpop.eup %4896  ;;  %v3066_v30 = vpack.c.bf16 %v3014_v34, %v3012_v45 }
 0x6c2   : > { %4918 = vpow2.f32 %v2807_v61  ;;  %v3564_v16 = vsub.f32 %v6959_v26, %v3489_v32  ;;  %v3565_v15 = vsub.f32 %v6963_v23, %v3489_v32  ;;  %v3068_v29 = vpack.c.bf16 %v3018_v51, %v3016_v13  ;;  %v4899_v7 = vpop.eup %4898  ;;  %v8996_v32 = vld [vmem:[#allocation14_spill] sm:$0xff] }
 0x6c3   : > { %4920 = vpow2.f32 %v2809_v50  ;;  %v3744_v3 = vpop.xlane.xlu0 %3743  ;;  %v3067_v1 = vpack.c.bf16 %v3017_v37, %v3015_v5  ;;  %v7745_v11 = vpop.eup %4900  ;;  %v3008_v26 = vmul.f32 %v7739_v36, %v7151_v17  ;;  %v3010_v23 = vmul.f32 %v7743_v18, %v7161_v0  ;;  %v8995_v50 = vld [vmem:[#allocation132_spill] sm:$0xff]  ;;  %v8997_v37 = vld [vmem:[#allocation83_spill] sm:$0xff] }
 0x6c4   : > { %v3666_v41 = vmul.f32 1.442695, %v3564_v16  ;;  %v3668_v28 = vmul.f32 1.442695, %v3565_v15  ;;  %3085 = vmatprep.subr.bf16.mxu1 %v3068_v29  ;;  %4922 = vrcp.f32 %v2885_v31  ;;  %v4903_v62 = vpop.eup %4902  ;;  %v3875_v40 = vmul.f32 %v4899_v7, %v7245_v52  ;;  %v8998_v16 = vld [vmem:[#allocation112_spill] sm:$0xff]  ;;  %v8999_v15 = vld [vmem:[#allocation38_spill] sm:$0xff] }
 0x6c5   : > { %3086 = vmatpush1.bf16.xpose.msra.mxu1 %v3067_v1  ;;  %v2888_v14 = vpop.xlane.xlu1 %2887  ;;  %v3011_v13 = vmul.f32 %v4891_v22, %v7166_v48  ;;  %v3013_v31 = vmul.f32 %v4887_v63, %v7185_v10  ;;  %v3874_v45 = vmul.f32 %v4899_v7, %v8997_v37  ;;  %v3873_v48 = vmul.f32 %v4903_v62, %v8999_v15  ;;  %v9001_v7 = vld [vmem:[#allocation130_spill] sm:$0xff]  ;;  %v9005_v15 = vld [vmem:[#allocation93_spill] sm:$0xff] }
 0x6c6   : > { %4924 = vpow2.f32 %v3666_v41  ;;  %3087 = vmatprep.subr.bf16.mxu1 %v3066_v30 }
 0x6c7   : > { %v4905_v44 = vpop.eup %4904  ;;  %4926 = vpow2.f32 %v3668_v28  ;;  %v2621_v21 = vpop.xlane.xlu0 %2620  ;;  %v3065_v1 = vpack.c.bf16 %v3013_v31, %v3011_v13 }
 0x6c8   : > { %v4907_v34 = vpop.eup %4906  ;;  %4928 = vrcp.f32 %v2888_v14  ;;  %v2699_v61 = vsub.f32 %v8872_v57, %v2621_v21  ;;  %v2700_v51 = vsub.f32 %v8995_v50, %v2621_v21  ;;  %v3877_v17 = vmul.f32 %v4905_v44, %v8996_v32  ;;  %v9002_v21 = vld [vmem:[#allocation61_spill] sm:$0xff] }
 0x6c9   : > { %v7757_v5 = vpop.eup %4908  ;;  %4930 = vrcp.f32 %v3744_v3  ;;  %v3747_v0 = vpop.xlane.xlu1 %3746  ;;  %v3876_v52 = vmul.f32 %v4905_v44, %v8998_v16  ;;  %v9000_v3 = vld [vmem:[#allocation85_spill] sm:$0xff] }
 0x6ca   : > { %v7762_v22 = vpop.eup %4910  ;;  %v2795_v10 = vmul.f32 1.442695, %v2699_v61  ;;  %v2797_v63 = vmul.f32 1.442695, %v2700_v51  ;;  %4932 = vrcp.f32 %v3747_v0  ;;  %v3927_v57 = vpack.c.bf16 %v3877_v17, %v3875_v40  ;;  %v9003_v0 = vld [vmem:[#allocation133_spill] sm:$0xff] }
 0x6cb   : > { %v3480_v29 = vpop.xlane.xlu0 %3479  ;;  %v3926_v41 = vpack.c.bf16 %v3876_v52, %v3874_v45  ;;  %v2913_v28 = vadd.f32 %v7762_v22, %v7757_v5  ;;  %v3871_v30 = vmul.f32 %v4907_v34, %v9000_v3  ;;  %v3064_v61 = vpack.c.bf16 %v3010_v23, %v3008_v26  ;;  %v9004_v45 = vld [vmem:[#allocation48_spill] sm:$0xff] }
 0x6cc   : > { %v7767_v14 = vpop.eup %4912  ;;  %4934 = vpow2.f32 %v2795_v10  ;;  %3944 = vmatprep.subr.bf16.mxu0 %v3927_v57  ;;  %v3558_v44 = vsub.f32 %v9001_v7, %v3480_v29  ;;  %v3559_v50 = vsub.f32 %v9002_v21, %v3480_v29  ;;  %v9006_v10 = vld [vmem:[#allocation87_spill] sm:$0xff]  ;;  %v9009_v21 = vld [vmem:[#allocation109_spill] sm:$0xff] }
 0x6cd   : > { %v7771_v51 = vpop.eup %4914  ;;  %4936 = vpow2.f32 %v2797_v63  ;;  %3088 = vmatpush1.bf16.xpose.msra.mxu1 %v3065_v1  ;;  %3945 = vmatpush1.bf16.xpose.msra.mxu0 %v3926_v41  ;;  %v2624_v40 = vpop.xlane.xlu1 %2623  ;;  %v3925_v13 = vpack.c.bf16 %v3873_v48, %v3871_v30  ;;  %v3009_v48 = vmul.f32 %v7743_v18, %v9005_v15  ;;  %v3872_v63 = vmul.f32 %v4903_v62, %v9006_v10  ;;  %v9007_v41 = vld [vmem:[#allocation111_spill] sm:$0xff]  ;;  %v9010_v62 = vld [vmem:[#allocation70_spill] sm:$0xff] }
 0x6ce   : > { %v7773_v31 = vpop.eup %4916  ;;  %v3654_v32 = vmul.f32 1.442695, %v3558_v44  ;;  %v3656_v17 = vmul.f32 1.442695, %v3559_v50  ;;  %v2701_v37 = vsub.f32 %v9003_v0, %v2624_v40  ;;  %v2702_v16 = vsub.f32 %v9004_v45, %v2624_v40  ;;  %2914 = vadd.xlane.f32.xlu0 %v2913_v28  ;;  %3089 = vmatprep.subr.bf16.mxu1 %v3064_v61  ;;  %v9008_v7 = vld [vmem:[#allocation91_spill] sm:$0xff]  ;;  %v9011_v40 = vld [vmem:[#allocation60_spill] sm:$0xff] }
 0x6cf   : > { %v7777_v52 = vpop.eup %4918  ;;  %3946 = vmatprep.subr.bf16.mxu0 %v3925_v13  ;;  %v2879_v26 = vpop.xlane.xlu0 %2878  ;;  %v3772_v23 = vadd.f32 %v7773_v31, %v7771_v51  ;;  %v3869_v28 = vmul.f32 %v7767_v14, %v9007_v41  ;;  %v3007_v44 = vmul.f32 %v7739_v36, %v9008_v7  ;;  %v3870_v18 = vmul.f32 %v4907_v34, %v9009_v21  ;;  %v9016_v21 = vld [vmem:[#allocation110_spill] sm:$0xff] }
 0x6d0   : > { %v7784_v57 = vpop.eup %4920  ;;  %4938 = vpow2.f32 %v3654_v32  ;;  %v2799_v29 = vmul.f32 1.442695, %v2701_v37  ;;  %v2801_v1 = vmul.f32 1.442695, %v2702_v16  ;;  %v9012_v32 = vld [vmem:[#allocation12_spill] sm:$0xff] }
 0x6d1   : > { %4940 = vpow2.f32 %v3656_v17  ;;  %v3483_v3 = vpop.xlane.xlu1 %3482  ;;  %v2916_v30 = vadd.f32 %v7784_v57, %v7777_v52  ;;  %v4923_v50 = vpop.eup %4922  ;;  %v3867_v0 = vmul.f32 %v7745_v11, %v9012_v32  ;;  %v3063_v45 = vpack.c.bf16 %v3009_v48, %v3007_v44 }
 0x6d2   : > { %4942 = vpow2.f32 %v2799_v29  ;;  %v3560_v61 = vsub.f32 %v9010_v62, %v3483_v3  ;;  %v3561_v13 = vsub.f32 %v9011_v40, %v3483_v3  ;;  %3773 = vadd.xlane.f32.xlu0 %v3772_v23  ;;  %v3924_v16 = vpack.c.bf16 %v3872_v63, %v3870_v18  ;;  %v9014_v63 = vld [vmem:[#allocation17_spill] sm:$0xff] }
 0x6d3   : > { %v7797_v17 = vpop.eup %4924  ;;  %4944 = vpow2.f32 %v2801_v1  ;;  %2917 = vadd.xlane.f32.xlu1 %v2916_v30  ;;  %v3738_v37 = vpop.xlane.xlu0 %3737  ;;  %v3923_v10 = vpack.c.bf16 %v3869_v28, %v3867_v0  ;;  %v9013_v1 = vld [vmem:[#allocation104_spill] sm:$0xff]  ;;  %v9015_v28 = vld [vmem:[#allocation105_spill] sm:$0xff]  ;;  %v3868_v18 = vmul.f32 %v7767_v14, %v9016_v21 }
 0x6d4   : > { %v7799_v36 = vpop.eup %4926  ;;  %4946 = vrcp.f32 %v2879_v26  ;;  %v3658_v34 = vmul.f32 1.442695, %v3560_v61  ;;  %v3660_v15 = vmul.f32 1.442695, %v3561_v13  ;;  %v3004_v48 = vmul.f32 %v4923_v50, %v9013_v1  ;;  %v9017_v61 = vld [vmem:[#allocation21_spill] sm:$0xff]  ;;  %v9018_v0 = vld [vmem:[#allocation16_spill] sm:$0xff] }
 0x6d5   : > { %v4929_v29 = vpop.eup %4928  ;;  %4948 = vrcp.f32 %v3738_v37  ;;  %3090 = vmatpush1.bf16.xpose.msra.mxu1 %v3063_v45  ;;  %3947 = vmatpush1.bf16.xpose.msra.mxu0 %v3924_v16  ;;  %v2882_v23 = vpop.xlane.xlu1 %2881  ;;  %v3775_v41 = vadd.f32 %v7799_v36, %v7797_v17  ;;  %v3003_v37 = vmul.f32 %v4923_v50, %v9018_v0  ;;  %v9019_v45 = vld [vmem:[#allocation10_spill] sm:$0xff] }
 0x6d6   : > { %v4931_v3 = vpop.eup %4930  ;;  %4950 = vpow2.f32 %v3658_v34  ;;  %3948 = vmatprep.subr.bf16.mxu0 %v3923_v10  ;;  %v3006_v30 = vmul.f32 %v4929_v29, %v9014_v63  ;;  %v3005_v44 = vmul.f32 %v4929_v29, %v9015_v28  ;;  %v3866_v16 = vmul.f32 %v7745_v11, %v9019_v45 }
 0x6d7   : > { %v4933_v7 = vpop.eup %4932  ;;  %4952 = vpow2.f32 %v3660_v15  ;;  %3776 = vadd.xlane.f32.xlu1 %v3775_v41  ;;  %v2873_v26 = vpop.xlane.xlu0 %2872  ;;  %v9020_v15 = vld [vmem:[#allocation89_spill] sm:$0xff] }
 0x6d8   : > { %4954 = vrcp.f32 %v2882_v23  ;;  %v3062_v62 = vpack.c.bf16 %v3006_v30, %v3004_v48  ;;  %v3865_v40 = vmul.f32 %v4933_v7, %v9017_v61  ;;  %v3863_v10 = vmul.f32 %v4931_v3, %v9020_v15 }
 0x6d9   : > { %v7809_v13 = vpop.eup %4934  ;;  %v3741_v32 = vpop.xlane.xlu1 %3740  ;;  %v3061_v14 = vpack.c.bf16 %v3005_v44, %v3003_v37  ;;  %v3922_v23 = vpack.c.bf16 %v3868_v18, %v3866_v16  ;;  %v9023_v44 = vld [vmem:[#allocation20_spill] sm:$0xff] }
 0x6da   : > { %v7814_v34 = vpop.eup %4936  ;;  %3091 = vmatprep.subr.bf16.mxu1 %v3062_v62  ;;  %4956 = vrcp.f32 %v3741_v32  ;;  %v3921_v1 = vpack.c.bf16 %v3865_v40, %v3863_v10  ;;  %v3864_v21 = vmul.f32 %v4933_v7, %v9023_v44  ;;  %v9024_v40 = vld [vmem:[#allocation78_spill] sm:$0xff] }
 0x6db   : > { %v3732_v29 = vpop.xlane.xlu0 %3731  ;;  %v2907_v41 = vadd.f32 %v7814_v34, %v7809_v13  ;;  %4958 = vrcp.f32 %v2873_v26  ;;  %v3862_v32 = vmul.f32 %v4931_v3, %v9024_v40  ;;  %v9028_v3 = vld [vmem:[#allocation18_spill] sm:$0xff]  ;;  %v9031_v40 = vld [vmem:[#allocation25_spill] sm:$0xff] }
 0x6dd   : > { %v7819_v48 = vpop.eup %4938  ;;  %3092 = vmatpush1.bf16.xpose.msra.mxu1 %v3061_v14  ;;  %3949 = vmatpush1.bf16.xpose.msra.mxu0 %v3922_v23  ;;  %v2876_v50 = vpop.xlane.xlu1 %2875  ;;  %v3920_v16 = vpack.c.bf16 %v3864_v21, %v3862_v32  ;;  %v9027_v14 = vld [vmem:[#allocation108_spill] sm:$0xff] }
 0x6de   : > { %9021 = vst [vmem:[#allocation122_spill] sm:$0xff] %v7819_v48  ;;  %v7821_v11 = vpop.eup %4940  ;;  %4960 = vrcp.f32 %v2876_v50  ;;  %2908 = vadd.xlane.f32.xlu0 %v2907_v41  ;;  %3950 = vmatprep.subr.bf16.mxu0 %v3921_v1  ;;  %v9029_v1 = vld [vmem:[#allocation24_spill] sm:$0xff] }
 0x6df   : > { %9022 = vst [vmem:[#allocation118_spill] sm:$0xff] %v7821_v11  ;;  %v7823_v63 = vpop.eup %4942  ;;  %v2867_v30 = vpop.xlane.xlu0 %2866  ;;  %v3766_v28 = vadd.f32 %v7821_v11, %v7819_v48  ;;  %4962 = vrcp.f32 %v3732_v29  ;;  %v9034_v11 = vld [vmem:[#allocation23_spill] sm:$0xff] }
 0x6e0   : > { %v7828_v26 = vpop.eup %4944 }
 0x6e1   : > { %v4947_v18 = vpop.eup %4946  ;;  %v3735_v62 = vpop.xlane.xlu1 %3734  ;;  %v2910_v61 = vadd.f32 %v7828_v26, %v7823_v63 }
 0x6e2   : > { %v4949_v0 = vpop.eup %4948  ;;  %4964 = vrcp.f32 %v3735_v62  ;;  %3767 = vadd.xlane.f32.xlu0 %v3766_v28  ;;  %v3000_v23 = vmul.f32 %v4947_v18, %v9027_v14  ;;  %v2999_v50 = vmul.f32 %v4947_v18, %v9029_v1  ;;  %v9030_v28 = vld [vmem:[#allocation19_spill] sm:$0xff]  ;;  %v9033_v14 = vld [vmem:[#allocation26_spill] sm:$0xff] }
 0x6e3   : > { %v7833_v37 = vpop.eup %4950  ;;  %2911 = vadd.xlane.f32.xlu1 %v2910_v61  ;;  %v3726_v45 = vpop.xlane.xlu0 %3725  ;;  %4966 = vrcp.f32 %v2867_v30  ;;  %v3859_v32 = vmul.f32 %v4949_v0, %v9031_v40  ;;  %v9036_v1 = vld [vmem:[#allocation27_spill] sm:$0xff] }
 0x6e4   : > { %9025 = vst [vmem:[#allocation106_spill] sm:$0xff] %v7833_v37  ;;  %v7835_v15 = vpop.eup %4952 }
 0x6e5   : > { %9026 = vst [vmem:[#allocation11_spill] sm:$0xff] %v7835_v15  ;;  %v4955_v7 = vpop.eup %4954  ;;  %3951 = vmatpush1.bf16.xpose.msra.mxu0 %v3920_v16  ;;  %v2870_v10 = vpop.xlane.xlu1 %2869  ;;  %v3769_v29 = vadd.f32 %v7835_v15, %v7833_v37  ;;  %v9032_v16 = vld [vmem:[#allocation22_spill] sm:$0xff] }
 0x6e6   : > { %4968 = vrcp.f32 %v2870_v10  ;;  %v3002_v41 = vmul.f32 %v4955_v7, %v9028_v3  ;;  %v3001_v44 = vmul.f32 %v4955_v7, %v9030_v28  ;;  %v3858_v10 = vmul.f32 %v4949_v0, %v9033_v14  ;;  %v9037_v28 = vld [vmem:[#allocation28_spill] sm:$0xff]  ;;  %v9040_v14 = vld [vmem:[#allocation30_spill] sm:$0xff] }
 0x6e7   : > { %v4957_v62 = vpop.eup %4956  ;;  %4970 = vrcp.f32 %v3726_v45  ;;  %3770 = vadd.xlane.f32.xlu1 %v3769_v29  ;;  %v2861_v21 = vpop.xlane.xlu0 %2860 }
 0x6e8   : > { %v3060_v30 = vpack.c.bf16 %v3002_v41, %v3000_v23  ;;  %v3059_v61 = vpack.c.bf16 %v3001_v44, %v2999_v50  ;;  %v3861_v48 = vmul.f32 %v4957_v62, %v9032_v16  ;;  %v4959_v37 = vpop.eup %4958  ;;  %v3860_v3 = vmul.f32 %v4957_v62, %v9034_v11  ;;  %v9035_v23 = vld [vmem:[#allocation107_spill] sm:$0xff] }
 0x6e9   : > { %v3729_v15 = vpop.xlane.xlu1 %3728  ;;  %v2996_v41 = vmul.f32 %v4959_v37, %v9035_v23  ;;  %v9038_v16 = vld [vmem:[#allocation79_spill] sm:$0xff] }
 0x6ea   : > { %3093 = vmatprep.subr.bf16.mxu1 %v3060_v30  ;;  %4972 = vrcp.f32 %v3729_v15  ;;  %v3919_v18 = vpack.c.bf16 %v3861_v48, %v3859_v32  ;;  %v3918_v29 = vpack.c.bf16 %v3860_v3, %v3858_v10  ;;  %v2995_v11 = vmul.f32 %v4959_v37, %v9038_v16 }
 0x6eb   : > { %v4961_v7 = vpop.eup %4960  ;;  %3094 = vmatpush1.bf16.xpose.msra.mxu1 %v3059_v61  ;;  %v3720_v45 = vpop.xlane.xlu0 %3719  ;;  %4974 = vrcp.f32 %v2861_v21  ;;  %v9039_v21 = vld [vmem:[#allocation32_spill] sm:$0xff] }
 0x6ec   : > { %3952 = vmatprep.subr.bf16.mxu0 %v3919_v18  ;;  %v2998_v50 = vmul.f32 %v4961_v7, %v9036_v1  ;;  %v2997_v44 = vmul.f32 %v4961_v7, %v9037_v28  ;;  %v4963_v40 = vpop.eup %4962  ;;  %v9041_v1 = vld [vmem:[#allocation36_spill] sm:$0xff] }
 0x6ed   : > { %3953 = vmatpush1.bf16.xpose.msra.mxu0 %v3918_v29  ;;  %v2864_v0 = vpop.xlane.xlu1 %2863  ;;  %v3855_v61 = vmul.f32 %v4963_v40, %v9039_v21  ;;  %v3854_v10 = vmul.f32 %v4963_v40, %v9040_v14  ;;  %v9042_v28 = vld [vmem:[#allocation84_spill] sm:$0xff] }
 0x6ee   : > { %4976 = vrcp.f32 %v2864_v0  ;;  %v3058_v15 = vpack.c.bf16 %v2998_v50, %v2996_v41  ;;  %v3057_v30 = vpack.c.bf16 %v2997_v44, %v2995_v11 }
 0x6ef   : > { %v4965_v48 = vpop.eup %4964  ;;  %4978 = vrcp.f32 %v3720_v45  ;;  %v2951_v62 = vpop.xlane.xlu0 %2950 }
 0x6f0   : > { %3095 = vmatprep.subr.bf16.mxu1 %v3058_v15  ;;  %v3857_v32 = vmul.f32 %v4965_v48, %v7451_v35  ;;  %v3856_v3 = vmul.f32 %v4965_v48, %v7447_v38  ;;  %v4967_v18 = vpop.eup %4966  ;;  %v9043_v35 = vld [vmem:[#allocation125_spill] sm:$0xff]  ;;  %v9044_v38 = vld [vmem:[#allocation34_spill] sm:$0xff] }
 0x6f1   : > { %v3723_v7 = vpop.xlane.xlu1 %3722  ;;  %v2992_v50 = vmul.f32 %v4967_v18, %v9041_v1  ;;  %v2991_v16 = vmul.f32 %v4967_v18, %v9044_v38  ;;  %v9048_v38 = vld [vmem:[#allocation68_spill] sm:$0xff] }
 0x6f2   : > { %4980 = vrcp.f32 %v3723_v7  ;;  %v3917_v29 = vpack.c.bf16 %v3857_v32, %v3855_v61  ;;  %v3916_v37 = vpack.c.bf16 %v3856_v3, %v3854_v10  ;;  %v9046_v32 = vld [vmem:[#allocation126_spill] sm:$0xff] }
 0x6f3   : > { %v4969_v23 = vpop.eup %4968  ;;  %3096 = vmatpush1.bf16.xpose.msra.mxu1 %v3057_v30  ;;  %v3810_v41 = vpop.xlane.xlu0 %3809  ;;  %4982 = vrcp.f32 %v2951_v62  ;;  %v9045_v30 = vld [vmem:[#allocation124_spill] sm:$0xff] }
 0x6f4   : > { %v4971_v45 = vpop.eup %4970  ;;  %3954 = vmatprep.subr.bf16.mxu0 %v3917_v29  ;;  %v2994_v44 = vmul.f32 %v4969_v23, %v9042_v28  ;;  %v2993_v0 = vmul.f32 %v4969_v23, %v9043_v35 }
 0x6f5   : > { %3955 = vmatpush1.bf16.xpose.msra.mxu0 %v3916_v37  ;;  %v2954_v40 = vpop.xlane.xlu1 %2953  ;;  %v3851_v61 = vmul.f32 %v4971_v45, %v9045_v30  ;;  %v3850_v14 = vmul.f32 %v4971_v45, %v9046_v32 }
 0x6f6   : > { %4984 = vrcp.f32 %v2954_v40  ;;  %v3056_v11 = vpack.c.bf16 %v2994_v44, %v2992_v50  ;;  %v3055_v21 = vpack.c.bf16 %v2993_v0, %v2991_v16 }
 0x6f7   : > { %v4973_v15 = vpop.eup %4972  ;;  %v2945_v48 = vpop.xlane.xlu0 %2944  ;;  %4986 = vrcp.f32 %v3810_v41 }
 0x6f8   : > { %3097 = vmatprep.subr.bf16.mxu1 %v3056_v11  ;;  %v3853_v62 = vmul.f32 %v4973_v15, %v7495_v19  ;;  %v3852_v10 = vmul.f32 %v4973_v15, %v7487_v53  ;;  %v4975_v3 = vpop.eup %4974  ;;  %v9047_v53 = vld [vmem:[#allocation134_spill] sm:$0xff] }
 0x6f9   : > { %v3813_v7 = vpop.xlane.xlu1 %3812  ;;  %v2988_v41 = vmul.f32 %v4975_v3, %v7481_v25  ;;  %v2987_v28 = vmul.f32 %v4975_v3, %v9047_v53  ;;  %v9049_v25 = vld [vmem:[#allocation82_spill] sm:$0xff] }
 0x6fa   : > { %4988 = vrcp.f32 %v3813_v7  ;;  %v3915_v29 = vpack.c.bf16 %v3853_v62, %v3851_v61  ;;  %v3914_v18 = vpack.c.bf16 %v3852_v10, %v3850_v14  ;;  %v9050_v10 = vld [vmem:[#allocation123_spill] sm:$0xff] }
 0x6fb   : > { %v4977_v37 = vpop.eup %4976  ;;  %3098 = vmatpush1.bf16.xpose.msra.mxu1 %v3055_v21  ;;  %v3804_v23 = vpop.xlane.xlu0 %3803  ;;  %4990 = vrcp.f32 %v2945_v48 }
 0x6fc   : > { %v4979_v1 = vpop.eup %4978  ;;  %3956 = vmatprep.subr.bf16.mxu0 %v3915_v29  ;;  %v2990_v50 = vmul.f32 %v4977_v37, %v7515_v12  ;;  %v2989_v19 = vmul.f32 %v4977_v37, %v7509_v43 }
 0x6fd   : > { %3957 = vmatpush1.bf16.xpose.msra.mxu0 %v3914_v18  ;;  %v2948_v45 = vpop.xlane.xlu1 %2947  ;;  %v3847_v16 = vmul.f32 %v4979_v1, %v9048_v38  ;;  %v3846_v15 = vmul.f32 %v4979_v1, %v9049_v25 }
 0x6fe   : > { %4992 = vrcp.f32 %v2948_v45  ;;  %v3054_v44 = vpack.c.bf16 %v2990_v50, %v2988_v41  ;;  %v3053_v40 = vpack.c.bf16 %v2989_v19, %v2987_v28  ;;  %v9052_v41 = vld [vmem:[#allocation71_spill] sm:$0xff]  ;;  %v9053_v19 = vld [vmem:[#allocation69_spill] sm:$0xff] }
 0x6ff   : > { %v4981_v35 = vpop.eup %4980  ;;  %v2939_v0 = vpop.xlane.xlu0 %2938  ;;  %4994 = vrcp.f32 %v3804_v23 }
 0x700   : > { %3099 = vmatprep.subr.bf16.mxu1 %v3054_v44  ;;  %v3849_v11 = vmul.f32 %v4981_v35, %v7535_v6  ;;  %v3848_v12 = vmul.f32 %v4981_v35, %v7529_v56  ;;  %v4983_v43 = vpop.eup %4982  ;;  %v9051_v56 = vld [vmem:[#allocation52_spill] sm:$0xff] }
 0x701   : > { %v3807_v48 = vpop.xlane.xlu1 %3806  ;;  %v3048_v32 = vmul.f32 %v4983_v43, %v7525_v20  ;;  %v3047_v29 = vmul.f32 %v4983_v43, %v9051_v56 }
 0x702   : > { %4996 = vrcp.f32 %v3807_v48  ;;  %v3913_v21 = vpack.c.bf16 %v3849_v11, %v3847_v16  ;;  %v3912_v30 = vpack.c.bf16 %v3848_v12, %v3846_v15  ;;  %v9054_v11 = vld [vmem:[#allocation51_spill] sm:$0xff] }
 0x703   : > { %v4985_v61 = vpop.eup %4984  ;;  %3100 = vmatpush1.bf16.xpose.msra.mxu1 %v3053_v40  ;;  %v3798_v62 = vpop.xlane.xlu0 %3797  ;;  %4998 = vrcp.f32 %v2939_v0 }
 0x704   : > { %3958 = vmatprep.subr.bf16.mxu0 %v3913_v21  ;;  %v3050_v14 = vmul.f32 %v4985_v61, %v7545_v59  ;;  %v3049_v6 = vmul.f32 %v4985_v61, %v9050_v10  ;;  %v4987_v3 = vpop.eup %4986  ;;  %v9056_v61 = vld [vmem:[#allocation66_spill] sm:$0xff] }
 0x705   : > { %3959 = vmatpush1.bf16.xpose.msra.mxu0 %v3912_v30  ;;  %v2942_v7 = vpop.xlane.xlu1 %2941  ;;  %v3907_v50 = vmul.f32 %v4987_v3, %v9052_v41  ;;  %v3906_v59 = vmul.f32 %v4987_v3, %v9053_v19 }
 0x706   : > { %5000 = vrcp.f32 %v2942_v7  ;;  %v3084_v18 = vpack.c.bf16 %v3050_v14, %v3048_v32  ;;  %v3083_v1 = vpack.c.bf16 %v3049_v6, %v3047_v29  ;;  %v9057_v32 = vld [vmem:[#allocation77_spill] sm:$0xff] }
 0x707   : > { %v4989_v37 = vpop.eup %4988  ;;  %5002 = vrcp.f32 %v3798_v62  ;;  %v2933_v23 = vpop.xlane.xlu0 %2932 }
 0x708   : > { %3101 = vmatprep.subr.bf16.mxu1 %v3084_v18  ;;  %v3909_v20 = vmul.f32 %v4989_v37, %v7585_v46  ;;  %v3908_v45 = vmul.f32 %v4989_v37, %v7579_v58  ;;  %v4991_v53 = vpop.eup %4990  ;;  %v9055_v58 = vld [vmem:[#allocation102_spill] sm:$0xff]  ;;  %v9058_v37 = vld [vmem:[#allocation97_spill] sm:$0xff] }
 0x709   : > { %v3801_v28 = vpop.xlane.xlu1 %3800  ;;  %v3044_v38 = vmul.f32 %v4991_v53, %v7565_v42  ;;  %v3043_v12 = vmul.f32 %v4991_v53, %v9055_v58 }
 0x70a   : > { %5004 = vrcp.f32 %v3801_v28  ;;  %v3943_v44 = vpack.c.bf16 %v3909_v20, %v3907_v50  ;;  %v3942_v35 = vpack.c.bf16 %v3908_v45, %v3906_v59 }
 0x70b   : > { %v4993_v0 = vpop.eup %4992  ;;  %3102 = vmatpush2.bf16.xpose.msra.mxu1 %v3083_v1  ;;  %v3792_v40 = vpop.xlane.xlu0 %3791  ;;  %5006 = vrcp.f32 %v2933_v23 }
 0x70c   : > { %3960 = vmatprep.subr.bf16.mxu0 %v3943_v44  ;;  %v3046_v16 = vmul.f32 %v4993_v0, %v7595_v55  ;;  %v3045_v46 = vmul.f32 %v4993_v0, %v9054_v11  ;;  %v4995_v25 = vpop.eup %4994  ;;  %v9060_v44 = vld [vmem:[#allocation92_spill] sm:$0xff] }
 0x70d   : > { %3961 = vmatpush2.bf16.xpose.msra.mxu0 %v3942_v35  ;;  %v2936_v15 = vpop.xlane.xlu1 %2935  ;;  %v3903_v62 = vmul.f32 %v4995_v25, %v9056_v61  ;;  %v3902_v55 = vmul.f32 %v4995_v25, %v9057_v32 }
 0x70e   : > { %5008 = vrcp.f32 %v2936_v15  ;;  %v3082_v43 = vpack.c.bf16 %v3046_v16, %v3044_v38  ;;  %v3081_v30 = vpack.c.bf16 %v3045_v46, %v3043_v12 }
 0x70f   : > { %v4997_v48 = vpop.eup %4996  ;;  %5010 = vrcp.f32 %v3792_v40  ;;  %v2927_v21 = vpop.xlane.xlu0 %2926 }
 0x710   : > { %3103 = vmatprep.subr.bf16.mxu1 %v3082_v43  ;;  %v3905_v42 = vmul.f32 %v4997_v48, %v7615_v47  ;;  %v3904_v14 = vmul.f32 %v4997_v48, %v7609_v33  ;;  %v4999_v10 = vpop.eup %4998  ;;  %v9059_v33 = vld [vmem:[#allocation47_spill] sm:$0xff] }
 0x711   : > { %v3795_v6 = vpop.xlane.xlu1 %3794  ;;  %v3040_v23 = vmul.f32 %v4999_v10, %v9058_v37  ;;  %v3039_v50 = vmul.f32 %v4999_v10, %v9059_v33  ;;  %v9069_v33 = vld [vmem:[#allocation13_spill] sm:$0xff] }
 0x712   : > { %5012 = vrcp.f32 %v3795_v6  ;;  %v3941_v3 = vpack.c.bf16 %v3905_v42, %v3903_v62  ;;  %v3940_v7 = vpack.c.bf16 %v3904_v14, %v3902_v55  ;;  %v9064_v14 = vld [vmem:[#allocation80_spill] sm:$0xff]  ;;  %v9065_v6 = vld [vmem:[#allocation99_spill] sm:$0xff] }
 0x713   : > { %v5001_v56 = vpop.eup %5000  ;;  %3104 = vmatpush2.bf16.xpose.msra.mxu1 %v3081_v30  ;;  %v3786_v29 = vpop.xlane.xlu0 %3785  ;;  %5014 = vrcp.f32 %v2927_v21  ;;  %v9061_v21 = vld [vmem:[#allocation128_spill] sm:$0xff] }
 0x714   : > { %v5003_v18 = vpop.eup %5002  ;;  %3962 = vmatprep.subr.bf16.mxu0 %v3941_v3  ;;  %v3042_v1 = vmul.f32 %v5001_v56, %v7635_v2  ;;  %v3041_v47 = vmul.f32 %v5001_v56, %v7629_v27  ;;  %v9066_v3 = vld [vmem:[#allocation101_spill] sm:$0xff] }
 0x715   : > { %3963 = vmatpush2.bf16.xpose.msra.mxu0 %v3940_v7  ;;  %v2930_v41 = vpop.xlane.xlu1 %2929  ;;  %v3899_v53 = vmul.f32 %v5003_v18, %v7625_v60  ;;  %v3898_v35 = vmul.f32 %v5003_v18, %v9060_v44 }
 0x716   : > { %5016 = vrcp.f32 %v2930_v41  ;;  %v3080_v20 = vpack.c.bf16 %v3042_v1, %v3040_v23  ;;  %v3079_v45 = vpack.c.bf16 %v3041_v47, %v3039_v50  ;;  %v9068_v47 = vld [vmem:[#allocation100_spill] sm:$0xff] }
 0x717   : > { %v5005_v19 = vpop.eup %5004  ;;  %v2921_v59 = vpop.xlane.xlu0 %2920  ;;  %5018 = vrcp.f32 %v3786_v29  ;;  %v9067_v29 = vld [vmem:[#allocation98_spill] sm:$0xff] }
 0x718   : > { %3105 = vmatprep.subr.bf16.mxu1 %v3080_v20  ;;  %v3901_v28 = vmul.f32 %v5005_v19, %v7653_v24  ;;  %v3900_v2 = vmul.f32 %v5005_v19, %v7647_v4  ;;  %v5007_v27 = vpop.eup %5006  ;;  %v9070_v20 = vld [vmem:[#allocation127_spill] sm:$0xff] }
 0x719   : > { %v3789_v0 = vpop.xlane.xlu1 %3788  ;;  %v3036_v60 = vmul.f32 %v5007_v27, %v7643_v49  ;;  %v3035_v4 = vmul.f32 %v5007_v27, %v7638_v8  ;;  %v9062_v49 = vld [vmem:[#allocation95_spill] sm:$0xff] }
 0x71a   : > { %5020 = vrcp.f32 %v3789_v0  ;;  %v3939_v40 = vpack.c.bf16 %v3901_v28, %v3899_v53  ;;  %v3938_v38 = vpack.c.bf16 %v3900_v2, %v3898_v35  ;;  %v9072_v2 = vld [vmem:[#allocation76_spill] sm:$0xff]  ;;  %v9073_v0 = vld [vmem:[#allocation103_spill] sm:$0xff] }
 0x71b   : > { %v5009_v16 = vpop.eup %5008  ;;  %3106 = vmatpush2.bf16.xpose.msra.mxu1 %v3079_v45  ;;  %5022 = vrcp.f32 %v2921_v59  ;;  %v3780_v25 = vpop.xlane.xlu0 %3779  ;;  %v9071_v59 = vld [vmem:[#allocation115_spill] sm:$0xff] }
 0x71c   : > { %v5011_v11 = vpop.eup %5010  ;;  %3964 = vmatprep.subr.bf16.mxu0 %v3939_v40  ;;  %v3038_v46 = vmul.f32 %v5009_v16, %v7667_v39  ;;  %v3037_v24 = vmul.f32 %v5009_v16, %v7662_v9  ;;  %v9063_v39 = vld [vmem:[#allocation81_spill] sm:$0xff] }
 0x71d   : > { %3965 = vmatpush2.bf16.xpose.msra.mxu0 %v3938_v38  ;;  %v2924_v15 = vpop.xlane.xlu1 %2923  ;;  %v3895_v48 = vmul.f32 %v5011_v11, %v7659_v54  ;;  %v3894_v61 = vmul.f32 %v5011_v11, %v9062_v49  ;;  %v9074_v38 = vld [vmem:[#allocation90_spill] sm:$0xff] }
 0x71e   : > { %5024 = vrcp.f32 %v2924_v15  ;;  %v3078_v58 = vpack.c.bf16 %v3038_v46, %v3036_v60  ;;  %v3077_v43 = vpack.c.bf16 %v3037_v24, %v3035_v4  ;;  %v9075_v60 = vld [vmem:[#allocation75_spill] sm:$0xff]  ;;  %v9076_v4 = vld [vmem:[#allocation114_spill] sm:$0xff] }
 0x71f   : > { %v5013_v12 = vpop.eup %5012  ;;  %5026 = vrcp.f32 %v3780_v25 }
 0x720   : > { %3107 = vmatprep.subr.bf16.mxu1 %v3078_v58  ;;  %v3897_v30 = vmul.f32 %v5013_v12, %v9061_v21  ;;  %v3896_v62 = vmul.f32 %v5013_v12, %v9063_v39  ;;  %v5015_v9 = vpop.eup %5014  ;;  %v9077_v12 = vld [vmem:[#allocation9_spill] sm:$0xff] }
 0x721   : > { %v3783_v42 = vpop.xlane.xlu1 %3782  ;;  %v3032_v10 = vmul.f32 %v5015_v9, %v9064_v14  ;;  %v3031_v18 = vmul.f32 %v5015_v9, %v9067_v29 }
 0x722   : > { %5028 = vrcp.f32 %v3783_v42  ;;  %v3937_v32 = vpack.c.bf16 %v3897_v30, %v3895_v48  ;;  %v3936_v55 = vpack.c.bf16 %v3896_v62, %v3894_v61  ;;  %v9078_v48 = vld [vmem:[#allocation94_spill] sm:$0xff]  ;;  %v9079_v30 = vld [vmem:[#allocation53_spill] sm:$0xff] }
 0x723   : > { %v5017_v8 = vpop.eup %5016  ;;  %3108 = vmatpush2.bf16.xpose.msra.mxu1 %v3077_v43 }
 0x724   : > { %3966 = vmatprep.subr.bf16.mxu0 %v3937_v32  ;;  %v3034_v54 = vmul.f32 %v5017_v8, %v9065_v6  ;;  %v3033_v7 = vmul.f32 %v5017_v8, %v9066_v3  ;;  %v5019_v56 = vpop.eup %5018 }
 0x725   : > { %3967 = vmatpush2.bf16.xpose.msra.mxu0 %v3936_v55  ;;  %v3891_v41 = vmul.f32 %v5019_v56, %v9068_v47  ;;  %v3890_v19 = vmul.f32 %v5019_v56, %v9070_v20 }
 0x726   : > { %v3076_v37 = vpack.c.bf16 %v3034_v54, %v3032_v10  ;;  %v3075_v1 = vpack.c.bf16 %v3033_v7, %v3031_v18 }
 0x727   : > { %v5021_v23 = vpop.eup %5020 }
 0x728   : > { %3109 = vmatprep.subr.bf16.mxu1 %v3076_v37  ;;  %v3893_v50 = vmul.f32 %v5021_v23, %v9069_v33  ;;  %v3892_v45 = vmul.f32 %v5021_v23, %v9071_v59  ;;  %v5023_v53 = vpop.eup %5022 }
 0x729   : > { %v3028_v27 = vmul.f32 %v5023_v53, %v9072_v2  ;;  %v3027_v46 = vmul.f32 %v5023_v53, %v9075_v60  ;;  %v9080_v53 = vld [vmem:[#allocation118_spill] sm:$0xff] }
 0x72a   : > { %v3935_v28 = vpack.c.bf16 %v3893_v50, %v3891_v41  ;;  %v3934_v44 = vpack.c.bf16 %v3892_v45, %v3890_v19  ;;  %v9082_v2 = vld [vmem:[#allocation122_spill] sm:$0xff] }
 0x72b   : > { %v5025_v35 = vpop.eup %5024  ;;  %3110 = vmatpush2.bf16.xpose.msra.mxu1 %v3075_v1 }
 0x72c   : > { %3968 = vmatprep.subr.bf16.mxu0 %v3935_v28  ;;  %v3030_v40 = vmul.f32 %v5025_v35, %v9073_v0  ;;  %v3029_v16 = vmul.f32 %v5025_v35, %v9074_v38  ;;  %v5027_v11 = vpop.eup %5026  ;;  %v9084_v0 = vld [vmem:[#allocation31_spill] sm:$0xff] }
 0x72d   : > { %3969 = vmatpush2.bf16.xpose.msra.mxu0 %v3934_v44  ;;  %v3887_v58 = vmul.f32 %v5027_v11, %v9076_v4  ;;  %v3886_v21 = vmul.f32 %v5027_v11, %v9078_v48  ;;  %v9081_v44 = vld [vmem:[#allocation11_spill] sm:$0xff]  ;;  %v9088_v11 = vld [vmem:[#allocation33_spill] sm:$0xff] }
 0x72e   : > { %v3074_v24 = vpack.c.bf16 %v3030_v40, %v3028_v27  ;;  %v3073_v15 = vpack.c.bf16 %v3029_v16, %v3027_v46  ;;  %v9083_v27 = vld [vmem:[#allocation106_spill] sm:$0xff]  ;;  %v9085_v40 = vld [vmem:[#allocation29_spill] sm:$0xff]  ;;  %v9087_v16 = vld [vmem:[#allocation35_spill] sm:$0xff] }
 0x72f   : > { %v5029_v25 = vpop.eup %5028  ;;  %v9086_v38 = vpack.c.bf16 %v9084_v0, %v9085_v40  ;;  %v9089_v60 = vpack.c.bf16 %v9087_v16, %v9088_v11 }
 0x730   : > { %3111 = vmatprep.subr.bf16.mxu1 %v3074_v24  ;;  %v3889_v43 = vmul.f32 %v5029_v25, %v9077_v12  ;;  %v3888_v49 = vmul.f32 %v5029_v25, %v9079_v30 }
 0x732   : > { %v3933_v61 = vpack.c.bf16 %v3889_v43, %v3887_v58  ;;  %v3932_v39 = vpack.c.bf16 %v3888_v49, %v3886_v21 }
 0x733   : > { %3112 = vmatpush2.bf16.xpose.msra.mxu1 %v3073_v15 }
 0x734   : > { %3970 = vmatprep.subr.bf16.mxu0 %v3933_v61 }
 0x735   : > { %3971 = vmatpush2.bf16.xpose.msra.mxu0 %v3932_v39 }
 0x757   : > { %v2915_v62 = vpop.xlane.xlu0 %2914 }
 0x758   : > { %5030 = vrcp.f32 %v2915_v62 }
 0x75b   : > { %v3774_v9 = vpop.xlane.xlu0 %3773 }
 0x75c   : > { %v2918_v42 = vpop.xlane.xlu1 %2917 }
 0x75d   : > { %5032 = vrcp.f32 %v2918_v42 }
 0x75e   : > { %5034 = vrcp.f32 %v3774_v9 }
 0x760   : > { %v3777_v32 = vpop.xlane.xlu1 %3776 }
 0x761   : > { %5036 = vrcp.f32 %v3777_v32 }
 0x765   : > { %v5031_v55 = vpop.eup %5030 }
 0x766   : > { %v3024_v10 = vmul.f32 %v5031_v55, %v7762_v22  ;;  %v3023_v3 = vmul.f32 %v5031_v55, %v7757_v5 }
 0x767   : > { %v2909_v8 = vpop.xlane.xlu0 %2908 }
 0x768   : > { %5038 = vrcp.f32 %v2909_v8 }
 0x76a   : > { %v5033_v14 = vpop.eup %5032 }
 0x76b   : > { %v5035_v6 = vpop.eup %5034  ;;  %v3026_v54 = vmul.f32 %v5033_v14, %v7784_v57  ;;  %v3025_v7 = vmul.f32 %v5033_v14, %v7777_v52  ;;  %v3768_v56 = vpop.xlane.xlu0 %3767 }
 0x76c   : > { %v2912_v29 = vpop.xlane.xlu1 %2911  ;;  %v3883_v1 = vmul.f32 %v5035_v6, %v7773_v31  ;;  %v3882_v47 = vmul.f32 %v5035_v6, %v7771_v51 }
 0x76d   : > { %5040 = vrcp.f32 %v2912_v29  ;;  %v3072_v18 = vpack.c.bf16 %v3026_v54, %v3024_v10  ;;  %v3071_v37 = vpack.c.bf16 %v3025_v7, %v3023_v3 }
 0x76e   : > { %v5037_v23 = vpop.eup %5036  ;;  %5042 = vrcp.f32 %v3768_v56 }
 0x76f   : > { %3113 = vmatprep.subr.bf16.mxu1 %v3072_v18  ;;  %v3885_v22 = vmul.f32 %v5037_v23, %v7799_v36  ;;  %v3884_v57 = vmul.f32 %v5037_v23, %v7797_v17 }
 0x770   : > { %3114 = vmatpush2.bf16.xpose.msra.mxu1 %v3071_v37  ;;  %v3771_v5 = vpop.xlane.xlu1 %3770 }
 0x771   : > { %5044 = vrcp.f32 %v3771_v5  ;;  %v3931_v52 = vpack.c.bf16 %v3885_v22, %v3883_v1  ;;  %v3930_v41 = vpack.c.bf16 %v3884_v57, %v3882_v47 }
 0x773   : > { %3972 = vmatprep.subr.bf16.mxu0 %v3931_v52 }
 0x774   : > { %3973 = vmatpush2.bf16.xpose.msra.mxu0 %v3930_v41 }
 0x775   : > { %v5039_v33 = vpop.eup %5038 }
 0x776   : > { %v3020_v20 = vmul.f32 %v5039_v33, %v7814_v34  ;;  %v3019_v19 = vmul.f32 %v5039_v33, %v7809_v13 }
 0x77a   : > { %v5041_v50 = vpop.eup %5040 }
 0x77b   : > { %v3022_v31 = vmul.f32 %v5041_v50, %v7828_v26  ;;  %v3021_v36 = vmul.f32 %v5041_v50, %v7823_v63  ;;  %v5043_v51 = vpop.eup %5042 }
 0x77c   : > { %v3879_v28 = vmul.f32 %v5043_v51, %v9080_v53  ;;  %v3878_v34 = vmul.f32 %v5043_v51, %v9082_v2 }
 0x77d   : > { %v3070_v59 = vpack.c.bf16 %v3022_v31, %v3020_v20  ;;  %v3069_v17 = vpack.c.bf16 %v3021_v36, %v3019_v19 }
 0x77e   : > { %v5045_v45 = vpop.eup %5044 }
 0x77f   : > { %3115 = vmatprep.subr.bf16.mxu1 %v3070_v59  ;;  %v3881_v35 = vmul.f32 %v5045_v45, %v9081_v44  ;;  %v3880_v26 = vmul.f32 %v5045_v45, %v9083_v27 }
 0x780   : > { %3116 = vmatpush2.bf16.xpose.msra.mxu1 %v3069_v17 }
 0x781   : > { %v3929_v13 = vpack.c.bf16 %v3881_v35, %v3879_v28  ;;  %v3928_v63 = vpack.c.bf16 %v3880_v26, %v3878_v34 }
 0x783   : > { %3974 = vmatprep.subr.bf16.mxu0 %v3929_v13 }
 0x784   : > { %3975 = vmatpush2.bf16.xpose.msra.mxu0 %v3928_v63 }
 0x787   : > { %3118 = vmatmul.mubr.bf16.vlgmr.msra.gmra.mxu1 %v9086_v38 }
 0x78b   : > { %3977 = vmatmul.mubr.bf16.vlgmr.msra.gmra.mxu0 %v9089_v60 }
 0x847   : > { %v3119_v46 = vpop.f32.mrf.mxu1 }
 0x848   : > { %3128 = vst [vmem:[%s6737_s27 + $0x40] sm:$0xff] %v3119_v46 }
 0x849   : > { %v3121_v24 = vpop.f32.mrf.mxu1 }
 0x84a   : > { %3129 = vst [vmem:[%s6737_s27 + $0x48] sm:$0xff] %v3121_v24 }
 0x84b   : > { %v3123_v25 = vpop.f32.mrf.mxu1  ;;  %v3978_v15 = vpop.f32.mrf.mxu0 }
 0x84c   : > { %3130 = vst [vmem:[%s6737_s27 + $0x50] sm:$0xff] %v3123_v25  ;;  %3987 = vst [vmem:[%s6737_s27 + $0x60] sm:$0xff] %v3978_v15 }
 0x84d   : > { %v3125_v4 = vpop.f32.mrf.mxu1  ;;  %v3980_v58 = vpop.f32.mrf.mxu0 }
 0x84e   : > { %3131 = vst [vmem:[%s6737_s27 + $0x58] sm:$0xff] %v3125_v4  ;;  %3988 = vst [vmem:[%s6737_s27 + $0x68] sm:$0xff] %v3980_v58 }
 0x84f   : > { %v3982_v12 = vpop.f32.mrf.mxu0 }
 0x850   : > { %3989 = vst [vmem:[%s6737_s27 + $0x70] sm:$0xff] %v3982_v12 }
 0x851   : > { %v3984_v43 = vpop.f32.mrf.mxu0 }
 0x852   : > { %3990 = vst [vmem:[%s6737_s27 + $0x78] sm:$0xff] %v3984_v43 }
 0x853   : > { %5085 = shalt.err (!%p5082_p0)
}
 0x854   : > { %s5086_s10 = scalar_lea.hbm %s7952_s5, 2048  ;;  %s5090_s19 = scalar_lea.hbm %s8003_s3, 4096 }
 0x855   : > { %p5087_p1 = scmp.ne.s32.totalorder %s7952_s5, %s5086_s10  ;;  %p5091_p4 = scmp.lt.s32.totalorder %s7952_s5, %s8003_s3 }
 0x856   : > { %p5092_p7 = scmp.lt.s32.totalorder %s5090_s19, %s5086_s10 }
 0x857   : > { %p5088_p2 = pnand %p5087_p1, %p5203_p5 }
 0x858   : > { %p5093_p8 = por %p5092_p7, %p5091_p4 }
 0x859   : > { %p5089_p3 = pneg %p5088_p2 }
 0x85b   : > { %p5094_p6 = pnand %p5093_p8, %p5089_p3 }
 0x85d   : > { %5097 = shalt.err (!%p5094_p6)
}
 0x85e   : > { %s5143_s25 = smov 256   ;;  %s5144_s26 = smov 16  }
 0x85f   : > { %4203 = dma.vmem_to_hbm [thread:$0]  (%p5203_p5), %s7954_s29, 2048, %s7952_s5, %s7960_s16, %s5143_s25, %s5143_s25, %s5144_s26  }
 0x860 PF: > { %p4215_p9 = scmp.ge.s32.totalorder %s5136_s15, 2  ;;  %s4020_s27 = sand.u32 1, %s5124_s12  }
 0x861   : > { %p9090_p10 = scmp.ne.s32.totalorder %s8353_s23, 0  ;;  %s4021_s28 = scalar_lea.sflag [#allocation5], %s4020_s27 }
 0x863   : > { %p4210_p11 = pnand %p4215_p9, %p9090_p10 }
 0x865   : > { %p4211_p12 = pneg %p4210_p11 }
 0x867   : > { %5119 = dma.done.wait (%p4211_p12), %s4021_s28, 2048  }
 0x868   : > { %5121 = vsyncadd (%p4211_p12), %s4021_s28, 4294965248  ;;  %p14_p13 = scmp.ge.s32.totalorder %s5190_s18, 4   ;;  %s9091_s12 = smov %s5128_s13 }
 0x869   : > { %s9092_s13 = smov %s5132_s14  ;;  %s9093_s14 = smov %s5201_s21 }
 0x86a   : > { %s9094_s15 = smov %s5190_s18  ;;  %16 = sbr.rel (!%p14_p13) target bundleno = 4 (0x4), region = 75 }
 0x86f   :  { %4026 = vsyncpa [#allocation4], 1 }
 0x870   :  { %4028 = vsyncpa [#allocation4 + $0x1], 1 }
 0x871   :  { %4029 = vsyncpa [#allocation5], 1 }
 0x872   :  { %4031 = vsyncpa [#allocation5 + $0x1], 1 }

</bundles_post_ra>
